<compile_context>
chip_gen: v7x
topology: tpu7x:2x2x1
jax: 0.10.0
libtpu: 0.0.40
codegen_flags: <defaults>
</compile_context>

<pallas_src>
import functools

import jax
import jax.numpy as jnp
from jax import lax
from jax.experimental import pallas as pl
from jax.experimental.pallas import tpu as pltpu

EPS = 1e-5
NEG_SLOPE = 0.01


# ----------------------------------------------------------------------------
# Fused Pallas kernel: whole 2-block residual stack for one sample.
# ----------------------------------------------------------------------------
def stack_kernel(taps_ref, w1_ref, ws_ref, wb_ref, g_ref, b_ref, s_ref, st_ref,
                 o_ref, pad_ref, *, ho, wo, cout, eps, neg_slope):
    """Layouts (per sample):
      activations:  (ho, wo*cout)              rows = h, lanes = w*cout + c
      taps_ref:     (1, 9, ho, wo*cin)         stride-2 windows of the padded input
      w1_ref:       (9, wo*cin, wo*cout)       block-diag weights, block-1 conv1
      ws_ref:       (wo*cin, wo*cout)          block-diag 1x1 skip conv
      wb_ref:       (3, 9, wo*cout, wo*cout)   block-diag weights: b1.conv2, b2.conv1, b2.conv2
      g_ref/b_ref:  (5, wo*cout)               lane-tiled InstanceNorm gamma/beta
      s_ref:        (wo*cout, cout)            per-channel lane selector (sum over w)
      st_ref:       (cout, wo*cout)            its transpose (broadcast back over w)
      o_ref:        (1, ho, wo*cout)
      pad_ref:      (ho+2, (wo+2)*cout)        zero-bordered conv canvas (VMEM scratch)
    """
    lanes = wo * cout
    inv_p = 1.0 / float(ho * wo)

    sel = s_ref[...]            # (lanes, cout)
    selt = st_ref[...]          # (cout, lanes)
    gam = g_ref[...]            # (5, lanes)
    bet = b_ref[...]            # (5, lanes)

    def lrelu(v):
        return jnp.where(v >= 0, v, neg_slope * v)

    def inst_norm(y, i):
        # Per-(sample, channel) stats over all ho*wo positions, single pass.
        s1 = jnp.dot(jnp.sum(y, axis=0, keepdims=True), sel,
                     preferred_element_type=jnp.float32)            # (1, cout)
        s2 = jnp.dot(jnp.sum(y * y, axis=0, keepdims=True), sel,
                     preferred_element_type=jnp.float32)            # (1, cout)
        mean = s1 * inv_p
        rstd = lax.rsqrt(s2 * inv_p - mean * mean + eps)            # EUP slot
        mean_l = jnp.dot(mean, selt, preferred_element_type=jnp.float32)  # (1, lanes)
        rstd_l = jnp.dot(rstd, selt, preferred_element_type=jnp.float32)
        return (y - mean_l) * rstd_l * gam[i:i + 1] + bet[i:i + 1]

    def conv3x3_same(y, widx):
        # 3x3 / stride 1 / pad 1 conv as 9 shifted-window sub-matmuls.
        pad_ref[1:1 + ho, cout:cout + lanes] = y                    # interior write
        acc = jnp.zeros((ho, lanes), jnp.float32)
        for t in range(9):
            ky, kx = t // 3, t % 3
            win = pad_ref[ky:ky + ho, kx * cout:kx * cout + lanes]  # (ho, lanes)
            acc = acc + jnp.dot(win, wb_ref[widx, t],
                                preferred_element_type=jnp.float32)
        return acc

    # Zero the canvas once per invocation; the border is never written afterwards.
    pad_ref[...] = jnp.zeros(pad_ref.shape, jnp.float32)

    # ---------------- Block 1 ----------------
    # conv1: 3x3 stride 2 via the 9 precomputed tap windows of the padded input.
    acc = jnp.zeros((ho, lanes), jnp.float32)
    for t in range(9):
        acc = acc + jnp.dot(taps_ref[0, t], w1_ref[t],
                            preferred_element_type=jnp.float32)
    y1 = lrelu(inst_norm(acc, 0))

    # conv2: 3x3 stride 1, norm, no nonlin.
    main = inst_norm(conv3x3_same(y1, 0), 1)

    # skip: AvgPool(2,2) == mean of the 4 "interior" stride-2 taps, then 1x1 conv + IN.
    pool = (taps_ref[0, 4] + taps_ref[0, 5] + taps_ref[0, 7] + taps_ref[0, 8]) * 0.25
    skip = inst_norm(jnp.dot(pool, ws_ref[...],
                             preferred_element_type=jnp.float32), 2)

    r1 = lrelu(main + skip)

    # ---------------- Block 2 ----------------
    y2 = lrelu(inst_norm(conv3x3_same(r1, 1), 3))
    main2 = inst_norm(conv3x3_same(y2, 2), 4)
    o_ref[0] = lrelu(main2 + r1)


# ----------------------------------------------------------------------------
# Wrapper: lane-packed weight prep + single pallas_call.
# ----------------------------------------------------------------------------
def _kron_eye(m, wo):
    """m: (ci, co) -> block-diagonal (wo*ci, wo*co) acting on lane-packed (w*ci+c) rows."""
    ci, co = m.shape
    eye = jnp.eye(wo, dtype=m.dtype)
    return jnp.einsum("ij,co->icjo", eye, m).reshape(wo * ci, wo * co)


def _kron_eye_taps(w, wo):
    """w: (3, 3, ci, co) -> (9, wo*ci, wo*co)."""
    ci, co = w.shape[2], w.shape[3]
    wt = w.reshape(9, ci, co)
    return jnp.stack([_kron_eye(wt[t], wo) for t in range(9)])


@jax.jit
def stacked_residual_blocks_forward(x_nchw, params):
    """StackedResidualBlocks.forward (2 x BasicBlockD). Input NCHW like PyTorch."""
    p1, p2 = params
    B, cin, H, W = x_nchw.shape
    cout = p1["w1"].shape[-1]
    ho, wo = H // 2, W // 2
    lanes = wo * cout

    # NCHW -> NHWC, pad by 1, extract the 9 stride-2 tap windows for block-1/conv1.
    x = jnp.transpose(x_nchw, (0, 2, 3, 1)).astype(jnp.float32)
    xp = jnp.pad(x, ((0, 0), (1, 1), (1, 1), (0, 0)))
    taps = []
    for ky in range(3):
        for kx in range(3):
            sl = xp[:, ky:ky + 2 * ho:2, kx:kx + 2 * wo:2, :]        # (B, ho, wo, cin)
            taps.append(sl.reshape(B, ho, wo * cin))
    taps0 = jnp.stack(taps, axis=1)                                  # (B, 9, ho, wo*cin)

    # Block-diagonal (lane-packed) weights.
    w1bd = _kron_eye_taps(p1["w1"], wo)                              # (9, wo*cin, lanes)
    wsbd = _kron_eye(p1["ws"].reshape(cin, cout), wo)                # (wo*cin, lanes)
    wbd = jnp.stack([_kron_eye_taps(p1["w2"], wo),
                     _kron_eye_taps(p2["w1"], wo),
                     _kron_eye_taps(p2["w2"], wo)])                  # (3, 9, lanes, lanes)

    gam = jnp.stack([jnp.tile(p1["g1"], wo), jnp.tile(p1["g2"], wo), jnp.tile(p1["gs"], wo),
                     jnp.tile(p2["g1"], wo), jnp.tile(p2["g2"], wo)])   # (5, lanes)
    bet = jnp.stack([jnp.tile(p1["b1"], wo), jnp.tile(p1["b2"], wo), jnp.tile(p1["bs"], wo),
                     jnp.tile(p2["b1"], wo), jnp.tile(p2["b2"], wo)])   # (5, lanes)
    sel = jnp.tile(jnp.eye(cout, dtype=jnp.float32), (wo, 1))           # (lanes, cout)
    selt = sel.T                                                        # (cout, lanes)

    kern = functools.partial(stack_kernel, ho=ho, wo=wo, cout=cout,
                             eps=EPS, neg_slope=NEG_SLOPE)

    out = pl.pallas_call(
        kern,
        out_shape=jax.ShapeDtypeStruct((B, ho, lanes), jnp.float32),
        grid=(B,),
        in_specs=[
            pl.BlockSpec((1, 9, ho, wo * cin), lambda b: (b, 0, 0, 0)),
            pl.BlockSpec((9, wo * cin, lanes), lambda b: (0, 0, 0)),
            pl.BlockSpec((wo * cin, lanes), lambda b: (0, 0)),
            pl.BlockSpec((3, 9, lanes, lanes), lambda b: (0, 0, 0, 0)),
            pl.BlockSpec((5, lanes), lambda b: (0, 0)),
            pl.BlockSpec((5, lanes), lambda b: (0, 0)),
            pl.BlockSpec((lanes, cout), lambda b: (0, 0)),
            pl.BlockSpec((cout, lanes), lambda b: (0, 0)),
        ],
        out_specs=pl.BlockSpec((1, ho, lanes), lambda b: (b, 0, 0)),
        scratch_shapes=[pltpu.VMEM((ho + 2, (wo + 2) * cout), jnp.float32)],
        compiler_params=pltpu.CompilerParams(dimension_semantics=("parallel",)),
    )(taps0, w1bd, wsbd, wbd, gam, bet, sel, selt)

    # (B, ho, wo*cout) lane-packed -> NHWC -> NCHW.
    return jnp.transpose(out.reshape(B, ho, wo, cout), (0, 3, 1, 2))


# ----------------------------------------------------------------------------
# Deterministic parameter init + pure-JAX reference
# ----------------------------------------------------------------------------
def init_params(key, cin, cout, n_blocks, initial_stride):
    params = []
    c_prev = cin
    for n in range(n_blocks):
        stride = initial_stride if n == 0 else 1
        key, *ks = jax.random.split(key, 8)
        p = {
            "w1": jax.random.normal(ks[0], (3, 3, c_prev, cout), jnp.float32) * 0.2,
            "g1": 1.0 + 0.1 * jax.random.normal(ks[1], (cout,), jnp.float32),
            "b1": 0.1 * jax.random.normal(ks[2], (cout,), jnp.float32),
            "w2": jax.random.normal(ks[3], (3, 3, cout, cout), jnp.float32) * 0.2,
            "g2": 1.0 + 0.1 * jax.random.normal(ks[4], (cout,), jnp.float32),
            "b2": 0.1 * jax.random.normal(ks[5], (cout,), jnp.float32),
        }
        if stride != 1 or c_prev != cout:
            key, *kp = jax.random.split(key, 4)
            p["ws"] = jax.random.normal(kp[0], (1, 1, c_prev, cout), jnp.float32) * 0.3
            p["gs"] = 1.0 + 0.1 * jax.random.normal(kp[1], (cout,), jnp.float32)
            p["bs"] = 0.1 * jax.random.normal(kp[2], (cout,), jnp.float32)
        params.append(p)
        c_prev = cout
    return params


def avg_pool2(x, stride):
    B, H, W, C = x.shape
    return x.reshape(B, H // stride, stride, W // stride, stride, C).mean(axis=(2, 4))


def _ref_conv(x, w, stride, padding):
    return lax.conv_general_dilated(
        x, w, (stride, stride), [(padding, padding)] * 2,
        dimension_numbers=("NHWC", "HWIO", "NHWC"))


def _ref_in(y, g, b):
    m = y.mean(axis=(1, 2), keepdims=True)
    v = ((y - m) ** 2).mean(axis=(1, 2), keepdims=True)
    return (y - m) * lax.rsqrt(v + EPS) * g + b


def _ref_lrelu(y):
    return jnp.where(y >= 0, y, NEG_SLOPE * y)


def reference_forward(x_nchw, params, initial_stride):
    x = jnp.transpose(x_nchw, (0, 2, 3, 1)).astype(jnp.float32)
    for i, p in enumerate(params):
        stride = initial_stride if i == 0 else 1
        out = _ref_lrelu(_ref_in(_ref_conv(x, p["w1"], stride, 1), p["g1"], p["b1"]))
        out = _ref_in(_ref_conv(out, p["w2"], 1, 1), p["g2"], p["b2"])
        skip = x
        if stride != 1:
            skip = avg_pool2(skip, stride)
        if "ws" in p:
            skip = _ref_in(_ref_conv(skip, p["ws"], 1, 0), p["gs"], p["bs"])
        x = _ref_lrelu(out + skip)
    return jnp.transpose(x, (0, 3, 1, 2))


# ----------------------------------------------------------------------------
if __name__ == "__main__":
    B, CIN, H, W = 2, 4, 16, 16
    COUT, N_BLOCKS, INITIAL_STRIDE = 8, 2, 2

    key = jax.random.PRNGKey(0)
    k_x, k_p = jax.random.split(key)
    x = jax.random.normal(k_x, (B, CIN, H, W), jnp.float32)          # NCHW, like PyTorch
    params = init_params(k_p, CIN, COUT, N_BLOCKS, INITIAL_STRIDE)

    out = jax.block_until_ready(stacked_residual_blocks_forward(x, params))
    ref = jax.block_until_ready(reference_forward(x, params, INITIAL_STRIDE))

    assert out.shape == (B, COUT, H // INITIAL_STRIDE, W // INITIAL_STRIDE), out.shape
    max_err = float(jnp.max(jnp.abs(out - ref)))
    assert jnp.allclose(out, ref, atol=1e-3, rtol=1e-3), max_err

    print("KERNEL_OK")
</pallas_src>

<mosaic_0001>
module attributes {stable_mosaic.version = 11 : i64} {
  func.func @stack_kernel(%arg0: i32, %arg1: memref<1x9x8x32xf32, #tpu.memory_space<vmem>>, %arg2: memref<9x32x64xf32, #tpu.memory_space<vmem>>, %arg3: memref<32x64xf32, #tpu.memory_space<vmem>>, %arg4: memref<3x9x64x64xf32, #tpu.memory_space<vmem>>, %arg5: memref<5x64xf32, #tpu.memory_space<vmem>>, %arg6: memref<5x64xf32, #tpu.memory_space<vmem>>, %arg7: memref<64x8xf32, #tpu.memory_space<vmem>>, %arg8: memref<8x64xf32, #tpu.memory_space<vmem>>, %arg9: memref<1x8x64xf32, #tpu.memory_space<vmem>>, %arg10: memref<10x80xf32, #tpu.memory_space<vmem>>) attributes {dimension_semantics = [#tpu.dimension_semantics<parallel>], iteration_bounds = array<i64: 2>, scalar_prefetch = 0 : i64, scratch_operands = 1 : i64, tpu.core_type = #tpu.core_type<tc>, window_params = [{transform_indices = @transform_0, window_bounds = array<i64: 1, 9, 8, 32>}, {pipeline_mode = #tpu.pipeline_mode<synchronous>, transform_indices = @transform_1, window_bounds = array<i64: 9, 32, 64>}, {pipeline_mode = #tpu.pipeline_mode<synchronous>, transform_indices = @transform_2, window_bounds = array<i64: 32, 64>}, {pipeline_mode = #tpu.pipeline_mode<synchronous>, transform_indices = @transform_3, window_bounds = array<i64: 3, 9, 64, 64>}, {pipeline_mode = #tpu.pipeline_mode<synchronous>, transform_indices = @transform_4, window_bounds = array<i64: 5, 64>}, {pipeline_mode = #tpu.pipeline_mode<synchronous>, transform_indices = @transform_5, window_bounds = array<i64: 5, 64>}, {pipeline_mode = #tpu.pipeline_mode<synchronous>, transform_indices = @transform_6, window_bounds = array<i64: 64, 8>}, {pipeline_mode = #tpu.pipeline_mode<synchronous>, transform_indices = @transform_7, window_bounds = array<i64: 8, 64>}, {transform_indices = @transform_8, window_bounds = array<i64: 1, 8, 64>}]} {
    %c0 = arith.constant 0 : index
    %c0_0 = arith.constant 0 : index
    %0 = vector.load %arg7[%c0, %c0_0] : memref<64x8xf32, #tpu.memory_space<vmem>>, vector<64x8xf32>
    %c0_1 = arith.constant 0 : index
    %c0_2 = arith.constant 0 : index
    %1 = vector.load %arg8[%c0_1, %c0_2] : memref<8x64xf32, #tpu.memory_space<vmem>>, vector<8x64xf32>
    %c0_3 = arith.constant 0 : index
    %c0_4 = arith.constant 0 : index
    %2 = vector.load %arg5[%c0_3, %c0_4] : memref<5x64xf32, #tpu.memory_space<vmem>>, vector<5x64xf32>
    %c0_5 = arith.constant 0 : index
    %c0_6 = arith.constant 0 : index
    %3 = vector.load %arg6[%c0_5, %c0_6] : memref<5x64xf32, #tpu.memory_space<vmem>>, vector<5x64xf32>
    %cst = arith.constant 0.000000e+00 : f32
    %4 = vector.broadcast %cst : f32 to vector<10x80xf32>
    %c0_7 = arith.constant 0 : index
    %c0_8 = arith.constant 0 : index
    %5 = vector.load %arg10[%c0_7, %c0_8] : memref<10x80xf32, #tpu.memory_space<vmem>>, vector<10x80xf32>
    tpu.vector_store %arg10[%c0_7, %c0_8], %4 {strides = array<i32>} : memref<10x80xf32, #tpu.memory_space<vmem>>, vector<10x80xf32>,
    %cst_9 = arith.constant 0.000000e+00 : f32
    %6 = vector.broadcast %cst_9 : f32 to vector<8x64xf32>
    %c0_10 = arith.constant 0 : index
    %c0_11 = arith.constant 0 : index
    %c0_12 = arith.constant 0 : index
    %c0_13 = arith.constant 0 : index
    %7 = vector.load %arg1[%c0_10, %c0_11, %c0_12, %c0_13] : memref<1x9x8x32xf32, #tpu.memory_space<vmem>>, vector<1x1x8x32xf32>
    %8 = vector.shape_cast %7 : vector<1x1x8x32xf32> to vector<8x32xf32>
    %c0_14 = arith.constant 0 : index
    %c0_15 = arith.constant 0 : index
    %c0_16 = arith.constant 0 : index
    %9 = vector.load %arg2[%c0_14, %c0_15, %c0_16] : memref<9x32x64xf32, #tpu.memory_space<vmem>>, vector<1x32x64xf32>
    %10 = vector.shape_cast %9 : vector<1x32x64xf32> to vector<32x64xf32>
    %cst_17 = arith.constant dense<0.000000e+00> : vector<8x64xf32>
    %11 = tpu.matmul %8, %10, %cst_17 {dimension_numbers = #tpu.dot_dimension_numbers<[1], [0], [0], [1], [0, 0, 1, 1], [], []>} : vector<8x32xf32>, vector<32x64xf32>, vector<8x64xf32> -> vector<8x64xf32>
    %12 = arith.addf %6, %11 : vector<8x64xf32>
    %c0_18 = arith.constant 0 : index
    %c1 = arith.constant 1 : index
    %c0_19 = arith.constant 0 : index
    %c0_20 = arith.constant 0 : index
    %13 = vector.load %arg1[%c0_18, %c1, %c0_19, %c0_20] : memref<1x9x8x32xf32, #tpu.memory_space<vmem>>, vector<1x1x8x32xf32>
    %14 = vector.shape_cast %13 : vector<1x1x8x32xf32> to vector<8x32xf32>
    %c1_21 = arith.constant 1 : index
    %c0_22 = arith.constant 0 : index
    %c0_23 = arith.constant 0 : index
    %15 = vector.load %arg2[%c1_21, %c0_22, %c0_23] : memref<9x32x64xf32, #tpu.memory_space<vmem>>, vector<1x32x64xf32>
    %16 = vector.shape_cast %15 : vector<1x32x64xf32> to vector<32x64xf32>
    %cst_24 = arith.constant dense<0.000000e+00> : vector<8x64xf32>
    %17 = tpu.matmul %14, %16, %cst_24 {dimension_numbers = #tpu.dot_dimension_numbers<[1], [0], [0], [1], [0, 0, 1, 1], [], []>} : vector<8x32xf32>, vector<32x64xf32>, vector<8x64xf32> -> vector<8x64xf32>
    %18 = arith.addf %12, %17 : vector<8x64xf32>
    %c0_25 = arith.constant 0 : index
    %c2 = arith.constant 2 : index
    %c0_26 = arith.constant 0 : index
    %c0_27 = arith.constant 0 : index
    %19 = vector.load %arg1[%c0_25, %c2, %c0_26, %c0_27] : memref<1x9x8x32xf32, #tpu.memory_space<vmem>>, vector<1x1x8x32xf32>
    %20 = vector.shape_cast %19 : vector<1x1x8x32xf32> to vector<8x32xf32>
    %c2_28 = arith.constant 2 : index
    %c0_29 = arith.constant 0 : index
    %c0_30 = arith.constant 0 : index
    %21 = vector.load %arg2[%c2_28, %c0_29, %c0_30] : memref<9x32x64xf32, #tpu.memory_space<vmem>>, vector<1x32x64xf32>
    %22 = vector.shape_cast %21 : vector<1x32x64xf32> to vector<32x64xf32>
    %cst_31 = arith.constant dense<0.000000e+00> : vector<8x64xf32>
    %23 = tpu.matmul %20, %22, %cst_31 {dimension_numbers = #tpu.dot_dimension_numbers<[1], [0], [0], [1], [0, 0, 1, 1], [], []>} : vector<8x32xf32>, vector<32x64xf32>, vector<8x64xf32> -> vector<8x64xf32>
    %24 = arith.addf %18, %23 : vector<8x64xf32>
    %c0_32 = arith.constant 0 : index
    %c3 = arith.constant 3 : index
    %c0_33 = arith.constant 0 : index
    %c0_34 = arith.constant 0 : index
    %25 = vector.load %arg1[%c0_32, %c3, %c0_33, %c0_34] : memref<1x9x8x32xf32, #tpu.memory_space<vmem>>, vector<1x1x8x32xf32>
    %26 = vector.shape_cast %25 : vector<1x1x8x32xf32> to vector<8x32xf32>
    %c3_35 = arith.constant 3 : index
    %c0_36 = arith.constant 0 : index
    %c0_37 = arith.constant 0 : index
    %27 = vector.load %arg2[%c3_35, %c0_36, %c0_37] : memref<9x32x64xf32, #tpu.memory_space<vmem>>, vector<1x32x64xf32>
    %28 = vector.shape_cast %27 : vector<1x32x64xf32> to vector<32x64xf32>
    %cst_38 = arith.constant dense<0.000000e+00> : vector<8x64xf32>
    %29 = tpu.matmul %26, %28, %cst_38 {dimension_numbers = #tpu.dot_dimension_numbers<[1], [0], [0], [1], [0, 0, 1, 1], [], []>} : vector<8x32xf32>, vector<32x64xf32>, vector<8x64xf32> -> vector<8x64xf32>
    %30 = arith.addf %24, %29 : vector<8x64xf32>
    %c0_39 = arith.constant 0 : index
    %c4 = arith.constant 4 : index
    %c0_40 = arith.constant 0 : index
    %c0_41 = arith.constant 0 : index
    %31 = vector.load %arg1[%c0_39, %c4, %c0_40, %c0_41] : memref<1x9x8x32xf32, #tpu.memory_space<vmem>>, vector<1x1x8x32xf32>
    %32 = vector.shape_cast %31 : vector<1x1x8x32xf32> to vector<8x32xf32>
    %c4_42 = arith.constant 4 : index
    %c0_43 = arith.constant 0 : index
    %c0_44 = arith.constant 0 : index
    %33 = vector.load %arg2[%c4_42, %c0_43, %c0_44] : memref<9x32x64xf32, #tpu.memory_space<vmem>>, vector<1x32x64xf32>
    %34 = vector.shape_cast %33 : vector<1x32x64xf32> to vector<32x64xf32>
    %cst_45 = arith.constant dense<0.000000e+00> : vector<8x64xf32>
    %35 = tpu.matmul %32, %34, %cst_45 {dimension_numbers = #tpu.dot_dimension_numbers<[1], [0], [0], [1], [0, 0, 1, 1], [], []>} : vector<8x32xf32>, vector<32x64xf32>, vector<8x64xf32> -> vector<8x64xf32>
    %36 = arith.addf %30, %35 : vector<8x64xf32>
    %c0_46 = arith.constant 0 : index
    %c5 = arith.constant 5 : index
    %c0_47 = arith.constant 0 : index
    %c0_48 = arith.constant 0 : index
    %37 = vector.load %arg1[%c0_46, %c5, %c0_47, %c0_48] : memref<1x9x8x32xf32, #tpu.memory_space<vmem>>, vector<1x1x8x32xf32>
    %38 = vector.shape_cast %37 : vector<1x1x8x32xf32> to vector<8x32xf32>
    %c5_49 = arith.constant 5 : index
    %c0_50 = arith.constant 0 : index
    %c0_51 = arith.constant 0 : index
    %39 = vector.load %arg2[%c5_49, %c0_50, %c0_51] : memref<9x32x64xf32, #tpu.memory_space<vmem>>, vector<1x32x64xf32>
    %40 = vector.shape_cast %39 : vector<1x32x64xf32> to vector<32x64xf32>
    %cst_52 = arith.constant dense<0.000000e+00> : vector<8x64xf32>
    %41 = tpu.matmul %38, %40, %cst_52 {dimension_numbers = #tpu.dot_dimension_numbers<[1], [0], [0], [1], [0, 0, 1, 1], [], []>} : vector<8x32xf32>, vector<32x64xf32>, vector<8x64xf32> -> vector<8x64xf32>
    %42 = arith.addf %36, %41 : vector<8x64xf32>
    %c0_53 = arith.constant 0 : index
    %c6 = arith.constant 6 : index
    %c0_54 = arith.constant 0 : index
    %c0_55 = arith.constant 0 : index
    %43 = vector.load %arg1[%c0_53, %c6, %c0_54, %c0_55] : memref<1x9x8x32xf32, #tpu.memory_space<vmem>>, vector<1x1x8x32xf32>
    %44 = vector.shape_cast %43 : vector<1x1x8x32xf32> to vector<8x32xf32>
    %c6_56 = arith.constant 6 : index
    %c0_57 = arith.constant 0 : index
    %c0_58 = arith.constant 0 : index
    %45 = vector.load %arg2[%c6_56, %c0_57, %c0_58] : memref<9x32x64xf32, #tpu.memory_space<vmem>>, vector<1x32x64xf32>
    %46 = vector.shape_cast %45 : vector<1x32x64xf32> to vector<32x64xf32>
    %cst_59 = arith.constant dense<0.000000e+00> : vector<8x64xf32>
    %47 = tpu.matmul %44, %46, %cst_59 {dimension_numbers = #tpu.dot_dimension_numbers<[1], [0], [0], [1], [0, 0, 1, 1], [], []>} : vector<8x32xf32>, vector<32x64xf32>, vector<8x64xf32> -> vector<8x64xf32>
    %48 = arith.addf %42, %47 : vector<8x64xf32>
    %c0_60 = arith.constant 0 : index
    %c7 = arith.constant 7 : index
    %c0_61 = arith.constant 0 : index
    %c0_62 = arith.constant 0 : index
    %49 = vector.load %arg1[%c0_60, %c7, %c0_61, %c0_62] : memref<1x9x8x32xf32, #tpu.memory_space<vmem>>, vector<1x1x8x32xf32>
    %50 = vector.shape_cast %49 : vector<1x1x8x32xf32> to vector<8x32xf32>
    %c7_63 = arith.constant 7 : index
    %c0_64 = arith.constant 0 : index
    %c0_65 = arith.constant 0 : index
    %51 = vector.load %arg2[%c7_63, %c0_64, %c0_65] : memref<9x32x64xf32, #tpu.memory_space<vmem>>, vector<1x32x64xf32>
    %52 = vector.shape_cast %51 : vector<1x32x64xf32> to vector<32x64xf32>
    %cst_66 = arith.constant dense<0.000000e+00> : vector<8x64xf32>
    %53 = tpu.matmul %50, %52, %cst_66 {dimension_numbers = #tpu.dot_dimension_numbers<[1], [0], [0], [1], [0, 0, 1, 1], [], []>} : vector<8x32xf32>, vector<32x64xf32>, vector<8x64xf32> -> vector<8x64xf32>
    %54 = arith.addf %48, %53 : vector<8x64xf32>
    %c0_67 = arith.constant 0 : index
    %c8 = arith.constant 8 : index
    %c0_68 = arith.constant 0 : index
    %c0_69 = arith.constant 0 : index
    %55 = vector.load %arg1[%c0_67, %c8, %c0_68, %c0_69] : memref<1x9x8x32xf32, #tpu.memory_space<vmem>>, vector<1x1x8x32xf32>
    %56 = vector.shape_cast %55 : vector<1x1x8x32xf32> to vector<8x32xf32>
    %c8_70 = arith.constant 8 : index
    %c0_71 = arith.constant 0 : index
    %c0_72 = arith.constant 0 : index
    %57 = vector.load %arg2[%c8_70, %c0_71, %c0_72] : memref<9x32x64xf32, #tpu.memory_space<vmem>>, vector<1x32x64xf32>
    %58 = vector.shape_cast %57 : vector<1x32x64xf32> to vector<32x64xf32>
    %cst_73 = arith.constant dense<0.000000e+00> : vector<8x64xf32>
    %59 = tpu.matmul %56, %58, %cst_73 {dimension_numbers = #tpu.dot_dimension_numbers<[1], [0], [0], [1], [0, 0, 1, 1], [], []>} : vector<8x32xf32>, vector<32x64xf32>, vector<8x64xf32> -> vector<8x64xf32>
    %60 = arith.addf %54, %59 : vector<8x64xf32>
    %cst_74 = arith.constant dense<0.000000e+00> : vector<64xf32>
    %61 = vector.multi_reduction <add>, %60, %cst_74 [0] : vector<8x64xf32> to vector<64xf32>
    %62 = vector.shape_cast %61 : vector<64xf32> to vector<1x64xf32>
    %cst_75 = arith.constant dense<0.000000e+00> : vector<1x8xf32>
    %63 = tpu.matmul %62, %0, %cst_75 {dimension_numbers = #tpu.dot_dimension_numbers<[1], [0], [0], [1], [0, 0, 1, 1], [], []>} : vector<1x64xf32>, vector<64x8xf32>, vector<1x8xf32> -> vector<1x8xf32>
    %64 = arith.mulf %60, %60 : vector<8x64xf32>
    %cst_76 = arith.constant dense<0.000000e+00> : vector<64xf32>
    %65 = vector.multi_reduction <add>, %64, %cst_76 [0] : vector<8x64xf32> to vector<64xf32>
    %66 = vector.shape_cast %65 : vector<64xf32> to vector<1x64xf32>
    %cst_77 = arith.constant dense<0.000000e+00> : vector<1x8xf32>
    %67 = tpu.matmul %66, %0, %cst_77 {dimension_numbers = #tpu.dot_dimension_numbers<[1], [0], [0], [1], [0, 0, 1, 1], [], []>} : vector<1x64xf32>, vector<64x8xf32>, vector<1x8xf32> -> vector<1x8xf32>
    %cst_78 = arith.constant 1.562500e-02 : f32
    %68 = vector.broadcast %cst_78 : f32 to vector<1x8xf32>
    %69 = arith.mulf %63, %68 : vector<1x8xf32>
    %cst_79 = arith.constant 1.562500e-02 : f32
    %70 = vector.broadcast %cst_79 : f32 to vector<1x8xf32>
    %71 = arith.mulf %67, %70 : vector<1x8xf32>
    %72 = arith.mulf %69, %69 : vector<1x8xf32>
    %73 = arith.subf %71, %72 : vector<1x8xf32>
    %cst_80 = arith.constant 9.99999974E-6 : f32
    %74 = vector.broadcast %cst_80 : f32 to vector<1x8xf32>
    %75 = arith.addf %73, %74 : vector<1x8xf32>
    %76 = math.rsqrt %75 : vector<1x8xf32>
    %cst_81 = arith.constant dense<0.000000e+00> : vector<1x64xf32>
    %77 = tpu.matmul %69, %1, %cst_81 {dimension_numbers = #tpu.dot_dimension_numbers<[1], [0], [0], [1], [0, 0, 1, 1], [], []>} : vector<1x8xf32>, vector<8x64xf32>, vector<1x64xf32> -> vector<1x64xf32>
    %cst_82 = arith.constant dense<0.000000e+00> : vector<1x64xf32>
    %78 = tpu.matmul %76, %1, %cst_82 {dimension_numbers = #tpu.dot_dimension_numbers<[1], [0], [0], [1], [0, 0, 1, 1], [], []>} : vector<1x8xf32>, vector<8x64xf32>, vector<1x64xf32> -> vector<1x64xf32>
    %79 = vector.broadcast %77 : vector<1x64xf32> to vector<8x64xf32>
    %80 = arith.subf %60, %79 : vector<8x64xf32>
    %81 = vector.broadcast %78 : vector<1x64xf32> to vector<8x64xf32>
    %82 = arith.mulf %80, %81 : vector<8x64xf32>
    %83 = vector.extract_strided_slice %2 {offsets = [0, 0], sizes = [1, 64], strides = [1, 1]} : vector<5x64xf32> to vector<1x64xf32>
    %84 = vector.broadcast %83 : vector<1x64xf32> to vector<8x64xf32>
    %85 = arith.mulf %82, %84 : vector<8x64xf32>
    %86 = vector.extract_strided_slice %3 {offsets = [0, 0], sizes = [1, 64], strides = [1, 1]} : vector<5x64xf32> to vector<1x64xf32>
    %87 = vector.broadcast %86 : vector<1x64xf32> to vector<8x64xf32>
    %88 = arith.addf %85, %87 : vector<8x64xf32>
    %cst_83 = arith.constant 0.000000e+00 : f32
    %89 = vector.broadcast %cst_83 : f32 to vector<8x64xf32>
    %90 = arith.cmpf oge, %88, %89 : vector<8x64xf32>
    %cst_84 = arith.constant 0.00999999977 : f32
    %91 = vector.broadcast %cst_84 : f32 to vector<8x64xf32>
    %92 = arith.mulf %91, %88 : vector<8x64xf32>
    %93 = arith.select %90, %88, %92 : vector<8x64xi1>, vector<8x64xf32>
    %c1_85 = arith.constant 1 : index
    %c8_86 = arith.constant 8 : index
    %94 = vector.load %arg10[%c1_85, %c8_86] : memref<10x80xf32, #tpu.memory_space<vmem>>, vector<8x64xf32>
    tpu.vector_store %arg10[%c1_85, %c8_86], %93 {strides = array<i32>} : memref<10x80xf32, #tpu.memory_space<vmem>>, vector<8x64xf32>,
    %cst_87 = arith.constant 0.000000e+00 : f32
    %95 = vector.broadcast %cst_87 : f32 to vector<8x64xf32>
    %c0_88 = arith.constant 0 : index
    %c0_89 = arith.constant 0 : index
    %96 = vector.load %arg10[%c0_88, %c0_89] : memref<10x80xf32, #tpu.memory_space<vmem>>, vector<8x64xf32>
    %c0_90 = arith.constant 0 : index
    %c0_91 = arith.constant 0 : index
    %c0_92 = arith.constant 0 : index
    %c0_93 = arith.constant 0 : index
    %97 = vector.load %arg4[%c0_90, %c0_91, %c0_92, %c0_93] : memref<3x9x64x64xf32, #tpu.memory_space<vmem>>, vector<1x1x64x64xf32>
    %98 = vector.shape_cast %97 : vector<1x1x64x64xf32> to vector<64x64xf32>
    %cst_94 = arith.constant dense<0.000000e+00> : vector<8x64xf32>
    %99 = tpu.matmul %96, %98, %cst_94 {dimension_numbers = #tpu.dot_dimension_numbers<[1], [0], [0], [1], [0, 0, 1, 1], [], []>} : vector<8x64xf32>, vector<64x64xf32>, vector<8x64xf32> -> vector<8x64xf32>
    %100 = arith.addf %95, %99 : vector<8x64xf32>
    %c0_95 = arith.constant 0 : index
    %c8_96 = arith.constant 8 : index
    %101 = vector.load %arg10[%c0_95, %c8_96] : memref<10x80xf32, #tpu.memory_space<vmem>>, vector<8x64xf32>
    %c0_97 = arith.constant 0 : index
    %c1_98 = arith.constant 1 : index
    %c0_99 = arith.constant 0 : index
    %c0_100 = arith.constant 0 : index
    %102 = vector.load %arg4[%c0_97, %c1_98, %c0_99, %c0_100] : memref<3x9x64x64xf32, #tpu.memory_space<vmem>>, vector<1x1x64x64xf32>
    %103 = vector.shape_cast %102 : vector<1x1x64x64xf32> to vector<64x64xf32>
    %cst_101 = arith.constant dense<0.000000e+00> : vector<8x64xf32>
    %104 = tpu.matmul %101, %103, %cst_101 {dimension_numbers = #tpu.dot_dimension_numbers<[1], [0], [0], [1], [0, 0, 1, 1], [], []>} : vector<8x64xf32>, vector<64x64xf32>, vector<8x64xf32> -> vector<8x64xf32>
    %105 = arith.addf %100, %104 : vector<8x64xf32>
    %c0_102 = arith.constant 0 : index
    %c16 = arith.constant 16 : index
    %106 = vector.load %arg10[%c0_102, %c16] : memref<10x80xf32, #tpu.memory_space<vmem>>, vector<8x64xf32>
    %c0_103 = arith.constant 0 : index
    %c2_104 = arith.constant 2 : index
    %c0_105 = arith.constant 0 : index
    %c0_106 = arith.constant 0 : index
    %107 = vector.load %arg4[%c0_103, %c2_104, %c0_105, %c0_106] : memref<3x9x64x64xf32, #tpu.memory_space<vmem>>, vector<1x1x64x64xf32>
    %108 = vector.shape_cast %107 : vector<1x1x64x64xf32> to vector<64x64xf32>
    %cst_107 = arith.constant dense<0.000000e+00> : vector<8x64xf32>
    %109 = tpu.matmul %106, %108, %cst_107 {dimension_numbers = #tpu.dot_dimension_numbers<[1], [0], [0], [1], [0, 0, 1, 1], [], []>} : vector<8x64xf32>, vector<64x64xf32>, vector<8x64xf32> -> vector<8x64xf32>
    %110 = arith.addf %105, %109 : vector<8x64xf32>
    %c1_108 = arith.constant 1 : index
    %c0_109 = arith.constant 0 : index
    %111 = vector.load %arg10[%c1_108, %c0_109] : memref<10x80xf32, #tpu.memory_space<vmem>>, vector<8x64xf32>
    %c0_110 = arith.constant 0 : index
    %c3_111 = arith.constant 3 : index
    %c0_112 = arith.constant 0 : index
    %c0_113 = arith.constant 0 : index
    %112 = vector.load %arg4[%c0_110, %c3_111, %c0_112, %c0_113] : memref<3x9x64x64xf32, #tpu.memory_space<vmem>>, vector<1x1x64x64xf32>
    %113 = vector.shape_cast %112 : vector<1x1x64x64xf32> to vector<64x64xf32>
    %cst_114 = arith.constant dense<0.000000e+00> : vector<8x64xf32>
    %114 = tpu.matmul %111, %113, %cst_114 {dimension_numbers = #tpu.dot_dimension_numbers<[1], [0], [0], [1], [0, 0, 1, 1], [], []>} : vector<8x64xf32>, vector<64x64xf32>, vector<8x64xf32> -> vector<8x64xf32>
    %115 = arith.addf %110, %114 : vector<8x64xf32>
    %c1_115 = arith.constant 1 : index
    %c8_116 = arith.constant 8 : index
    %116 = vector.load %arg10[%c1_115, %c8_116] : memref<10x80xf32, #tpu.memory_space<vmem>>, vector<8x64xf32>
    %c0_117 = arith.constant 0 : index
    %c4_118 = arith.constant 4 : index
    %c0_119 = arith.constant 0 : index
    %c0_120 = arith.constant 0 : index
    %117 = vector.load %arg4[%c0_117, %c4_118, %c0_119, %c0_120] : memref<3x9x64x64xf32, #tpu.memory_space<vmem>>, vector<1x1x64x64xf32>
    %118 = vector.shape_cast %117 : vector<1x1x64x64xf32> to vector<64x64xf32>
    %cst_121 = arith.constant dense<0.000000e+00> : vector<8x64xf32>
    %119 = tpu.matmul %116, %118, %cst_121 {dimension_numbers = #tpu.dot_dimension_numbers<[1], [0], [0], [1], [0, 0, 1, 1], [], []>} : vector<8x64xf32>, vector<64x64xf32>, vector<8x64xf32> -> vector<8x64xf32>
    %120 = arith.addf %115, %119 : vector<8x64xf32>
    %c1_122 = arith.constant 1 : index
    %c16_123 = arith.constant 16 : index
    %121 = vector.load %arg10[%c1_122, %c16_123] : memref<10x80xf32, #tpu.memory_space<vmem>>, vector<8x64xf32>
    %c0_124 = arith.constant 0 : index
    %c5_125 = arith.constant 5 : index
    %c0_126 = arith.constant 0 : index
    %c0_127 = arith.constant 0 : index
    %122 = vector.load %arg4[%c0_124, %c5_125, %c0_126, %c0_127] : memref<3x9x64x64xf32, #tpu.memory_space<vmem>>, vector<1x1x64x64xf32>
    %123 = vector.shape_cast %122 : vector<1x1x64x64xf32> to vector<64x64xf32>
    %cst_128 = arith.constant dense<0.000000e+00> : vector<8x64xf32>
    %124 = tpu.matmul %121, %123, %cst_128 {dimension_numbers = #tpu.dot_dimension_numbers<[1], [0], [0], [1], [0, 0, 1, 1], [], []>} : vector<8x64xf32>, vector<64x64xf32>, vector<8x64xf32> -> vector<8x64xf32>
    %125 = arith.addf %120, %124 : vector<8x64xf32>
    %c2_129 = arith.constant 2 : index
    %c0_130 = arith.constant 0 : index
    %126 = vector.load %arg10[%c2_129, %c0_130] : memref<10x80xf32, #tpu.memory_space<vmem>>, vector<8x64xf32>
    %c0_131 = arith.constant 0 : index
    %c6_132 = arith.constant 6 : index
    %c0_133 = arith.constant 0 : index
    %c0_134 = arith.constant 0 : index
    %127 = vector.load %arg4[%c0_131, %c6_132, %c0_133, %c0_134] : memref<3x9x64x64xf32, #tpu.memory_space<vmem>>, vector<1x1x64x64xf32>
    %128 = vector.shape_cast %127 : vector<1x1x64x64xf32> to vector<64x64xf32>
    %cst_135 = arith.constant dense<0.000000e+00> : vector<8x64xf32>
    %129 = tpu.matmul %126, %128, %cst_135 {dimension_numbers = #tpu.dot_dimension_numbers<[1], [0], [0], [1], [0, 0, 1, 1], [], []>} : vector<8x64xf32>, vector<64x64xf32>, vector<8x64xf32> -> vector<8x64xf32>
    %130 = arith.addf %125, %129 : vector<8x64xf32>
    %c2_136 = arith.constant 2 : index
    %c8_137 = arith.constant 8 : index
    %131 = vector.load %arg10[%c2_136, %c8_137] : memref<10x80xf32, #tpu.memory_space<vmem>>, vector<8x64xf32>
    %c0_138 = arith.constant 0 : index
    %c7_139 = arith.constant 7 : index
    %c0_140 = arith.constant 0 : index
    %c0_141 = arith.constant 0 : index
    %132 = vector.load %arg4[%c0_138, %c7_139, %c0_140, %c0_141] : memref<3x9x64x64xf32, #tpu.memory_space<vmem>>, vector<1x1x64x64xf32>
    %133 = vector.shape_cast %132 : vector<1x1x64x64xf32> to vector<64x64xf32>
    %cst_142 = arith.constant dense<0.000000e+00> : vector<8x64xf32>
    %134 = tpu.matmul %131, %133, %cst_142 {dimension_numbers = #tpu.dot_dimension_numbers<[1], [0], [0], [1], [0, 0, 1, 1], [], []>} : vector<8x64xf32>, vector<64x64xf32>, vector<8x64xf32> -> vector<8x64xf32>
    %135 = arith.addf %130, %134 : vector<8x64xf32>
    %c2_143 = arith.constant 2 : index
    %c16_144 = arith.constant 16 : index
    %136 = vector.load %arg10[%c2_143, %c16_144] : memref<10x80xf32, #tpu.memory_space<vmem>>, vector<8x64xf32>
    %c0_145 = arith.constant 0 : index
    %c8_146 = arith.constant 8 : index
    %c0_147 = arith.constant 0 : index
    %c0_148 = arith.constant 0 : index
    %137 = vector.load %arg4[%c0_145, %c8_146, %c0_147, %c0_148] : memref<3x9x64x64xf32, #tpu.memory_space<vmem>>, vector<1x1x64x64xf32>
    %138 = vector.shape_cast %137 : vector<1x1x64x64xf32> to vector<64x64xf32>
    %cst_149 = arith.constant dense<0.000000e+00> : vector<8x64xf32>
    %139 = tpu.matmul %136, %138, %cst_149 {dimension_numbers = #tpu.dot_dimension_numbers<[1], [0], [0], [1], [0, 0, 1, 1], [], []>} : vector<8x64xf32>, vector<64x64xf32>, vector<8x64xf32> -> vector<8x64xf32>
    %140 = arith.addf %135, %139 : vector<8x64xf32>
    %cst_150 = arith.constant dense<0.000000e+00> : vector<64xf32>
    %141 = vector.multi_reduction <add>, %140, %cst_150 [0] : vector<8x64xf32> to vector<64xf32>
    %142 = vector.shape_cast %141 : vector<64xf32> to vector<1x64xf32>
    %cst_151 = arith.constant dense<0.000000e+00> : vector<1x8xf32>
    %143 = tpu.matmul %142, %0, %cst_151 {dimension_numbers = #tpu.dot_dimension_numbers<[1], [0], [0], [1], [0, 0, 1, 1], [], []>} : vector<1x64xf32>, vector<64x8xf32>, vector<1x8xf32> -> vector<1x8xf32>
    %144 = arith.mulf %140, %140 : vector<8x64xf32>
    %cst_152 = arith.constant dense<0.000000e+00> : vector<64xf32>
    %145 = vector.multi_reduction <add>, %144, %cst_152 [0] : vector<8x64xf32> to vector<64xf32>
    %146 = vector.shape_cast %145 : vector<64xf32> to vector<1x64xf32>
    %cst_153 = arith.constant dense<0.000000e+00> : vector<1x8xf32>
    %147 = tpu.matmul %146, %0, %cst_153 {dimension_numbers = #tpu.dot_dimension_numbers<[1], [0], [0], [1], [0, 0, 1, 1], [], []>} : vector<1x64xf32>, vector<64x8xf32>, vector<1x8xf32> -> vector<1x8xf32>
    %cst_154 = arith.constant 1.562500e-02 : f32
    %148 = vector.broadcast %cst_154 : f32 to vector<1x8xf32>
    %149 = arith.mulf %143, %148 : vector<1x8xf32>
    %cst_155 = arith.constant 1.562500e-02 : f32
    %150 = vector.broadcast %cst_155 : f32 to vector<1x8xf32>
    %151 = arith.mulf %147, %150 : vector<1x8xf32>
    %152 = arith.mulf %149, %149 : vector<1x8xf32>
    %153 = arith.subf %151, %152 : vector<1x8xf32>
    %cst_156 = arith.constant 9.99999974E-6 : f32
    %154 = vector.broadcast %cst_156 : f32 to vector<1x8xf32>
    %155 = arith.addf %153, %154 : vector<1x8xf32>
    %156 = math.rsqrt %155 : vector<1x8xf32>
    %cst_157 = arith.constant dense<0.000000e+00> : vector<1x64xf32>
    %157 = tpu.matmul %149, %1, %cst_157 {dimension_numbers = #tpu.dot_dimension_numbers<[1], [0], [0], [1], [0, 0, 1, 1], [], []>} : vector<1x8xf32>, vector<8x64xf32>, vector<1x64xf32> -> vector<1x64xf32>
    %cst_158 = arith.constant dense<0.000000e+00> : vector<1x64xf32>
    %158 = tpu.matmul %156, %1, %cst_158 {dimension_numbers = #tpu.dot_dimension_numbers<[1], [0], [0], [1], [0, 0, 1, 1], [], []>} : vector<1x8xf32>, vector<8x64xf32>, vector<1x64xf32> -> vector<1x64xf32>
    %159 = vector.broadcast %157 : vector<1x64xf32> to vector<8x64xf32>
    %160 = arith.subf %140, %159 : vector<8x64xf32>
    %161 = vector.broadcast %158 : vector<1x64xf32> to vector<8x64xf32>
    %162 = arith.mulf %160, %161 : vector<8x64xf32>
    %163 = vector.extract_strided_slice %2 {offsets = [1, 0], sizes = [1, 64], strides = [1, 1]} : vector<5x64xf32> to vector<1x64xf32>
    %164 = vector.broadcast %163 : vector<1x64xf32> to vector<8x64xf32>
    %165 = arith.mulf %162, %164 : vector<8x64xf32>
    %166 = vector.extract_strided_slice %3 {offsets = [1, 0], sizes = [1, 64], strides = [1, 1]} : vector<5x64xf32> to vector<1x64xf32>
    %167 = vector.broadcast %166 : vector<1x64xf32> to vector<8x64xf32>
    %168 = arith.addf %165, %167 : vector<8x64xf32>
    %c0_159 = arith.constant 0 : index
    %c4_160 = arith.constant 4 : index
    %c0_161 = arith.constant 0 : index
    %c0_162 = arith.constant 0 : index
    %169 = vector.load %arg1[%c0_159, %c4_160, %c0_161, %c0_162] : memref<1x9x8x32xf32, #tpu.memory_space<vmem>>, vector<1x1x8x32xf32>
    %170 = vector.shape_cast %169 : vector<1x1x8x32xf32> to vector<8x32xf32>
    %c0_163 = arith.constant 0 : index
    %c5_164 = arith.constant 5 : index
    %c0_165 = arith.constant 0 : index
    %c0_166 = arith.constant 0 : index
    %171 = vector.load %arg1[%c0_163, %c5_164, %c0_165, %c0_166] : memref<1x9x8x32xf32, #tpu.memory_space<vmem>>, vector<1x1x8x32xf32>
    %172 = vector.shape_cast %171 : vector<1x1x8x32xf32> to vector<8x32xf32>
    %173 = arith.addf %170, %172 : vector<8x32xf32>
    %c0_167 = arith.constant 0 : index
    %c7_168 = arith.constant 7 : index
    %c0_169 = arith.constant 0 : index
    %c0_170 = arith.constant 0 : index
    %174 = vector.load %arg1[%c0_167, %c7_168, %c0_169, %c0_170] : memref<1x9x8x32xf32, #tpu.memory_space<vmem>>, vector<1x1x8x32xf32>
    %175 = vector.shape_cast %174 : vector<1x1x8x32xf32> to vector<8x32xf32>
    %176 = arith.addf %173, %175 : vector<8x32xf32>
    %c0_171 = arith.constant 0 : index
    %c8_172 = arith.constant 8 : index
    %c0_173 = arith.constant 0 : index
    %c0_174 = arith.constant 0 : index
    %177 = vector.load %arg1[%c0_171, %c8_172, %c0_173, %c0_174] : memref<1x9x8x32xf32, #tpu.memory_space<vmem>>, vector<1x1x8x32xf32>
    %178 = vector.shape_cast %177 : vector<1x1x8x32xf32> to vector<8x32xf32>
    %179 = arith.addf %176, %178 : vector<8x32xf32>
    %cst_175 = arith.constant 2.500000e-01 : f32
    %180 = vector.broadcast %cst_175 : f32 to vector<8x32xf32>
    %181 = arith.mulf %179, %180 : vector<8x32xf32>
    %c0_176 = arith.constant 0 : index
    %c0_177 = arith.constant 0 : index
    %182 = vector.load %arg3[%c0_176, %c0_177] : memref<32x64xf32, #tpu.memory_space<vmem>>, vector<32x64xf32>
    %cst_178 = arith.constant dense<0.000000e+00> : vector<8x64xf32>
    %183 = tpu.matmul %181, %182, %cst_178 {dimension_numbers = #tpu.dot_dimension_numbers<[1], [0], [0], [1], [0, 0, 1, 1], [], []>} : vector<8x32xf32>, vector<32x64xf32>, vector<8x64xf32> -> vector<8x64xf32>
    %cst_179 = arith.constant dense<0.000000e+00> : vector<64xf32>
    %184 = vector.multi_reduction <add>, %183, %cst_179 [0] : vector<8x64xf32> to vector<64xf32>
    %185 = vector.shape_cast %184 : vector<64xf32> to vector<1x64xf32>
    %cst_180 = arith.constant dense<0.000000e+00> : vector<1x8xf32>
    %186 = tpu.matmul %185, %0, %cst_180 {dimension_numbers = #tpu.dot_dimension_numbers<[1], [0], [0], [1], [0, 0, 1, 1], [], []>} : vector<1x64xf32>, vector<64x8xf32>, vector<1x8xf32> -> vector<1x8xf32>
    %187 = arith.mulf %183, %183 : vector<8x64xf32>
    %cst_181 = arith.constant dense<0.000000e+00> : vector<64xf32>
    %188 = vector.multi_reduction <add>, %187, %cst_181 [0] : vector<8x64xf32> to vector<64xf32>
    %189 = vector.shape_cast %188 : vector<64xf32> to vector<1x64xf32>
    %cst_182 = arith.constant dense<0.000000e+00> : vector<1x8xf32>
    %190 = tpu.matmul %189, %0, %cst_182 {dimension_numbers = #tpu.dot_dimension_numbers<[1], [0], [0], [1], [0, 0, 1, 1], [], []>} : vector<1x64xf32>, vector<64x8xf32>, vector<1x8xf32> -> vector<1x8xf32>
    %cst_183 = arith.constant 1.562500e-02 : f32
    %191 = vector.broadcast %cst_183 : f32 to vector<1x8xf32>
    %192 = arith.mulf %186, %191 : vector<1x8xf32>
    %cst_184 = arith.constant 1.562500e-02 : f32
    %193 = vector.broadcast %cst_184 : f32 to vector<1x8xf32>
    %194 = arith.mulf %190, %193 : vector<1x8xf32>
    %195 = arith.mulf %192, %192 : vector<1x8xf32>
    %196 = arith.subf %194, %195 : vector<1x8xf32>
    %cst_185 = arith.constant 9.99999974E-6 : f32
    %197 = vector.broadcast %cst_185 : f32 to vector<1x8xf32>
    %198 = arith.addf %196, %197 : vector<1x8xf32>
    %199 = math.rsqrt %198 : vector<1x8xf32>
    %cst_186 = arith.constant dense<0.000000e+00> : vector<1x64xf32>
    %200 = tpu.matmul %192, %1, %cst_186 {dimension_numbers = #tpu.dot_dimension_numbers<[1], [0], [0], [1], [0, 0, 1, 1], [], []>} : vector<1x8xf32>, vector<8x64xf32>, vector<1x64xf32> -> vector<1x64xf32>
    %cst_187 = arith.constant dense<0.000000e+00> : vector<1x64xf32>
    %201 = tpu.matmul %199, %1, %cst_187 {dimension_numbers = #tpu.dot_dimension_numbers<[1], [0], [0], [1], [0, 0, 1, 1], [], []>} : vector<1x8xf32>, vector<8x64xf32>, vector<1x64xf32> -> vector<1x64xf32>
    %202 = vector.broadcast %200 : vector<1x64xf32> to vector<8x64xf32>
    %203 = arith.subf %183, %202 : vector<8x64xf32>
    %204 = vector.broadcast %201 : vector<1x64xf32> to vector<8x64xf32>
    %205 = arith.mulf %203, %204 : vector<8x64xf32>
    %206 = vector.extract_strided_slice %2 {offsets = [2, 0], sizes = [1, 64], strides = [1, 1]} : vector<5x64xf32> to vector<1x64xf32>
    %207 = vector.broadcast %206 : vector<1x64xf32> to vector<8x64xf32>
    %208 = arith.mulf %205, %207 : vector<8x64xf32>
    %209 = vector.extract_strided_slice %3 {offsets = [2, 0], sizes = [1, 64], strides = [1, 1]} : vector<5x64xf32> to vector<1x64xf32>
    %210 = vector.broadcast %209 : vector<1x64xf32> to vector<8x64xf32>
    %211 = arith.addf %208, %210 : vector<8x64xf32>
    %212 = arith.addf %168, %211 : vector<8x64xf32>
    %cst_188 = arith.constant 0.000000e+00 : f32
    %213 = vector.broadcast %cst_188 : f32 to vector<8x64xf32>
    %214 = arith.cmpf oge, %212, %213 : vector<8x64xf32>
    %cst_189 = arith.constant 0.00999999977 : f32
    %215 = vector.broadcast %cst_189 : f32 to vector<8x64xf32>
    %216 = arith.mulf %215, %212 : vector<8x64xf32>
    %217 = arith.select %214, %212, %216 : vector<8x64xi1>, vector<8x64xf32>
    %c1_190 = arith.constant 1 : index
    %c8_191 = arith.constant 8 : index
    %218 = vector.load %arg10[%c1_190, %c8_191] : memref<10x80xf32, #tpu.memory_space<vmem>>, vector<8x64xf32>
    tpu.vector_store %arg10[%c1_190, %c8_191], %217 {strides = array<i32>} : memref<10x80xf32, #tpu.memory_space<vmem>>, vector<8x64xf32>,
    %cst_192 = arith.constant 0.000000e+00 : f32
    %219 = vector.broadcast %cst_192 : f32 to vector<8x64xf32>
    %c0_193 = arith.constant 0 : index
    %c0_194 = arith.constant 0 : index
    %220 = vector.load %arg10[%c0_193, %c0_194] : memref<10x80xf32, #tpu.memory_space<vmem>>, vector<8x64xf32>
    %c1_195 = arith.constant 1 : index
    %c0_196 = arith.constant 0 : index
    %c0_197 = arith.constant 0 : index
    %c0_198 = arith.constant 0 : index
    %221 = vector.load %arg4[%c1_195, %c0_196, %c0_197, %c0_198] : memref<3x9x64x64xf32, #tpu.memory_space<vmem>>, vector<1x1x64x64xf32>
    %222 = vector.shape_cast %221 : vector<1x1x64x64xf32> to vector<64x64xf32>
    %cst_199 = arith.constant dense<0.000000e+00> : vector<8x64xf32>
    %223 = tpu.matmul %220, %222, %cst_199 {dimension_numbers = #tpu.dot_dimension_numbers<[1], [0], [0], [1], [0, 0, 1, 1], [], []>} : vector<8x64xf32>, vector<64x64xf32>, vector<8x64xf32> -> vector<8x64xf32>
    %224 = arith.addf %219, %223 : vector<8x64xf32>
    %c0_200 = arith.constant 0 : index
    %c8_201 = arith.constant 8 : index
    %225 = vector.load %arg10[%c0_200, %c8_201] : memref<10x80xf32, #tpu.memory_space<vmem>>, vector<8x64xf32>
    %c1_202 = arith.constant 1 : index
    %c1_203 = arith.constant 1 : index
    %c0_204 = arith.constant 0 : index
    %c0_205 = arith.constant 0 : index
    %226 = vector.load %arg4[%c1_202, %c1_203, %c0_204, %c0_205] : memref<3x9x64x64xf32, #tpu.memory_space<vmem>>, vector<1x1x64x64xf32>
    %227 = vector.shape_cast %226 : vector<1x1x64x64xf32> to vector<64x64xf32>
    %cst_206 = arith.constant dense<0.000000e+00> : vector<8x64xf32>
    %228 = tpu.matmul %225, %227, %cst_206 {dimension_numbers = #tpu.dot_dimension_numbers<[1], [0], [0], [1], [0, 0, 1, 1], [], []>} : vector<8x64xf32>, vector<64x64xf32>, vector<8x64xf32> -> vector<8x64xf32>
    %229 = arith.addf %224, %228 : vector<8x64xf32>
    %c0_207 = arith.constant 0 : index
    %c16_208 = arith.constant 16 : index
    %230 = vector.load %arg10[%c0_207, %c16_208] : memref<10x80xf32, #tpu.memory_space<vmem>>, vector<8x64xf32>
    %c1_209 = arith.constant 1 : index
    %c2_210 = arith.constant 2 : index
    %c0_211 = arith.constant 0 : index
    %c0_212 = arith.constant 0 : index
    %231 = vector.load %arg4[%c1_209, %c2_210, %c0_211, %c0_212] : memref<3x9x64x64xf32, #tpu.memory_space<vmem>>, vector<1x1x64x64xf32>
    %232 = vector.shape_cast %231 : vector<1x1x64x64xf32> to vector<64x64xf32>
    %cst_213 = arith.constant dense<0.000000e+00> : vector<8x64xf32>
    %233 = tpu.matmul %230, %232, %cst_213 {dimension_numbers = #tpu.dot_dimension_numbers<[1], [0], [0], [1], [0, 0, 1, 1], [], []>} : vector<8x64xf32>, vector<64x64xf32>, vector<8x64xf32> -> vector<8x64xf32>
    %234 = arith.addf %229, %233 : vector<8x64xf32>
    %c1_214 = arith.constant 1 : index
    %c0_215 = arith.constant 0 : index
    %235 = vector.load %arg10[%c1_214, %c0_215] : memref<10x80xf32, #tpu.memory_space<vmem>>, vector<8x64xf32>
    %c1_216 = arith.constant 1 : index
    %c3_217 = arith.constant 3 : index
    %c0_218 = arith.constant 0 : index
    %c0_219 = arith.constant 0 : index
    %236 = vector.load %arg4[%c1_216, %c3_217, %c0_218, %c0_219] : memref<3x9x64x64xf32, #tpu.memory_space<vmem>>, vector<1x1x64x64xf32>
    %237 = vector.shape_cast %236 : vector<1x1x64x64xf32> to vector<64x64xf32>
    %cst_220 = arith.constant dense<0.000000e+00> : vector<8x64xf32>
    %238 = tpu.matmul %235, %237, %cst_220 {dimension_numbers = #tpu.dot_dimension_numbers<[1], [0], [0], [1], [0, 0, 1, 1], [], []>} : vector<8x64xf32>, vector<64x64xf32>, vector<8x64xf32> -> vector<8x64xf32>
    %239 = arith.addf %234, %238 : vector<8x64xf32>
    %c1_221 = arith.constant 1 : index
    %c8_222 = arith.constant 8 : index
    %240 = vector.load %arg10[%c1_221, %c8_222] : memref<10x80xf32, #tpu.memory_space<vmem>>, vector<8x64xf32>
    %c1_223 = arith.constant 1 : index
    %c4_224 = arith.constant 4 : index
    %c0_225 = arith.constant 0 : index
    %c0_226 = arith.constant 0 : index
    %241 = vector.load %arg4[%c1_223, %c4_224, %c0_225, %c0_226] : memref<3x9x64x64xf32, #tpu.memory_space<vmem>>, vector<1x1x64x64xf32>
    %242 = vector.shape_cast %241 : vector<1x1x64x64xf32> to vector<64x64xf32>
    %cst_227 = arith.constant dense<0.000000e+00> : vector<8x64xf32>
    %243 = tpu.matmul %240, %242, %cst_227 {dimension_numbers = #tpu.dot_dimension_numbers<[1], [0], [0], [1], [0, 0, 1, 1], [], []>} : vector<8x64xf32>, vector<64x64xf32>, vector<8x64xf32> -> vector<8x64xf32>
    %244 = arith.addf %239, %243 : vector<8x64xf32>
    %c1_228 = arith.constant 1 : index
    %c16_229 = arith.constant 16 : index
    %245 = vector.load %arg10[%c1_228, %c16_229] : memref<10x80xf32, #tpu.memory_space<vmem>>, vector<8x64xf32>
    %c1_230 = arith.constant 1 : index
    %c5_231 = arith.constant 5 : index
    %c0_232 = arith.constant 0 : index
    %c0_233 = arith.constant 0 : index
    %246 = vector.load %arg4[%c1_230, %c5_231, %c0_232, %c0_233] : memref<3x9x64x64xf32, #tpu.memory_space<vmem>>, vector<1x1x64x64xf32>
    %247 = vector.shape_cast %246 : vector<1x1x64x64xf32> to vector<64x64xf32>
    %cst_234 = arith.constant dense<0.000000e+00> : vector<8x64xf32>
    %248 = tpu.matmul %245, %247, %cst_234 {dimension_numbers = #tpu.dot_dimension_numbers<[1], [0], [0], [1], [0, 0, 1, 1], [], []>} : vector<8x64xf32>, vector<64x64xf32>, vector<8x64xf32> -> vector<8x64xf32>
    %249 = arith.addf %244, %248 : vector<8x64xf32>
    %c2_235 = arith.constant 2 : index
    %c0_236 = arith.constant 0 : index
    %250 = vector.load %arg10[%c2_235, %c0_236] : memref<10x80xf32, #tpu.memory_space<vmem>>, vector<8x64xf32>
    %c1_237 = arith.constant 1 : index
    %c6_238 = arith.constant 6 : index
    %c0_239 = arith.constant 0 : index
    %c0_240 = arith.constant 0 : index
    %251 = vector.load %arg4[%c1_237, %c6_238, %c0_239, %c0_240] : memref<3x9x64x64xf32, #tpu.memory_space<vmem>>, vector<1x1x64x64xf32>
    %252 = vector.shape_cast %251 : vector<1x1x64x64xf32> to vector<64x64xf32>
    %cst_241 = arith.constant dense<0.000000e+00> : vector<8x64xf32>
    %253 = tpu.matmul %250, %252, %cst_241 {dimension_numbers = #tpu.dot_dimension_numbers<[1], [0], [0], [1], [0, 0, 1, 1], [], []>} : vector<8x64xf32>, vector<64x64xf32>, vector<8x64xf32> -> vector<8x64xf32>
    %254 = arith.addf %249, %253 : vector<8x64xf32>
    %c2_242 = arith.constant 2 : index
    %c8_243 = arith.constant 8 : index
    %255 = vector.load %arg10[%c2_242, %c8_243] : memref<10x80xf32, #tpu.memory_space<vmem>>, vector<8x64xf32>
    %c1_244 = arith.constant 1 : index
    %c7_245 = arith.constant 7 : index
    %c0_246 = arith.constant 0 : index
    %c0_247 = arith.constant 0 : index
    %256 = vector.load %arg4[%c1_244, %c7_245, %c0_246, %c0_247] : memref<3x9x64x64xf32, #tpu.memory_space<vmem>>, vector<1x1x64x64xf32>
    %257 = vector.shape_cast %256 : vector<1x1x64x64xf32> to vector<64x64xf32>
    %cst_248 = arith.constant dense<0.000000e+00> : vector<8x64xf32>
    %258 = tpu.matmul %255, %257, %cst_248 {dimension_numbers = #tpu.dot_dimension_numbers<[1], [0], [0], [1], [0, 0, 1, 1], [], []>} : vector<8x64xf32>, vector<64x64xf32>, vector<8x64xf32> -> vector<8x64xf32>
    %259 = arith.addf %254, %258 : vector<8x64xf32>
    %c2_249 = arith.constant 2 : index
    %c16_250 = arith.constant 16 : index
    %260 = vector.load %arg10[%c2_249, %c16_250] : memref<10x80xf32, #tpu.memory_space<vmem>>, vector<8x64xf32>
    %c1_251 = arith.constant 1 : index
    %c8_252 = arith.constant 8 : index
    %c0_253 = arith.constant 0 : index
    %c0_254 = arith.constant 0 : index
    %261 = vector.load %arg4[%c1_251, %c8_252, %c0_253, %c0_254] : memref<3x9x64x64xf32, #tpu.memory_space<vmem>>, vector<1x1x64x64xf32>
    %262 = vector.shape_cast %261 : vector<1x1x64x64xf32> to vector<64x64xf32>
    %cst_255 = arith.constant dense<0.000000e+00> : vector<8x64xf32>
    %263 = tpu.matmul %260, %262, %cst_255 {dimension_numbers = #tpu.dot_dimension_numbers<[1], [0], [0], [1], [0, 0, 1, 1], [], []>} : vector<8x64xf32>, vector<64x64xf32>, vector<8x64xf32> -> vector<8x64xf32>
    %264 = arith.addf %259, %263 : vector<8x64xf32>
    %cst_256 = arith.constant dense<0.000000e+00> : vector<64xf32>
    %265 = vector.multi_reduction <add>, %264, %cst_256 [0] : vector<8x64xf32> to vector<64xf32>
    %266 = vector.shape_cast %265 : vector<64xf32> to vector<1x64xf32>
    %cst_257 = arith.constant dense<0.000000e+00> : vector<1x8xf32>
    %267 = tpu.matmul %266, %0, %cst_257 {dimension_numbers = #tpu.dot_dimension_numbers<[1], [0], [0], [1], [0, 0, 1, 1], [], []>} : vector<1x64xf32>, vector<64x8xf32>, vector<1x8xf32> -> vector<1x8xf32>
    %268 = arith.mulf %264, %264 : vector<8x64xf32>
    %cst_258 = arith.constant dense<0.000000e+00> : vector<64xf32>
    %269 = vector.multi_reduction <add>, %268, %cst_258 [0] : vector<8x64xf32> to vector<64xf32>
    %270 = vector.shape_cast %269 : vector<64xf32> to vector<1x64xf32>
    %cst_259 = arith.constant dense<0.000000e+00> : vector<1x8xf32>
    %271 = tpu.matmul %270, %0, %cst_259 {dimension_numbers = #tpu.dot_dimension_numbers<[1], [0], [0], [1], [0, 0, 1, 1], [], []>} : vector<1x64xf32>, vector<64x8xf32>, vector<1x8xf32> -> vector<1x8xf32>
    %cst_260 = arith.constant 1.562500e-02 : f32
    %272 = vector.broadcast %cst_260 : f32 to vector<1x8xf32>
    %273 = arith.mulf %267, %272 : vector<1x8xf32>
    %cst_261 = arith.constant 1.562500e-02 : f32
    %274 = vector.broadcast %cst_261 : f32 to vector<1x8xf32>
    %275 = arith.mulf %271, %274 : vector<1x8xf32>
    %276 = arith.mulf %273, %273 : vector<1x8xf32>
    %277 = arith.subf %275, %276 : vector<1x8xf32>
    %cst_262 = arith.constant 9.99999974E-6 : f32
    %278 = vector.broadcast %cst_262 : f32 to vector<1x8xf32>
    %279 = arith.addf %277, %278 : vector<1x8xf32>
    %280 = math.rsqrt %279 : vector<1x8xf32>
    %cst_263 = arith.constant dense<0.000000e+00> : vector<1x64xf32>
    %281 = tpu.matmul %273, %1, %cst_263 {dimension_numbers = #tpu.dot_dimension_numbers<[1], [0], [0], [1], [0, 0, 1, 1], [], []>} : vector<1x8xf32>, vector<8x64xf32>, vector<1x64xf32> -> vector<1x64xf32>
    %cst_264 = arith.constant dense<0.000000e+00> : vector<1x64xf32>
    %282 = tpu.matmul %280, %1, %cst_264 {dimension_numbers = #tpu.dot_dimension_numbers<[1], [0], [0], [1], [0, 0, 1, 1], [], []>} : vector<1x8xf32>, vector<8x64xf32>, vector<1x64xf32> -> vector<1x64xf32>
    %283 = vector.broadcast %281 : vector<1x64xf32> to vector<8x64xf32>
    %284 = arith.subf %264, %283 : vector<8x64xf32>
    %285 = vector.broadcast %282 : vector<1x64xf32> to vector<8x64xf32>
    %286 = arith.mulf %284, %285 : vector<8x64xf32>
    %287 = vector.extract_strided_slice %2 {offsets = [3, 0], sizes = [1, 64], strides = [1, 1]} : vector<5x64xf32> to vector<1x64xf32>
    %288 = vector.broadcast %287 : vector<1x64xf32> to vector<8x64xf32>
    %289 = arith.mulf %286, %288 : vector<8x64xf32>
    %290 = vector.extract_strided_slice %3 {offsets = [3, 0], sizes = [1, 64], strides = [1, 1]} : vector<5x64xf32> to vector<1x64xf32>
    %291 = vector.broadcast %290 : vector<1x64xf32> to vector<8x64xf32>
    %292 = arith.addf %289, %291 : vector<8x64xf32>
    %cst_265 = arith.constant 0.000000e+00 : f32
    %293 = vector.broadcast %cst_265 : f32 to vector<8x64xf32>
    %294 = arith.cmpf oge, %292, %293 : vector<8x64xf32>
    %cst_266 = arith.constant 0.00999999977 : f32
    %295 = vector.broadcast %cst_266 : f32 to vector<8x64xf32>
    %296 = arith.mulf %295, %292 : vector<8x64xf32>
    %297 = arith.select %294, %292, %296 : vector<8x64xi1>, vector<8x64xf32>
    %c1_267 = arith.constant 1 : index
    %c8_268 = arith.constant 8 : index
    %298 = vector.load %arg10[%c1_267, %c8_268] : memref<10x80xf32, #tpu.memory_space<vmem>>, vector<8x64xf32>
    tpu.vector_store %arg10[%c1_267, %c8_268], %297 {strides = array<i32>} : memref<10x80xf32, #tpu.memory_space<vmem>>, vector<8x64xf32>,
    %cst_269 = arith.constant 0.000000e+00 : f32
    %299 = vector.broadcast %cst_269 : f32 to vector<8x64xf32>
    %c0_270 = arith.constant 0 : index
    %c0_271 = arith.constant 0 : index
    %300 = vector.load %arg10[%c0_270, %c0_271] : memref<10x80xf32, #tpu.memory_space<vmem>>, vector<8x64xf32>
    %c2_272 = arith.constant 2 : index
    %c0_273 = arith.constant 0 : index
    %c0_274 = arith.constant 0 : index
    %c0_275 = arith.constant 0 : index
    %301 = vector.load %arg4[%c2_272, %c0_273, %c0_274, %c0_275] : memref<3x9x64x64xf32, #tpu.memory_space<vmem>>, vector<1x1x64x64xf32>
    %302 = vector.shape_cast %301 : vector<1x1x64x64xf32> to vector<64x64xf32>
    %cst_276 = arith.constant dense<0.000000e+00> : vector<8x64xf32>
    %303 = tpu.matmul %300, %302, %cst_276 {dimension_numbers = #tpu.dot_dimension_numbers<[1], [0], [0], [1], [0, 0, 1, 1], [], []>} : vector<8x64xf32>, vector<64x64xf32>, vector<8x64xf32> -> vector<8x64xf32>
    %304 = arith.addf %299, %303 : vector<8x64xf32>
    %c0_277 = arith.constant 0 : index
    %c8_278 = arith.constant 8 : index
    %305 = vector.load %arg10[%c0_277, %c8_278] : memref<10x80xf32, #tpu.memory_space<vmem>>, vector<8x64xf32>
    %c2_279 = arith.constant 2 : index
    %c1_280 = arith.constant 1 : index
    %c0_281 = arith.constant 0 : index
    %c0_282 = arith.constant 0 : index
    %306 = vector.load %arg4[%c2_279, %c1_280, %c0_281, %c0_282] : memref<3x9x64x64xf32, #tpu.memory_space<vmem>>, vector<1x1x64x64xf32>
    %307 = vector.shape_cast %306 : vector<1x1x64x64xf32> to vector<64x64xf32>
    %cst_283 = arith.constant dense<0.000000e+00> : vector<8x64xf32>
    %308 = tpu.matmul %305, %307, %cst_283 {dimension_numbers = #tpu.dot_dimension_numbers<[1], [0], [0], [1], [0, 0, 1, 1], [], []>} : vector<8x64xf32>, vector<64x64xf32>, vector<8x64xf32> -> vector<8x64xf32>
    %309 = arith.addf %304, %308 : vector<8x64xf32>
    %c0_284 = arith.constant 0 : index
    %c16_285 = arith.constant 16 : index
    %310 = vector.load %arg10[%c0_284, %c16_285] : memref<10x80xf32, #tpu.memory_space<vmem>>, vector<8x64xf32>
    %c2_286 = arith.constant 2 : index
    %c2_287 = arith.constant 2 : index
    %c0_288 = arith.constant 0 : index
    %c0_289 = arith.constant 0 : index
    %311 = vector.load %arg4[%c2_286, %c2_287, %c0_288, %c0_289] : memref<3x9x64x64xf32, #tpu.memory_space<vmem>>, vector<1x1x64x64xf32>
    %312 = vector.shape_cast %311 : vector<1x1x64x64xf32> to vector<64x64xf32>
    %cst_290 = arith.constant dense<0.000000e+00> : vector<8x64xf32>
    %313 = tpu.matmul %310, %312, %cst_290 {dimension_numbers = #tpu.dot_dimension_numbers<[1], [0], [0], [1], [0, 0, 1, 1], [], []>} : vector<8x64xf32>, vector<64x64xf32>, vector<8x64xf32> -> vector<8x64xf32>
    %314 = arith.addf %309, %313 : vector<8x64xf32>
    %c1_291 = arith.constant 1 : index
    %c0_292 = arith.constant 0 : index
    %315 = vector.load %arg10[%c1_291, %c0_292] : memref<10x80xf32, #tpu.memory_space<vmem>>, vector<8x64xf32>
    %c2_293 = arith.constant 2 : index
    %c3_294 = arith.constant 3 : index
    %c0_295 = arith.constant 0 : index
    %c0_296 = arith.constant 0 : index
    %316 = vector.load %arg4[%c2_293, %c3_294, %c0_295, %c0_296] : memref<3x9x64x64xf32, #tpu.memory_space<vmem>>, vector<1x1x64x64xf32>
    %317 = vector.shape_cast %316 : vector<1x1x64x64xf32> to vector<64x64xf32>
    %cst_297 = arith.constant dense<0.000000e+00> : vector<8x64xf32>
    %318 = tpu.matmul %315, %317, %cst_297 {dimension_numbers = #tpu.dot_dimension_numbers<[1], [0], [0], [1], [0, 0, 1, 1], [], []>} : vector<8x64xf32>, vector<64x64xf32>, vector<8x64xf32> -> vector<8x64xf32>
    %319 = arith.addf %314, %318 : vector<8x64xf32>
    %c1_298 = arith.constant 1 : index
    %c8_299 = arith.constant 8 : index
    %320 = vector.load %arg10[%c1_298, %c8_299] : memref<10x80xf32, #tpu.memory_space<vmem>>, vector<8x64xf32>
    %c2_300 = arith.constant 2 : index
    %c4_301 = arith.constant 4 : index
    %c0_302 = arith.constant 0 : index
    %c0_303 = arith.constant 0 : index
    %321 = vector.load %arg4[%c2_300, %c4_301, %c0_302, %c0_303] : memref<3x9x64x64xf32, #tpu.memory_space<vmem>>, vector<1x1x64x64xf32>
    %322 = vector.shape_cast %321 : vector<1x1x64x64xf32> to vector<64x64xf32>
    %cst_304 = arith.constant dense<0.000000e+00> : vector<8x64xf32>
    %323 = tpu.matmul %320, %322, %cst_304 {dimension_numbers = #tpu.dot_dimension_numbers<[1], [0], [0], [1], [0, 0, 1, 1], [], []>} : vector<8x64xf32>, vector<64x64xf32>, vector<8x64xf32> -> vector<8x64xf32>
    %324 = arith.addf %319, %323 : vector<8x64xf32>
    %c1_305 = arith.constant 1 : index
    %c16_306 = arith.constant 16 : index
    %325 = vector.load %arg10[%c1_305, %c16_306] : memref<10x80xf32, #tpu.memory_space<vmem>>, vector<8x64xf32>
    %c2_307 = arith.constant 2 : index
    %c5_308 = arith.constant 5 : index
    %c0_309 = arith.constant 0 : index
    %c0_310 = arith.constant 0 : index
    %326 = vector.load %arg4[%c2_307, %c5_308, %c0_309, %c0_310] : memref<3x9x64x64xf32, #tpu.memory_space<vmem>>, vector<1x1x64x64xf32>
    %327 = vector.shape_cast %326 : vector<1x1x64x64xf32> to vector<64x64xf32>
    %cst_311 = arith.constant dense<0.000000e+00> : vector<8x64xf32>
    %328 = tpu.matmul %325, %327, %cst_311 {dimension_numbers = #tpu.dot_dimension_numbers<[1], [0], [0], [1], [0, 0, 1, 1], [], []>} : vector<8x64xf32>, vector<64x64xf32>, vector<8x64xf32> -> vector<8x64xf32>
    %329 = arith.addf %324, %328 : vector<8x64xf32>
    %c2_312 = arith.constant 2 : index
    %c0_313 = arith.constant 0 : index
    %330 = vector.load %arg10[%c2_312, %c0_313] : memref<10x80xf32, #tpu.memory_space<vmem>>, vector<8x64xf32>
    %c2_314 = arith.constant 2 : index
    %c6_315 = arith.constant 6 : index
    %c0_316 = arith.constant 0 : index
    %c0_317 = arith.constant 0 : index
    %331 = vector.load %arg4[%c2_314, %c6_315, %c0_316, %c0_317] : memref<3x9x64x64xf32, #tpu.memory_space<vmem>>, vector<1x1x64x64xf32>
    %332 = vector.shape_cast %331 : vector<1x1x64x64xf32> to vector<64x64xf32>
    %cst_318 = arith.constant dense<0.000000e+00> : vector<8x64xf32>
    %333 = tpu.matmul %330, %332, %cst_318 {dimension_numbers = #tpu.dot_dimension_numbers<[1], [0], [0], [1], [0, 0, 1, 1], [], []>} : vector<8x64xf32>, vector<64x64xf32>, vector<8x64xf32> -> vector<8x64xf32>
    %334 = arith.addf %329, %333 : vector<8x64xf32>
    %c2_319 = arith.constant 2 : index
    %c8_320 = arith.constant 8 : index
    %335 = vector.load %arg10[%c2_319, %c8_320] : memref<10x80xf32, #tpu.memory_space<vmem>>, vector<8x64xf32>
    %c2_321 = arith.constant 2 : index
    %c7_322 = arith.constant 7 : index
    %c0_323 = arith.constant 0 : index
    %c0_324 = arith.constant 0 : index
    %336 = vector.load %arg4[%c2_321, %c7_322, %c0_323, %c0_324] : memref<3x9x64x64xf32, #tpu.memory_space<vmem>>, vector<1x1x64x64xf32>
    %337 = vector.shape_cast %336 : vector<1x1x64x64xf32> to vector<64x64xf32>
    %cst_325 = arith.constant dense<0.000000e+00> : vector<8x64xf32>
    %338 = tpu.matmul %335, %337, %cst_325 {dimension_numbers = #tpu.dot_dimension_numbers<[1], [0], [0], [1], [0, 0, 1, 1], [], []>} : vector<8x64xf32>, vector<64x64xf32>, vector<8x64xf32> -> vector<8x64xf32>
    %339 = arith.addf %334, %338 : vector<8x64xf32>
    %c2_326 = arith.constant 2 : index
    %c16_327 = arith.constant 16 : index
    %340 = vector.load %arg10[%c2_326, %c16_327] : memref<10x80xf32, #tpu.memory_space<vmem>>, vector<8x64xf32>
    %c2_328 = arith.constant 2 : index
    %c8_329 = arith.constant 8 : index
    %c0_330 = arith.constant 0 : index
    %c0_331 = arith.constant 0 : index
    %341 = vector.load %arg4[%c2_328, %c8_329, %c0_330, %c0_331] : memref<3x9x64x64xf32, #tpu.memory_space<vmem>>, vector<1x1x64x64xf32>
    %342 = vector.shape_cast %341 : vector<1x1x64x64xf32> to vector<64x64xf32>
    %cst_332 = arith.constant dense<0.000000e+00> : vector<8x64xf32>
    %343 = tpu.matmul %340, %342, %cst_332 {dimension_numbers = #tpu.dot_dimension_numbers<[1], [0], [0], [1], [0, 0, 1, 1], [], []>} : vector<8x64xf32>, vector<64x64xf32>, vector<8x64xf32> -> vector<8x64xf32>
    %344 = arith.addf %339, %343 : vector<8x64xf32>
    %cst_333 = arith.constant dense<0.000000e+00> : vector<64xf32>
    %345 = vector.multi_reduction <add>, %344, %cst_333 [0] : vector<8x64xf32> to vector<64xf32>
    %346 = vector.shape_cast %345 : vector<64xf32> to vector<1x64xf32>
    %cst_334 = arith.constant dense<0.000000e+00> : vector<1x8xf32>
    %347 = tpu.matmul %346, %0, %cst_334 {dimension_numbers = #tpu.dot_dimension_numbers<[1], [0], [0], [1], [0, 0, 1, 1], [], []>} : vector<1x64xf32>, vector<64x8xf32>, vector<1x8xf32> -> vector<1x8xf32>
    %348 = arith.mulf %344, %344 : vector<8x64xf32>
    %cst_335 = arith.constant dense<0.000000e+00> : vector<64xf32>
    %349 = vector.multi_reduction <add>, %348, %cst_335 [0] : vector<8x64xf32> to vector<64xf32>
    %350 = vector.shape_cast %349 : vector<64xf32> to vector<1x64xf32>
    %cst_336 = arith.constant dense<0.000000e+00> : vector<1x8xf32>
    %351 = tpu.matmul %350, %0, %cst_336 {dimension_numbers = #tpu.dot_dimension_numbers<[1], [0], [0], [1], [0, 0, 1, 1], [], []>} : vector<1x64xf32>, vector<64x8xf32>, vector<1x8xf32> -> vector<1x8xf32>
    %cst_337 = arith.constant 1.562500e-02 : f32
    %352 = vector.broadcast %cst_337 : f32 to vector<1x8xf32>
    %353 = arith.mulf %347, %352 : vector<1x8xf32>
    %cst_338 = arith.constant 1.562500e-02 : f32
    %354 = vector.broadcast %cst_338 : f32 to vector<1x8xf32>
    %355 = arith.mulf %351, %354 : vector<1x8xf32>
    %356 = arith.mulf %353, %353 : vector<1x8xf32>
    %357 = arith.subf %355, %356 : vector<1x8xf32>
    %cst_339 = arith.constant 9.99999974E-6 : f32
    %358 = vector.broadcast %cst_339 : f32 to vector<1x8xf32>
    %359 = arith.addf %357, %358 : vector<1x8xf32>
    %360 = math.rsqrt %359 : vector<1x8xf32>
    %cst_340 = arith.constant dense<0.000000e+00> : vector<1x64xf32>
    %361 = tpu.matmul %353, %1, %cst_340 {dimension_numbers = #tpu.dot_dimension_numbers<[1], [0], [0], [1], [0, 0, 1, 1], [], []>} : vector<1x8xf32>, vector<8x64xf32>, vector<1x64xf32> -> vector<1x64xf32>
    %cst_341 = arith.constant dense<0.000000e+00> : vector<1x64xf32>
    %362 = tpu.matmul %360, %1, %cst_341 {dimension_numbers = #tpu.dot_dimension_numbers<[1], [0], [0], [1], [0, 0, 1, 1], [], []>} : vector<1x8xf32>, vector<8x64xf32>, vector<1x64xf32> -> vector<1x64xf32>
    %363 = vector.broadcast %361 : vector<1x64xf32> to vector<8x64xf32>
    %364 = arith.subf %344, %363 : vector<8x64xf32>
    %365 = vector.broadcast %362 : vector<1x64xf32> to vector<8x64xf32>
    %366 = arith.mulf %364, %365 : vector<8x64xf32>
    %367 = vector.extract_strided_slice %2 {offsets = [4, 0], sizes = [1, 64], strides = [1, 1]} : vector<5x64xf32> to vector<1x64xf32>
    %368 = vector.broadcast %367 : vector<1x64xf32> to vector<8x64xf32>
    %369 = arith.mulf %366, %368 : vector<8x64xf32>
    %370 = vector.extract_strided_slice %3 {offsets = [4, 0], sizes = [1, 64], strides = [1, 1]} : vector<5x64xf32> to vector<1x64xf32>
    %371 = vector.broadcast %370 : vector<1x64xf32> to vector<8x64xf32>
    %372 = arith.addf %369, %371 : vector<8x64xf32>
    %373 = arith.addf %372, %217 : vector<8x64xf32>
    %cst_342 = arith.constant 0.000000e+00 : f32
    %374 = vector.broadcast %cst_342 : f32 to vector<8x64xf32>
    %375 = arith.cmpf oge, %373, %374 : vector<8x64xf32>
    %cst_343 = arith.constant 0.00999999977 : f32
    %376 = vector.broadcast %cst_343 : f32 to vector<8x64xf32>
    %377 = arith.mulf %376, %373 : vector<8x64xf32>
    %378 = arith.select %375, %373, %377 : vector<8x64xi1>, vector<8x64xf32>
    %c0_344 = arith.constant 0 : index
    %c0_345 = arith.constant 0 : index
    %c0_346 = arith.constant 0 : index
    %379 = vector.load %arg9[%c0_344, %c0_345, %c0_346] : memref<1x8x64xf32, #tpu.memory_space<vmem>>, vector<1x8x64xf32>
    %380 = vector.shape_cast %379 : vector<1x8x64xf32> to vector<8x64xf32>
    %381 = vector.shape_cast %378 : vector<8x64xf32> to vector<1x8x64xf32>
    tpu.vector_store %arg9[%c0_344, %c0_345, %c0_346], %381 {strides = array<i32>} : memref<1x8x64xf32, #tpu.memory_space<vmem>>, vector<1x8x64xf32>,
    return
  }
  func.func @transform_0(%arg0: i32) -> (i32, i32, i32, i32) {
    %c0_i32 = arith.constant 0 : i32
    %c0_i32_0 = arith.constant 0 : i32
    %c0_i32_1 = arith.constant 0 : i32
    %c0_i32_2 = arith.constant 0 : i32
    return %arg0, %c0_i32, %c0_i32_0, %c0_i32_1 : i32, i32, i32, i32
  }
  func.func @transform_1(%arg0: i32) -> (i32, i32, i32) {
    %c0_i32 = arith.constant 0 : i32
    %c0_i32_0 = arith.constant 0 : i32
    %c0_i32_1 = arith.constant 0 : i32
    %c0_i32_2 = arith.constant 0 : i32
    return %c0_i32, %c0_i32_0, %c0_i32_1 : i32, i32, i32
  }
  func.func @transform_2(%arg0: i32) -> (i32, i32) {
    %c0_i32 = arith.constant 0 : i32
    %c0_i32_0 = arith.constant 0 : i32
    %c0_i32_1 = arith.constant 0 : i32
    return %c0_i32, %c0_i32_0 : i32, i32
  }
  func.func @transform_3(%arg0: i32) -> (i32, i32, i32, i32) {
    %c0_i32 = arith.constant 0 : i32
    %c0_i32_0 = arith.constant 0 : i32
    %c0_i32_1 = arith.constant 0 : i32
    %c0_i32_2 = arith.constant 0 : i32
    %c0_i32_3 = arith.constant 0 : i32
    return %c0_i32, %c0_i32_0, %c0_i32_1, %c0_i32_2 : i32, i32, i32, i32
  }
  func.func @transform_4(%arg0: i32) -> (i32, i32) {
    %c0_i32 = arith.constant 0 : i32
    %c0_i32_0 = arith.constant 0 : i32
    %c0_i32_1 = arith.constant 0 : i32
    return %c0_i32, %c0_i32_0 : i32, i32
  }
  func.func @transform_5(%arg0: i32) -> (i32, i32) {
    %c0_i32 = arith.constant 0 : i32
    %c0_i32_0 = arith.constant 0 : i32
    %c0_i32_1 = arith.constant 0 : i32
    return %c0_i32, %c0_i32_0 : i32, i32
  }
  func.func @transform_6(%arg0: i32) -> (i32, i32) {
    %c0_i32 = arith.constant 0 : i32
    %c0_i32_0 = arith.constant 0 : i32
    %c0_i32_1 = arith.constant 0 : i32
    return %c0_i32, %c0_i32_0 : i32, i32
  }
  func.func @transform_7(%arg0: i32) -> (i32, i32) {
    %c0_i32 = arith.constant 0 : i32
    %c0_i32_0 = arith.constant 0 : i32
    %c0_i32_1 = arith.constant 0 : i32
    return %c0_i32, %c0_i32_0 : i32, i32
  }
  func.func @transform_8(%arg0: i32) -> (i32, i32, i32) {
    %c0_i32 = arith.constant 0 : i32
    %c0_i32_0 = arith.constant 0 : i32
    %c0_i32_1 = arith.constant 0 : i32
    return %arg0, %c0_i32, %c0_i32_0 : i32, i32, i32
  }
}

</mosaic_0001>

<bundles_post_ra>
// kernel: tile.83
= control target key start
LH: loop header
LB: loop body
LE: loop exit
PB: predicated region body
PF: predicated region fallthrough
CT: control target
= control target key end

     0   :  { %s22_s0 = inlined_call_operand.vmem [shape: f32[8], index: 0, kind: input, shape index: {}]   ;;  %s23_s1 = inlined_call_operand.vmem [shape: f32[8,8], index: 1, kind: output, shape index: {}]  }
   0x1   :  { %v4_v0 = vld [vmem:[%s22_s0] ss:$0 sm:$0xff] }
   0x2   :  { %5 = vst [vmem:[%s23_s1] sm:$0xff] %v4_v0 }

// kernel: tile.100
= control target key start
LH: loop header
LB: loop body
LE: loop exit
PB: predicated region body
PF: predicated region fallthrough
CT: control target
= control target key end

     0   :  { %s67_s10 = smov 56   ;;  %s68_s11 = smov 40   ;;  %vm3_vm0 = vcmask 64512   ;;  %vm9_vm1 = vcmask 523712   ;;  %vm15_vm2 = vcmask 458112   ;;  %vm21_vm3 = vcmask 392512   ;;  %s111_s0 = inlined_call_operand.vmem [shape: f32[8,8], index: 0, kind: input, shape index: {}]   ;;  %s112_s1 = inlined_call_operand.vmem [shape: f32[1,64], index: 1, kind: output, shape index: {}]  }
   0x1   :  { %v53_v0 = vld [vmem:[%s111_s0 + $0x7] sm:$0x1]   ;;  %v55_v1 = vld [vmem:[%s111_s0 + $0x5] sm:$0x1]   ;;  %v54_v2 = vld [vmem:[%s111_s0 + $0x6] sm:$0x1]  }
   0x2   :  { %7 = vrot.lane.b32.xlu0 %v53_v0, %s67_s10  ;;  %19 = vrot.lane.b32.xlu1 %v55_v1, %s68_s11  ;;  %v56_v3 = vld [vmem:[%s111_s0 + $0x4] sm:$0x1]   ;;  %v2_v4 = vld [vmem:[%s111_s0] sm:$0x1]   ;;  %s69_s18 = smov 48   ;;  %s70_s19 = smov 32  }
   0x3   :  { %4 = vst.msk [vmem:[#allocation0] sm:$0x1] %vm3_vm0, %v2_v4   ;;  %v57_v5 = vld [vmem:[%s111_s0 + $0x3] sm:$0x1]   ;;  %v58_v6 = vld [vmem:[%s111_s0 + $0x2] sm:$0x1]  }
   0x4   :  { %s71_s24 = smov 24   ;;  %s72_s25 = smov 16   ;;  %v59_v7 = vld [vmem:[%s111_s0 + $0x1] sm:$0x1]   ;;  %vm27_vm4 = vcmask 326912   ;;  %vm33_vm5 = vcmask 261312  }
   0x5   :  { %s73_s0 = smov 8   ;;  %vm39_vm6 = vcmask 195712   ;;  %vm45_vm7 = vcmask 130112  }
   0x6   :  { %13 = vrot.lane.b32.xlu0 %v54_v2, %s69_s18  ;;  %25 = vrot.lane.b32.xlu1 %v56_v3, %s70_s19 }
   0xa   :  { %31 = vrot.lane.b32.xlu0 %v57_v5, %s71_s24  ;;  %37 = vrot.lane.b32.xlu1 %v58_v6, %s72_s25 }
   0xe   :  { %43 = vrot.lane.b32.xlu0 %v59_v7, %s73_s0 }
  0x74   :  { %v8_v8 = vpop.permute.xlu0 %7   ;;  %v20_v9 = vpop.permute.xlu1 %19  }
  0x75   :  { %10 = vst.msk [vmem:[#allocation0] sm:$0x1] %vm9_vm1, %v8_v8  }
  0x78   :  { %v14_v10 = vpop.permute.xlu0 %13   ;;  %v26_v11 = vpop.permute.xlu1 %25  }
  0x79   :  { %16 = vst.msk [vmem:[#allocation0] sm:$0x1] %vm15_vm2, %v14_v10  }
  0x7a   :  { %22 = vst.msk [vmem:[#allocation0] sm:$0x1] %vm21_vm3, %v20_v9  }
  0x7b   :  { %28 = vst.msk [vmem:[#allocation0] sm:$0x1] %vm27_vm4, %v26_v11  }
  0x7c   :  { %v32_v12 = vpop.permute.xlu0 %31   ;;  %v38_v13 = vpop.permute.xlu1 %37  }
  0x7d   :  { %34 = vst.msk [vmem:[#allocation0] sm:$0x1] %vm33_vm5, %v32_v12  }
  0x7e   :  { %40 = vst.msk [vmem:[#allocation0] sm:$0x1] %vm39_vm6, %v38_v13  }
  0x80   :  { %v44_v14 = vpop.permute.xlu0 %43  }
  0x81   :  { %46 = vst.msk [vmem:[#allocation0] sm:$0x1] %vm45_vm7, %v44_v14  }
  0x88   :  { %v50_v15 = vld [vmem:[#allocation0] sm:$0x1] }
  0x89   :  { %52 = vst [vmem:[%s112_s1] sm:$0x1] %v50_v15 }

// kernel: tile.109
= control target key start
LH: loop header
LB: loop body
LE: loop exit
PB: predicated region body
PF: predicated region fallthrough
CT: control target
= control target key end

     0   :  { %vm4_vm0 = vcmask 1047556   ;;  %s99_s14 = smov 56   ;;  %s100_s19 = smov 40   ;;  %vm6_vm1 = vcmask 64512   ;;  %vm16_vm2 = vcmask 523712   ;;  %vm26_vm3 = vcmask 458112   ;;  %s196_s0 = inlined_call_operand.vmem [shape: f32[8,8,8], index: 0, kind: input, shape index: {}]   ;;  %s197_s1 = inlined_call_operand.vmem [shape: f32[64,8], index: 1, kind: output, shape index: {}]  }
   0x1   :  { %v78_v0 = vld [vmem:[%s196_s0 + $0x7] ss:$8 sm:$0xf]   ;;  %v82_v3 = vld [vmem:[%s196_s0 + $0x5] ss:$8 sm:$0xf]  }
   0x2   :  { %v79_v1 = vld [vmem:[%s196_s0 + $0x7] ss:$8 sm:$0xf0]   ;;  %v83_v4 = vld [vmem:[%s196_s0 + $0x5] ss:$8 sm:$0xf0]  }
   0x3   :  { %v13_v2 = vsel %vm4_vm0, %v79_v1, %v78_v0  ;;  %v33_v5 = vsel %vm4_vm0, %v83_v4, %v82_v3  ;;  %v80_v6 = vld [vmem:[%s196_s0 + $0x6] ss:$8 sm:$0xf]   ;;  %v84_v9 = vld [vmem:[%s196_s0 + $0x4] ss:$8 sm:$0xf]  }
   0x4   :  { %14 = vrot.lane.b32.xlu0 %v13_v2, %s99_s14  ;;  %v81_v7 = vld [vmem:[%s196_s0 + $0x6] ss:$8 sm:$0xf0]   ;;  %34 = vrot.lane.b32.xlu1 %v33_v5, %s100_s19  ;;  %v85_v10 = vld [vmem:[%s196_s0 + $0x4] ss:$8 sm:$0xf0]  }
   0x5   :  { %v23_v8 = vsel %vm4_vm0, %v81_v7, %v80_v6  ;;  %v86_v11 = vld [vmem:[%s196_s0 + $0x3] ss:$8 sm:$0xf]   ;;  %v43_v12 = vsel %vm4_vm0, %v85_v10, %v84_v9  ;;  %s101_s28 = smov 48   ;;  %s102_s4 = smov 32   ;;  %vm36_vm4 = vcmask 392512  }
   0x6   :  { %v87_v13 = vld [vmem:[%s196_s0 + $0x3] ss:$8 sm:$0xf0]   ;;  %v88_v14 = vld [vmem:[%s196_s0 + $0x2] ss:$8 sm:$0xf]  }
   0x7   :  { %v89_v15 = vld [vmem:[%s196_s0 + $0x2] ss:$8 sm:$0xf0]   ;;  %v53_v16 = vsel %vm4_vm0, %v87_v13, %v86_v11  ;;  %v90_v17 = vld [vmem:[%s196_s0 + $0x1] ss:$8 sm:$0xf]  }
   0x8   :  { %24 = vrot.lane.b32.xlu0 %v23_v8, %s101_s28  ;;  %44 = vrot.lane.b32.xlu1 %v43_v12, %s102_s4  ;;  %v63_v18 = vsel %vm4_vm0, %v89_v15, %v88_v14  ;;  %v91_v19 = vld [vmem:[%s196_s0 + $0x1] ss:$8 sm:$0xf0]   ;;  %v2_v20 = vld [vmem:[%s196_s0] ss:$8 sm:$0xf]  }
   0x9   :  { %v3_v21 = vld [vmem:[%s196_s0] ss:$8 sm:$0xf0]   ;;  %s103_s0 = smov 24   ;;  %s104_s13 = smov 16   ;;  %v73_v23 = vsel %vm4_vm0, %v91_v19, %v90_v17  ;;  %vm46_vm5 = vcmask 326912  }
   0xa   :  { %v5_v22 = vsel %vm4_vm0, %v3_v21, %v2_v20  ;;  %s105_s16 = smov 8   ;;  %vm56_vm6 = vcmask 261312   ;;  %vm66_vm7 = vcmask 195712   ;;  %vm76_vm8 = vcmask 130112  }
   0xb   :  { %7 = vst.msk [vmem:[%s197_s1] sm:$0xff] %vm6_vm1, %v5_v22  }
   0xc   :  { %54 = vrot.lane.b32.xlu0 %v53_v16, %s103_s0  ;;  %64 = vrot.lane.b32.xlu1 %v63_v18, %s104_s13 }
  0x10   :  { %74 = vrot.lane.b32.xlu0 %v73_v23, %s105_s16 }
  0x76   :  { %v15_v24 = vpop.permute.xlu0 %14   ;;  %v35_v25 = vpop.permute.xlu1 %34  }
  0x77   :  { %17 = vst.msk [vmem:[%s197_s1] sm:$0xff] %vm16_vm2, %v15_v24  }
  0x7a   :  { %v25_v26 = vpop.permute.xlu0 %24   ;;  %v45_v27 = vpop.permute.xlu1 %44  }
  0x7b   :  { %27 = vst.msk [vmem:[%s197_s1] sm:$0xff] %vm26_vm3, %v25_v26  }
  0x7c   :  { %37 = vst.msk [vmem:[%s197_s1] sm:$0xff] %vm36_vm4, %v35_v25  }
  0x7d   :  { %47 = vst.msk [vmem:[%s197_s1] sm:$0xff] %vm46_vm5, %v45_v27  }
  0x7e   :  { %v55_v28 = vpop.permute.xlu0 %54   ;;  %v65_v29 = vpop.permute.xlu1 %64  }
  0x7f   :  { %57 = vst.msk [vmem:[%s197_s1] sm:$0xff] %vm56_vm6, %v55_v28  }
  0x80   :  { %67 = vst.msk [vmem:[%s197_s1] sm:$0xff] %vm66_vm7, %v65_v29  }
  0x82   :  { %v75_v30 = vpop.permute.xlu0 %74  }
  0x83   :  { %77 = vst.msk [vmem:[%s197_s1] sm:$0xff] %vm76_vm8, %v75_v30  }

// kernel: stacked_residual_blocks_forward.1
= control target key start
LH: loop header
LB: loop body
LE: loop exit
PB: predicated region body
PF: predicated region fallthrough
CT: control target
= control target key end

     0   :  { %s7381_s27 = smov 0   ;;  %s8766_s0 = inlined_call_operand.vmem [shape: f32[2,9,8,32], index: 0, kind: input, shape index: {}]   ;;  %s8767_s1 = inlined_call_operand.vmem [shape: f32[9,32,64], index: 1, kind: input, shape index: {}]   ;;  %s8768_s2 = inlined_call_operand.vmem [shape: f32[32,64], index: 2, kind: input, shape index: {}]   ;;  %s8769_s3 = inlined_call_operand.vmem [shape: f32[3,9,64,64], index: 3, kind: input, shape index: {}]   ;;  %s8770_s4 = inlined_call_operand.vmem [shape: f32[5,64], index: 4, kind: input, shape index: {}]   ;;  %s8771_s5 = inlined_call_operand.vmem [shape: f32[5,64], index: 5, kind: input, shape index: {}]   ;;  %s8772_s6 = inlined_call_operand.vmem [shape: f32[64,8], index: 6, kind: input, shape index: {}]   ;;  %s8773_s7 = inlined_call_operand.vmem [shape: f32[8,64], index: 7, kind: input, shape index: {}]   ;;  %s8774_s8 = inlined_call_operand.vmem [shape: f32[2,8,64], index: 8, kind: output, shape index: {}]  }
   0x1 LB: > { %s5142_s28 = sadd.s32 4294967295, %s7328_s27   ;;  %p5146_p0 = scmp.ge.s32.totalorder %s7328_s27, 1  ;;  %s7328_s27 = sphi %s7381_s27, %s18_s27  }
   0x2   : > { %p262_p1 = scmp.lt.s32.totalorder %s7328_s27, 3 }
   0x4   : > { %p263_p2 = pnand %p5146_p0, %p262_p1 }
   0x5   : > { %v5150_v0 = vld [vmem:[%s8767_s1 + $0x20] sm:$0xff] (!%p263_p2)  ;;  %v5151_v1 = vld [vmem:[%s8767_s1 + $0x28] sm:$0xff] (!%p263_p2)  ;;  %v5152_v2 = vld [vmem:[%s8767_s1 + $0x30] sm:$0xff] (!%p263_p2)  ;;  %v7330_v3 = vmov (!%p263_p2), 0.0|0.0   ;;  %vm7331_vm0 = vmmov (!%p263_p2), 0   ;;  %v7332_v6 = vmov (!%p263_p2), 0.0  }
   0x6   : > { %266 = sbr.rel (%p263_p2) target bundleno = 4421 (0x1145), region = 52  ;;  %6726 = vmatprep.subr.bf16.mxu0 (!%p263_p2), %v7330_v3  ;;  %v6727_v4 = vpack.c.bf16 (!%p263_p2), %v5151_v1, %v5150_v0  ;;  %v5153_v5 = vld [vmem:[%s8767_s1 + $0x38] sm:$0xff] (!%p263_p2)  ;;  %5871 = vmatprep.mubr.msk.f32.mxu0 (!%p263_p2), %vm7331_vm0, %v7332_v6  ;;  %p295_p3 = scmp.lt.s32.totalorder (!%p263_p2), %s5142_s28, 1  ;;  %v320_v8 = vld [vmem:[%s8767_s1] sm:$0xff] (!%p263_p2)  ;;  %v321_v9 = vld [vmem:[%s8767_s1 + $0x8] sm:$0xff] (!%p263_p2)  ;;  %vm331_vm1 = vcmask (!%p263_p2), 261120  }
   0x7   : > { %6792 = vmatprep.subr.bf16.mxu1 (!%p263_p2), %v7330_v3  ;;  %5997 = vmatprep.mubr.msk.f32.mxu1 (!%p263_p2), %vm7331_vm0, %v7332_v6  ;;  %v6730_v7 = vpack.c.bf16 (!%p263_p2), %v5153_v5, %v5152_v2  ;;  %v6733_v10 = vpack.c.bf16 (!%p263_p2), %v321_v9, %v320_v8  ;;  %v322_v12 = vld [vmem:[%s8767_s1 + $0x10] sm:$0xff] (!%p263_p2)  ;;  %v323_v13 = vld [vmem:[%s8767_s1 + $0x18] sm:$0xff] (!%p263_p2)  ;;  %v5157_v15 = vld [vmem:[%s8767_s1 + $0x40] sm:$0xff] (!%p263_p2)  ;;  %vm1045_vm2 = vcmask (!%p263_p2), 523264   ;;  %vm1213_vm3 = vcmask (!%p263_p2), 64512   ;;  %s7333_s30 = smov (!%p263_p2), 8  }
   0x8   : > { %6728 = vmatpush3.bf16.msra.mxu0 (!%p263_p2), %v6727_v4  ;;  %v6736_v14 = vpack.c.bf16 (!%p263_p2), %v323_v13, %v322_v12  ;;  %v5158_v16 = vld [vmem:[%s8767_s1 + $0x48] sm:$0xff] (!%p263_p2)  ;;  %v304_v19 = vld [vmem:[%s8772_s6] sm:$0xff] (!%p263_p2)  ;;  %v5159_v21 = vld [vmem:[%s8767_s1 + $0x50] sm:$0xff] (!%p263_p2)  ;;  %vm315_vm4 = vcmask (!%p263_p2), 654336   ;;  %vm317_vm5 = vcmask (!%p263_p2), 648192   ;;  %vm1387_vm7 = vcmask (!%p263_p2), 588864  }
   0x9   : > { %6729 = vmatprep.subr.bf16.mxu0 (!%p263_p2), %v7330_v3  ;;  %v6739_v18 = vpack.c.bf16 (!%p263_p2), %v5158_v16, %v5157_v15  ;;  %v305_v20 = vld [vmem:[%s8772_s6 + $0x8] sm:$0xff] (!%p263_p2)  ;;  %v5160_v22 = vld [vmem:[%s8767_s1 + $0x58] sm:$0xff] (!%p263_p2)  ;;  %v5163_v25 = vld [vmem:[%s8767_s1 + $0x60] sm:$0xff] (!%p263_p2)  ;;  %316 = vst.msk [vmem:[#allocation2] sm:$0xff] (!%p263_p2), %vm315_vm4, %v7332_v6  ;;  %s7334_s25 = smov (!%p263_p2), 112   ;;  %s7335_s26 = smov (!%p263_p2), 120  }
   0xa   : > { %v7454_v23 = vpack.c.bf16 (!%p263_p2), %v305_v20, %v304_v19  ;;  %v6742_v24 = vpack.c.bf16 (!%p263_p2), %v5160_v22, %v5159_v21  ;;  %v5164_v26 = vld [vmem:[%s8767_s1 + $0x68] sm:$0xff] (!%p263_p2)  ;;  %v5165_v29 = vld [vmem:[%s8767_s1 + $0x70] sm:$0xff] (!%p263_p2)  ;;  %v5166_v30 = vld [vmem:[%s8767_s1 + $0x78] sm:$0xff] (!%p263_p2)  ;;  %318 = vst.msk [vmem:[#allocation2 + $0x8] sm:$0x3] (!%p263_p2), %vm317_vm5, %v7332_v6 }
   0xb   : > { %v6745_v28 = vpack.c.bf16 (!%p263_p2), %v5164_v26, %v5163_v25  ;;  %v6748_v31 = vpack.c.bf16 (!%p263_p2), %v5166_v30, %v5165_v29  ;;  %v5169_v32 = vld [vmem:[%s8767_s1 + $0x80] sm:$0xff] (!%p263_p2)  ;;  %v5170_v33 = vld [vmem:[%s8767_s1 + $0x88] sm:$0xff] (!%p263_p2)  ;;  %v5171_v36 = vld [vmem:[%s8767_s1 + $0x90] sm:$0xff] (!%p263_p2) }
   0xc   : > { %6731 = vmatpush3.bf16.msra.mxu0 (!%p263_p2), %v6730_v7  ;;  %6794 = vmatpush3.bf16.msra.mxu1 (!%p263_p2), %v7454_v23  ;;  %v6751_v35 = vpack.c.bf16 (!%p263_p2), %v5170_v33, %v5169_v32  ;;  %v5172_v37 = vld [vmem:[%s8767_s1 + $0x98] sm:$0xff] (!%p263_p2)  ;;  %v5175_v39 = vld [vmem:[%s8767_s1 + $0xa0] sm:$0xff] (!%p263_p2)  ;;  %v5176_v40 = vld [vmem:[%s8767_s1 + $0xa8] sm:$0xff] (!%p263_p2) }
   0xd   : > { %s8776_s28 = smov (!%p295_p3, %s5142_s28), 1  ;;  %6732 = vmatprep.subr.bf16.mxu0 %v7330_v3  ;;  %6795 = vmatprep.subr.bf16.mxu1 %v7330_v3  ;;  %v6754_v38 = vpack.c.bf16 %v5172_v37, %v5171_v36  ;;  %v6757_v42 = vpack.c.bf16 %v5176_v40, %v5175_v39  ;;  %v5177_v43 = vld [vmem:[%s8767_s1 + $0xb0] sm:$0xff]  ;;  %v5178_v44 = vld [vmem:[%s8767_s1 + $0xb8] sm:$0xff]  ;;  %v5181_v46 = vld [vmem:[%s8767_s1 + $0xc0] sm:$0xff] }
   0xe   : > { %s7294_s19 = smul.u32 72, %s8776_s28  ;;  %v6760_v45 = vpack.c.bf16 %v5178_v44, %v5177_v43  ;;  %v5182_v47 = vld [vmem:[%s8767_s1 + $0xc8] sm:$0xff]  ;;  %v5183_v50 = vld [vmem:[%s8767_s1 + $0xd0] sm:$0xff]  ;;  %v5184_v51 = vld [vmem:[%s8767_s1 + $0xd8] sm:$0xff] }
   0xf   : > { %v6763_v49 = vpack.c.bf16 %v5182_v47, %v5181_v46  ;;  %v6766_v52 = vpack.c.bf16 %v5184_v51, %v5183_v50  ;;  %v5187_v53 = vld [vmem:[%s8767_s1 + $0xe0] sm:$0xff]  ;;  %v5188_v54 = vld [vmem:[%s8767_s1 + $0xe8] sm:$0xff]  ;;  %v5189_v57 = vld [vmem:[%s8767_s1 + $0xf0] sm:$0xff] }
  0x10   : > { %s7420_s22 = scalar_lea.vmem %s8766_s0, %s7294_s19  ;;  %v6769_v56 = vpack.c.bf16 %v5188_v54, %v5187_v53  ;;  %v5190_v58 = vld [vmem:[%s8767_s1 + $0xf8] sm:$0xff]  ;;  %v5193_v60 = vld [vmem:[%s8767_s1 + $0x100] sm:$0xff]  ;;  %v5194_v61 = vld [vmem:[%s8767_s1 + $0x108] sm:$0xff] }
  0x11   : > { %v5149_v11 = vld [vmem:[%s7420_s22 + $0x8] sm:$0xff]  ;;  %v319_v17 = vld [vmem:[%s7420_s22] sm:$0xff]  ;;  %v5156_v27 = vld [vmem:[%s7420_s22 + $0x10] sm:$0xff]  ;;  %v6772_v59 = vpack.c.bf16 %v5190_v58, %v5189_v57  ;;  %v6775_v63 = vpack.c.bf16 %v5194_v61, %v5193_v60 }
  0x12   : > { %5872 = vmatmul.mubr.msk.f32.vlgmr.msra.gmra.mrb[0].mxu0 %vm331_vm1, %v5149_v11  ;;  %v5162_v34 = vld [vmem:[%s7420_s22 + $0x18] sm:$0xff]  ;;  %v7505_v41 = vld [vmem:[%s7420_s22 + $0x20] sm:$0xff]  ;;  %v7526_v48 = vld [vmem:[%s7420_s22 + $0x28] sm:$0xff] }
  0x13   : > { %6734 = vmatpush3.bf16.msra.mxu0 %v6733_v10  ;;  %5882 = vmatprep.mubr.msk.f32.mxu0 %vm7331_vm0, %v7332_v6  ;;  %v5180_v55 = vld [vmem:[%s7420_s22 + $0x30] sm:$0xff]  ;;  %v7565_v62 = vld [vmem:[%s7420_s22 + $0x38] sm:$0xff]  ;;  %v7580_v4 = vld [vmem:[%s7420_s22 + $0x40] sm:$0xff] }
  0x14   : > { %6735 = vmatprep.subr.bf16.mxu0 %v7330_v3  ;;  %v5195_v0 = vld [vmem:[%s8767_s1 + $0x110] sm:$0xff]  ;;  %v5196_v1 = vld [vmem:[%s8767_s1 + $0x118] sm:$0xff]  ;;  %v308_v9 = vld [vmem:[%s8772_s6 + $0x20] sm:$0xff] }
  0x15   : > { %v6778_v2 = vpack.c.bf16 %v5196_v1, %v5195_v0  ;;  %v306_v5 = vld [vmem:[%s8772_s6 + $0x10] sm:$0xff]  ;;  %v307_v7 = vld [vmem:[%s8772_s6 + $0x18] sm:$0xff]  ;;  %v309_v10 = vld [vmem:[%s8772_s6 + $0x28] sm:$0xff] }
  0x16   : > { %v7595_v8 = vpack.c.bf16 %v307_v7, %v306_v5  ;;  %v7607_v11 = vpack.c.bf16 %v309_v10, %v308_v9  ;;  %v310_v12 = vld [vmem:[%s8772_s6 + $0x30] sm:$0xff]  ;;  %v311_v13 = vld [vmem:[%s8772_s6 + $0x38] sm:$0xff]  ;;  %v7644_v33 = vld [vmem:[%s8773_s7] sm:$0xff] }
  0x17   : > { %6737 = vmatpush3.bf16.msra.mxu0 %v6736_v14  ;;  %v7619_v14 = vpack.c.bf16 %v311_v13, %v310_v12  ;;  %v7667_v53 = vld [vmem:[%s8770_s4] sm:$0x1f]  ;;  %v5203_v5 = vld [vmem:[%s8769_s3 + $0x48] sm:$0xff]  ;;  %v5204_v7 = vld [vmem:[%s8769_s3 + $0x50] sm:$0xff] }
  0x18   : > { %6738 = vmatprep.subr.bf16.mxu0 %v7330_v3  ;;  %6797 = vmatpush3.bf16.msra.mxu1 %v7595_v8  ;;  %v5205_v10 = vld [vmem:[%s8769_s3 + $0x58] sm:$0xff]  ;;  %v5206_v13 = vld [vmem:[%s8769_s3 + $0x60] sm:$0xff] }
  0x19   : > { %6798 = vmatprep.subr.bf16.mxu1 %v7330_v3  ;;  %v6808_v12 = vpack.c.bf16 %v5205_v10, %v5204_v7  ;;  %v5227_v7 = vld [vmem:[%s8769_s3 + $0xf0] sm:$0xff] }
  0x1a   : > { %5883 = vmatmul.mubr.msk.f32.vlgmr.msra.gmra.mrb[0].mxu0 %vm331_vm1, %v319_v17 }
  0x1b   : > { %6740 = vmatpush3.bf16.msra.mxu0 %v6739_v18  ;;  %5893 = vmatprep.mubr.msk.f32.mxu0 %vm7331_vm0, %v7332_v6 }
  0x1c   : > { %6741 = vmatprep.subr.bf16.mxu0 %v7330_v3  ;;  %6800 = vmatpush3.bf16.msra.mxu1 %v7607_v11 }
  0x1d   : > { %6801 = vmatprep.subr.bf16.mxu1 %v7330_v3 }
  0x1f   : > { %6743 = vmatpush3.bf16.msra.mxu0 %v6742_v24 }
  0x20   : > { %6744 = vmatprep.subr.bf16.mxu0 %v7330_v3  ;;  %6803 = vmatpush3.bf16.msra.mxu1 %v7619_v14 }
  0x21   : > { %6000 = vmatprep.subr.mxu1 %v7332_v6 }
  0x22   : > { %5894 = vmatmul.mubr.msk.f32.vlgmr.msra.gmra.mrb[0].mxu0 %vm331_vm1, %v5156_v27 }
  0x23   : > { %6746 = vmatpush3.bf16.msra.mxu0 %v6745_v28  ;;  %5904 = vmatprep.mubr.msk.f32.mxu0 %vm7331_vm0, %v7332_v6 }
  0x24   : > { %6747 = vmatprep.subr.bf16.mxu0 %v7330_v3 }
  0x27   : > { %6749 = vmatpush3.bf16.msra.mxu0 %v6748_v31 }
  0x28   : > { %6750 = vmatprep.subr.bf16.mxu0 %v7330_v3 }
  0x2a   : > { %5905 = vmatmul.mubr.msk.f32.vlgmr.msra.gmra.mrb[0].mxu0 %vm331_vm1, %v5162_v34 }
  0x2b   : > { %6752 = vmatpush3.bf16.msra.mxu0 %v6751_v35  ;;  %5915 = vmatprep.mubr.msk.f32.mxu0 %vm7331_vm0, %v7332_v6 }
  0x2c   : > { %6753 = vmatprep.subr.bf16.mxu0 %v7330_v3 }
  0x2f   : > { %6755 = vmatpush3.bf16.msra.mxu0 %v6754_v38 }
  0x30   : > { %6756 = vmatprep.subr.bf16.mxu0 %v7330_v3 }
  0x32   : > { %5916 = vmatmul.mubr.msk.f32.vlgmr.msra.gmra.mrb[0].mxu0 %vm331_vm1, %v7505_v41 }
  0x33   : > { %6758 = vmatpush3.bf16.msra.mxu0 %v6757_v42  ;;  %5926 = vmatprep.mubr.msk.f32.mxu0 %vm7331_vm0, %v7332_v6 }
  0x34   : > { %6759 = vmatprep.subr.bf16.mxu0 %v7330_v3 }
  0x37   : > { %6761 = vmatpush3.bf16.msra.mxu0 %v6760_v45  ;;  %v1360_v45 = vlaneseq }
  0x38   : > { %6762 = vmatprep.subr.bf16.mxu0 %v7330_v3 }
  0x39   : > { %v7658_v46 = vshrl.u32 %v1360_v45, 7 }
  0x3a   : > { %5927 = vmatmul.mubr.msk.f32.vlgmr.msra.gmra.mrb[0].mxu0 %vm331_vm1, %v7526_v48 }
  0x3b   : > { %6764 = vmatpush3.bf16.msra.mxu0 %v6763_v49  ;;  %5937 = vmatprep.mubr.msk.f32.mxu0 %vm7331_vm0, %v7332_v6  ;;  %v7661_v47 = vsub.s32 0, %v7658_v46 }
  0x3c   : > { %6765 = vmatprep.subr.bf16.mxu0 %v7330_v3 }
  0x3d   : > { %v1373_v57 = vrot.slane %v7667_v53, %v7661_v47 }
  0x3f   : > { %6767 = vmatpush3.bf16.msra.mxu0 %v6766_v52 }
  0x40   : > { %6768 = vmatprep.subr.bf16.mxu0 %v7330_v3 }
  0x42   : > { %5938 = vmatmul.mubr.msk.f32.vlgmr.msra.gmra.mrb[0].mxu0 %vm331_vm1, %v5180_v55  ;;  %v7672_v55 = vld [vmem:[%s8771_s5] sm:$0x1f] }
  0x43   : > { %6770 = vmatpush3.bf16.msra.mxu0 %v6769_v56  ;;  %5948 = vmatprep.mubr.msk.f32.mxu0 %vm7331_vm0, %v7332_v6  ;;  %v1378_v60 = vrot.slane %v7672_v55, %v7661_v47 }
  0x44   : > { %6771 = vmatprep.subr.bf16.mxu0 %v7330_v3 }
  0x47   : > { %6773 = vmatpush3.bf16.msra.mxu0 %v6772_v59 }
  0x48   : > { %6774 = vmatprep.subr.bf16.mxu0 %v7330_v3 }
  0x4a   : > { %5949 = vmatmul.mubr.msk.f32.vlgmr.msra.gmra.mrb[0].mxu0 %vm331_vm1, %v7565_v62 }
  0x4b   : > { %6776 = vmatpush3.bf16.msra.mxu0 %v6775_v63  ;;  %5959 = vmatprep.mubr.msk.f32.mxu0 %vm7331_vm0, %v7332_v6 }
  0x4c   : > { %6777 = vmatprep.subr.bf16.mxu0 %v7330_v3 }
  0x4f   : > { %6779 = vmatpush3.bf16.msra.mxu0 %v6778_v2  ;;  %v5202_v2 = vld [vmem:[%s8769_s3 + $0x40] sm:$0xff] }
  0x50   : > { %6780 = vmatprep.subr.bf16.mxu0 %v7330_v3  ;;  %v6805_v9 = vpack.c.bf16 %v5203_v5, %v5202_v2  ;;  %v5226_v2 = vld [vmem:[%s8769_s3 + $0xe8] sm:$0xff] }
  0x52   : > { %5960 = vmatmul.mubr.msk.f32.vlgmr.msra.gmra.mrb[0].mxu0 %vm331_vm1, %v7580_v4 }
  0x53   : > { %6782 = vmatpush3.bf16.msra.mxu0 %v7454_v23  ;;  %5978 = vmatprep.mubr.msk.f32.mxu0 %vm7331_vm0, %v7332_v6 }
  0x54   : > { %6783 = vmatprep.subr.bf16.mxu0 %v7330_v3 }
  0x57   : > { %6785 = vmatpush3.bf16.msra.mxu0 %v7595_v8 }
  0x58   : > { %6786 = vmatprep.subr.bf16.mxu0 %v7330_v3 }
  0x5b   : > { %6788 = vmatpush3.bf16.msra.mxu0 %v7607_v11 }
  0x5c   : > { %6789 = vmatprep.subr.bf16.mxu0 %v7330_v3 }
  0x5f   : > { %6791 = vmatpush3.bf16.msra.mxu0 %v7619_v14 }
  0x60   : > { %6912 = vmatprep.subr.bf16.mxu0 %v7330_v3 }
 0x125   : > { %v1040_v15 = vpop.f32.mrb[0].mxu0 }
 0x126   : > { %v1046_v16 = vsel %vm1045_vm2, %v1040_v15, 0.0  ;;  %v1126_v17 = vmul.f32 %v1040_v15, %v1040_v15  ;;  %v5961_v18 = vpop.f32.mrb[1].mxu0 }
 0x127   : > { %v1047_v19 = vrot.slane %v1046_v16, 4  ;;  %v5209_v18 = vld [vmem:[%s8769_s3 + $0x78] sm:$0xff] }
 0x128   : > { %v1127_v20 = vsel %vm1045_vm2, %v1126_v17, 0.0  ;;  %v5208_v17 = vld [vmem:[%s8769_s3 + $0x70] sm:$0xff] }
 0x129   : > { %v1048_v21 = vadd.f32 %v1047_v19, %v1046_v16  ;;  %v1128_v22 = vrot.slane %v1127_v20, 4  ;;  %v6814_v19 = vpack.c.bf16 %v5209_v18, %v5208_v17  ;;  %v5233_v17 = vld [vmem:[%s8769_s3 + $0x118] sm:$0xff] }
 0x12b   : > { %v1049_v24 = vrot.slane %v1048_v21, 2  ;;  %v1129_v25 = vadd.f32 %v1128_v22, %v1127_v20 }
 0x12d   : > { %v1050_v26 = vadd.f32 %v1049_v24, %v1048_v21  ;;  %v1130_v27 = vrot.slane %v1129_v25, 2 }
 0x12f   : > { %v1051_v28 = vrot.slane %v1050_v26, 1  ;;  %v1131_v29 = vadd.f32 %v1130_v27, %v1129_v25  ;;  %v1390_v25 = vld [vmem:[%s8769_s3] sm:$0xff] }
 0x131   : > { %v1052_v30 = vadd.f32 %v1051_v28, %v1050_v26  ;;  %v1132_v31 = vrot.slane %v1131_v29, 1  ;;  %v1391_v26 = vld [vmem:[%s8769_s3 + $0x8] sm:$0xff]  ;;  %v1392_v28 = vld [vmem:[%s8769_s3 + $0x10] sm:$0xff] }
 0x132   : > { %v6817_v27 = vpack.c.bf16 %v1391_v26, %v1390_v25  ;;  %v5237_v25 = vld [vmem:[%s8769_s3 + $0x138] sm:$0xff] }
 0x133   : > { %5979 = vmatmul.mubr.msk.f32.vlgmr.msra.gmra.mrb[2].mxu0 %vm1045_vm2, %v1052_v30  ;;  %v1133_v32 = vadd.f32 %v1132_v31, %v1131_v29  ;;  %v1393_v29 = vld [vmem:[%s8769_s3 + $0x18] sm:$0xff] }
 0x134   : > { %6914 = vmatpush3.bf16.msra.mxu0 %v7454_v23  ;;  %6197 = vmatprep.mubr.msk.f32.mxu0 %vm7331_vm0, %v7332_v6  ;;  %v6820_v31 = vpack.c.bf16 %v1393_v29, %v1392_v28  ;;  %v5240_v28 = vld [vmem:[%s8769_s3 + $0x148] sm:$0xff] }
 0x135   : > { %5998 = vmatmul.mubr.msk.f32.vlgmr.msra.gmra.mrb[0].mxu1 %vm1045_vm2, %v1133_v32  ;;  %6915 = vmatprep.subr.bf16.mxu0 %v7330_v3  ;;  %v1394_v32 = vld [vmem:[%s8769_s3 + $0x20] sm:$0xff] }
 0x136   : > { %6002 = vmatprep.mubr.msk.f32.mxu1 %vm7331_vm0, %v7332_v6  ;;  %6001 = vmatpush3.msra.mxu1 %v7644_v33 }
 0x137   : > { %6005 = vmatprep.subr.mxu1 %v7332_v6 }
 0x138   : > { %6917 = vmatpush3.bf16.msra.mxu0 %v7595_v8 }
 0x139   : > { %6918 = vmatprep.subr.bf16.mxu0 %v7330_v3 }
 0x13c   : > { %6920 = vmatpush3.bf16.msra.mxu0 %v7607_v11 }
 0x13d   : > { %6921 = vmatprep.subr.bf16.mxu0 %v7330_v3 }
 0x140   : > { %6923 = vmatpush3.bf16.msra.mxu0 %v7619_v14 }
 0x141   : > { %6924 = vmatprep.subr.bf16.mxu0 %v7330_v3 }
 0x206   : > { %v1122_v34 = vpop.f32.mrb[2].mxu0 }
 0x207   : > { %v1207_v35 = vmul.f32 0.015625, %v1122_v34  ;;  %v5980_v36 = vpop.f32.mrb[3].mxu0  ;;  %v1395_v34 = vld [vmem:[%s8769_s3 + $0x28] sm:$0xff] }
 0x208   : > { %v1203_v37 = vpop.f32.mrb[0].mxu1  ;;  %v1396_v36 = vld [vmem:[%s8769_s3 + $0x30] sm:$0xff] }
 0x209   : > { %v1209_v38 = vmul.f32 %v1207_v35, %v1207_v35  ;;  %v1208_v39 = vmul.f32 0.015625, %v1203_v37  ;;  %v5999_v40 = vpop.f32.mrb[1].mxu1  ;;  %6003 = vmatmul.mubr.msk.f32.vlgmr.msra.gmra.mrb[2].mxu1 %vm1213_vm3, %v1207_v35  ;;  %v6823_v35 = vpack.c.bf16 %v1395_v34, %v1394_v32  ;;  %v1397_v37 = vld [vmem:[%s8769_s3 + $0x38] sm:$0xff] }
 0x20a   : > { %6006 = vmatpush3.msra.mxu1 %v7644_v33  ;;  %6007 = vmatprep.mubr.msk.f32.mxu1 %vm7331_vm0, %v7332_v6  ;;  %v5213_v40 = vld [vmem:[%s8769_s3 + $0x88] sm:$0xff] }
 0x20b   : > { %v1210_v42 = vsub.f32 %v1208_v39, %v1209_v38  ;;  %6804 = vmatprep.subr.bf16.mxu1 %v7330_v3  ;;  %v6826_v38 = vpack.c.bf16 %v1397_v37, %v1396_v36  ;;  %v5212_v39 = vld [vmem:[%s8769_s3 + $0x80] sm:$0xff]  ;;  %v5244_v36 = vld [vmem:[%s8769_s3 + $0x168] sm:$0xff] }
 0x20d   : > { %v1211_v43 = vadd.f32 1e-05, %v1210_v42  ;;  %v6829_v42 = vpack.c.bf16 %v5213_v40, %v5212_v39  ;;  %v5246_v39 = vld [vmem:[%s8769_s3 + $0x178] sm:$0xff] }
 0x20f   : > { %7309 = vrsqrt.f32 %v1211_v43  ;;  %v5214_v43 = vld [vmem:[%s8769_s3 + $0x90] sm:$0xff] }
 0x219   : > { %v7310_v44 = vpop.eup %7309 }
 0x21a   : > { %6008 = vmatmul.mubr.msk.f32.vlgmr.msra.gmra.mrb[4].mxu1 %vm1213_vm3, %v7310_v44  ;;  %v5215_v44 = vld [vmem:[%s8769_s3 + $0x98] sm:$0xff] }
 0x21b   : > { %6026 = vmatprep.mubr.msk.f32.mxu1 %vm7331_vm0, %v7332_v6  ;;  %6806 = vmatpush3.bf16.msra.mxu1 %v6805_v9  ;;  %v6832_v45 = vpack.c.bf16 %v5215_v44, %v5214_v43  ;;  %v5228_v9 = vld [vmem:[%s8769_s3 + $0xf8] sm:$0xff]  ;;  %v5249_v43 = vld [vmem:[%s8769_s3 + $0x188] sm:$0xff] }
 0x21c   : > { %6807 = vmatprep.subr.bf16.mxu1 %v7330_v3  ;;  %v6850_v10 = vpack.c.bf16 %v5228_v9, %v5227_v7  ;;  %v5262_v7 = vld [vmem:[%s8769_s3 + $0x1e8] sm:$0xff] }
 0x21f   : > { %6809 = vmatpush3.bf16.msra.mxu1 %v6808_v12  ;;  %v5230_v12 = vld [vmem:[%s8769_s3 + $0x100] sm:$0xff] }
 0x220   : > { %6810 = vmatprep.subr.bf16.mxu1 %v7330_v3 }
 0x2dc   : > { %v1283_v49 = vpop.f32.mrb[2].mxu1 }
 0x2dd   : > { %v1363_v50 = vrot.slane %v1283_v49, %v7661_v47  ;;  %v6004_v51 = vpop.f32.mrb[3].mxu1  ;;  %v5216_v49 = vld [vmem:[%s8769_s3 + $0xa0] sm:$0xff] }
 0x2df   : > { %v1364_v52 = vsub.f32 %v1040_v15, %v1363_v50  ;;  %v5207_v15 = vld [vmem:[%s8769_s3 + $0x68] sm:$0xff] }
 0x2e0   : > { %v6811_v16 = vpack.c.bf16 %v5207_v15, %v5206_v13  ;;  %v5217_v50 = vld [vmem:[%s8769_s3 + $0xa8] sm:$0xff] }
 0x2e1   : > { %v6835_v51 = vpack.c.bf16 %v5217_v50, %v5216_v49  ;;  %v5231_v13 = vld [vmem:[%s8769_s3 + $0x108] sm:$0xff]  ;;  %v5251_v49 = vld [vmem:[%s8769_s3 + $0x198] sm:$0xff] }
 0x2e2   : > { %6812 = vmatpush3.bf16.msra.mxu1 %v6811_v16  ;;  %v6853_v15 = vpack.c.bf16 %v5231_v13, %v5230_v12  ;;  %v5232_v16 = vld [vmem:[%s8769_s3 + $0x110] sm:$0xff]  ;;  %v5266_v13 = vld [vmem:[%s8769_s3 + $0x200] sm:$0xff] }
 0x2e3   : > { %6813 = vmatprep.subr.bf16.mxu1 %v7330_v3  ;;  %v6856_v18 = vpack.c.bf16 %v5233_v17, %v5232_v16  ;;  %v5268_v17 = vld [vmem:[%s8769_s3 + $0x210] sm:$0xff] }
 0x2e6   : > { %6815 = vmatpush3.bf16.msra.mxu1 %v6814_v19  ;;  %v5234_v19 = vld [vmem:[%s8769_s3 + $0x120] sm:$0xff] }
 0x2e7   : > { %6816 = vmatprep.subr.bf16.mxu1 %v7330_v3 }
 0x2ed   : > { %v1356_v54 = vpop.f32.mrb[4].mxu1 }
 0x2ee   : > { %v1368_v56 = vrot.slane %v1356_v54, %v7661_v47  ;;  %v6009_v58 = vpop.f32.mrb[5].mxu1  ;;  %v5219_v54 = vld [vmem:[%s8769_s3 + $0xb8] sm:$0xff] }
 0x2ef   : > { %v5222_v58 = vld [vmem:[%s8769_s3 + $0xc8] sm:$0xff] }
 0x2f0   : > { %v1369_v59 = vmul.f32 %v1368_v56, %v1364_v52  ;;  %v5218_v52 = vld [vmem:[%s8769_s3 + $0xb0] sm:$0xff] }
 0x2f1   : > { %v6838_v56 = vpack.c.bf16 %v5219_v54, %v5218_v52  ;;  %v5252_v52 = vld [vmem:[%s8769_s3 + $0x1a0] sm:$0xff]  ;;  %v5253_v54 = vld [vmem:[%s8769_s3 + $0x1a8] sm:$0xff] }
 0x2f2   : > { %v1374_v61 = vmul.f32 %v1373_v57, %v1369_v59  ;;  %v5221_v57 = vld [vmem:[%s8769_s3 + $0xc0] sm:$0xff] }
 0x2f3   : > { %v6841_v59 = vpack.c.bf16 %v5222_v58, %v5221_v57  ;;  %v5254_v57 = vld [vmem:[%s8769_s3 + $0x1b0] sm:$0xff]  ;;  %v5255_v58 = vld [vmem:[%s8769_s3 + $0x1b8] sm:$0xff] }
 0x2f4   : > { %v1379_v63 = vadd.f32 %v1378_v60, %v1374_v61  ;;  %v5223_v60 = vld [vmem:[%s8769_s3 + $0xd0] sm:$0xff]  ;;  %v5224_v61 = vld [vmem:[%s8769_s3 + $0xd8] sm:$0xff] }
 0x2f6   : > { %vm1380_vm6 = vcmp.ge.f32.partialorder %v1379_v63, 0.0  ;;  %v1381_v0 = vmul.f32 0.01, %v1379_v63 }
 0x2f8   : > { %v1382_v1 = vsel %vm1380_vm6, %v1379_v63, %v1381_v0  ;;  %v6844_v0 = vpack.c.bf16 %v5224_v61, %v5223_v60  ;;  %v5257_v60 = vld [vmem:[%s8769_s3 + $0x1c0] sm:$0xff]  ;;  %v5258_v61 = vld [vmem:[%s8769_s3 + $0x1c8] sm:$0xff] }
 0x2f9   : > { %1384 = vrot.lane.b32.xlu0 %v1382_v1, %s7333_s30  ;;  %v5225_v1 = vld [vmem:[%s8769_s3 + $0xe0] sm:$0xff] }
 0x2fa   : > { %v6847_v5 = vpack.c.bf16 %v5226_v2, %v5225_v1  ;;  %v5260_v1 = vld [vmem:[%s8769_s3 + $0x1d8] sm:$0xff] }
 0x36b   : > { %v1385_v20 = vpop.permute.xlu0 %1384 }
 0x36c   : > { %1388 = vst.msk [vmem:[#allocation2 + $0x1] sm:$0xff] %vm1387_vm7, %v1385_v20  ;;  %v5235_v20 = vld [vmem:[%s8769_s3 + $0x128] sm:$0xff] }
 0x373   : > { %v1389_v21 = vld [vmem:[#allocation2] sm:$0xff] }
 0x374   : > { %1563 = vrot.lane.b32.xlu1 %v1389_v21, %s7334_s25  ;;  %1408 = vrot.lane.b32.xlu0 %v1389_v21, %s7335_s26  ;;  %v7711_v22 = vld [vmem:[#allocation2 + $0x1] sm:$0xff] }
 0x375   : > { %v7717_v24 = vld [vmem:[#allocation2 + $0x2] sm:$0xff] }
 0x378   : > { %1731 = vrot.lane.b32.xlu1 %v7711_v22, %s7335_s26  ;;  %1815 = vrot.lane.b32.xlu0 %v7711_v22, %s7334_s25 }
 0x37c   : > { %1983 = vrot.lane.b32.xlu1 %v7717_v24, %s7335_s26  ;;  %2067 = vrot.lane.b32.xlu0 %v7717_v24, %s7334_s25 }
 0x3e6   : > { %v1409_v30 = vpop.permute.xlu0 %1408  ;;  %v1564_v63 = vpop.permute.xlu1 %1563 }
 0x3e7   : > { %6027 = vmatmul.mubr.msk.f32.vlgmr.msra.gmra.mrb[6].mxu1 %vm1045_vm2, %v1409_v30  ;;  %v5241_v30 = vld [vmem:[%s8769_s3 + $0x150] sm:$0xff] }
 0x3e8   : > { %6818 = vmatpush3.bf16.msra.mxu1 %v6817_v27  ;;  %6045 = vmatprep.mubr.msk.f32.mxu1 %vm7331_vm0, %v7332_v6  ;;  %v5239_v27 = vld [vmem:[%s8769_s3 + $0x140] sm:$0xff] }
 0x3e9   : > { %6819 = vmatprep.subr.bf16.mxu1 %v7330_v3  ;;  %v6865_v29 = vpack.c.bf16 %v5240_v28, %v5239_v27  ;;  %v5273_v27 = vld [vmem:[%s8769_s3 + $0x238] sm:$0xff] }
 0x3ea   : > { %v1732_v32 = vpop.permute.xlu1 %1731  ;;  %v1816_v50 = vpop.permute.xlu0 %1815 }
 0x3ec   : > { %6821 = vmatpush3.bf16.msra.mxu1 %v6820_v31  ;;  %v5242_v31 = vld [vmem:[%s8769_s3 + $0x158] sm:$0xff] }
 0x3ed   : > { %6822 = vmatprep.subr.bf16.mxu1 %v7330_v3  ;;  %v6868_v34 = vpack.c.bf16 %v5242_v31, %v5241_v30 }
 0x3f0   : > { %6824 = vmatpush3.bf16.msra.mxu1 %v6823_v35  ;;  %v5243_v35 = vld [vmem:[%s8769_s3 + $0x160] sm:$0xff] }
 0x3f1   : > { %6825 = vmatprep.subr.bf16.mxu1 %v7330_v3  ;;  %v6871_v37 = vpack.c.bf16 %v5244_v36, %v5243_v35 }
 0x3f4   : > { %6827 = vmatpush3.bf16.msra.mxu1 %v6826_v38  ;;  %v5245_v38 = vld [vmem:[%s8769_s3 + $0x170] sm:$0xff] }
 0x3f5   : > { %6828 = vmatprep.subr.bf16.mxu1 %v7330_v3  ;;  %v6874_v40 = vpack.c.bf16 %v5246_v39, %v5245_v38 }
 0x3f7   : > { %6046 = vmatmul.mubr.msk.f32.vlgmr.msra.gmra.mrb[6].mxu1 %vm1045_vm2, %v1389_v21  ;;  %v6859_v21 = vpack.c.bf16 %v5235_v20, %v5234_v19  ;;  %v1984_v19 = vpop.permute.xlu1 %1983 }
 0x3f8   : > { %6830 = vmatpush3.bf16.msra.mxu1 %v6829_v42  ;;  %6064 = vmatprep.mubr.msk.f32.mxu1 %vm7331_vm0, %v7332_v6  ;;  %v5248_v42 = vld [vmem:[%s8769_s3 + $0x180] sm:$0xff] }
 0x3f9   : > { %6831 = vmatprep.subr.bf16.mxu1 %v7330_v3  ;;  %v6877_v44 = vpack.c.bf16 %v5249_v43, %v5248_v42 }
 0x3fc   : > { %6833 = vmatpush3.bf16.msra.mxu1 %v6832_v45  ;;  %v5250_v45 = vld [vmem:[%s8769_s3 + $0x190] sm:$0xff] }
 0x3fd   : > { %6834 = vmatprep.subr.bf16.mxu1 %v7330_v3 }
 0x400   : > { %6836 = vmatpush3.bf16.msra.mxu1 %v6835_v51  ;;  %v6880_v51 = vpack.c.bf16 %v5251_v49, %v5250_v45 }
 0x401   : > { %6837 = vmatprep.subr.bf16.mxu1 %v7330_v3 }
 0x404   : > { %6839 = vmatpush3.bf16.msra.mxu1 %v6838_v56  ;;  %v6883_v56 = vpack.c.bf16 %v5253_v54, %v5252_v52 }
 0x405   : > { %6840 = vmatprep.subr.bf16.mxu1 %v7330_v3 }
 0x407   : > { %6065 = vmatmul.mubr.msk.f32.vlgmr.msra.gmra.mrb[6].mxu1 %vm1045_vm2, %v1564_v63  ;;  %v6889_v63 = vpack.c.bf16 %v5258_v61, %v5257_v60 }
 0x408   : > { %6842 = vmatpush3.bf16.msra.mxu1 %v6841_v59  ;;  %6083 = vmatprep.mubr.msk.f32.mxu1 %vm7331_vm0, %v7332_v6  ;;  %v6886_v59 = vpack.c.bf16 %v5255_v58, %v5254_v57 }
 0x409   : > { %6843 = vmatprep.subr.bf16.mxu1 %v7330_v3 }
 0x40c   : > { %6845 = vmatpush3.bf16.msra.mxu1 %v6844_v0  ;;  %v5259_v0 = vld [vmem:[%s8769_s3 + $0x1d0] sm:$0xff] }
 0x40d   : > { %6846 = vmatprep.subr.bf16.mxu1 %v7330_v3  ;;  %v6892_v2 = vpack.c.bf16 %v5260_v1, %v5259_v0  ;;  %v2477_v0 = vadd.f32 %v7526_v48, %v7505_v41  ;;  %v2483_v1 = vld [vmem:[%s8768_s2] sm:$0xff] }
 0x410   : > { %6848 = vmatpush3.bf16.msra.mxu1 %v6847_v5  ;;  %v5261_v5 = vld [vmem:[%s8769_s3 + $0x1e0] sm:$0xff] }
 0x411   : > { %6849 = vmatprep.subr.bf16.mxu1 %v7330_v3  ;;  %v6895_v9 = vpack.c.bf16 %v5262_v7, %v5261_v5  ;;  %v2479_v5 = vadd.f32 %v7565_v62, %v2477_v0 }
 0x413   : > { %v2481_v48 = vadd.f32 %v7580_v4, %v2479_v5 }
 0x414   : > { %6851 = vmatpush3.bf16.msra.mxu1 %v6850_v10  ;;  %v5264_v10 = vld [vmem:[%s8769_s3 + $0x1f8] sm:$0xff] }
 0x415   : > { %6852 = vmatprep.subr.bf16.mxu1 %v7330_v3  ;;  %v2482_v62 = vmul.f32 0.25, %v2481_v48 }
 0x417   : > { %6084 = vmatmul.mubr.msk.f32.vlgmr.msra.gmra.mrb[6].mxu1 %vm1045_vm2, %v7711_v22  ;;  %v5236_v22 = vld [vmem:[%s8769_s3 + $0x130] sm:$0xff] }
 0x418   : > { %6854 = vmatpush3.bf16.msra.mxu1 %v6853_v15  ;;  %6102 = vmatprep.mubr.msk.f32.mxu1 %vm7331_vm0, %v7332_v6  ;;  %v6862_v26 = vpack.c.bf16 %v5237_v25, %v5236_v22  ;;  %v5267_v15 = vld [vmem:[%s8769_s3 + $0x208] sm:$0xff] }
 0x419   : > { %6855 = vmatprep.subr.bf16.mxu1 %v7330_v3  ;;  %v6901_v16 = vpack.c.bf16 %v5267_v15, %v5266_v13  ;;  %v5271_v22 = vld [vmem:[%s8769_s3 + $0x228] sm:$0xff] }
 0x41c   : > { %6857 = vmatpush3.bf16.msra.mxu1 %v6856_v18  ;;  %v5269_v18 = vld [vmem:[%s8769_s3 + $0x218] sm:$0xff] }
 0x41d   : > { %6858 = vmatprep.subr.bf16.mxu1 %v7330_v3  ;;  %v6904_v20 = vpack.c.bf16 %v5269_v18, %v5268_v17 }
 0x420   : > { %6860 = vmatpush3.bf16.msra.mxu1 %v6859_v21  ;;  %v5270_v21 = vld [vmem:[%s8769_s3 + $0x220] sm:$0xff] }
 0x421   : > { %6861 = vmatprep.subr.bf16.mxu1 %v7330_v3  ;;  %v6907_v25 = vpack.c.bf16 %v5271_v22, %v5270_v21 }
 0x424   : > { %6863 = vmatpush3.bf16.msra.mxu1 %v6862_v26  ;;  %v5272_v26 = vld [vmem:[%s8769_s3 + $0x230] sm:$0xff] }
 0x425   : > { %6864 = vmatprep.subr.bf16.mxu1 %v7330_v3  ;;  %v6910_v28 = vpack.c.bf16 %v5273_v27, %v5272_v26 }
 0x427   : > { %6103 = vmatmul.mubr.msk.f32.vlgmr.msra.gmra.mrb[6].mxu1 %vm1045_vm2, %v1732_v32 }
 0x428   : > { %6866 = vmatpush3.bf16.msra.mxu1 %v6865_v29  ;;  %6121 = vmatprep.mubr.msk.f32.mxu1 %vm7331_vm0, %v7332_v6  ;;  %v2068_v29 = vpop.permute.xlu0 %2067 }
 0x429   : > { %6867 = vmatprep.subr.bf16.mxu1 %v7330_v3 }
 0x42c   : > { %6869 = vmatpush3.bf16.msra.mxu1 %v6868_v34 }
 0x42d   : > { %6870 = vmatprep.subr.bf16.mxu1 %v7330_v3 }
 0x430   : > { %6872 = vmatpush3.bf16.msra.mxu1 %v6871_v37 }
 0x431   : > { %6873 = vmatprep.subr.bf16.mxu1 %v7330_v3 }
 0x434   : > { %6875 = vmatpush3.bf16.msra.mxu1 %v6874_v40 }
 0x435   : > { %6876 = vmatprep.subr.bf16.mxu1 %v7330_v3 }
 0x437   : > { %6122 = vmatmul.mubr.msk.f32.vlgmr.msra.gmra.mrb[6].mxu1 %vm1045_vm2, %v1816_v50 }
 0x438   : > { %6878 = vmatpush3.bf16.msra.mxu1 %v6877_v44  ;;  %6140 = vmatprep.mubr.msk.f32.mxu1 %vm7331_vm0, %v7332_v6 }
 0x439   : > { %6879 = vmatprep.subr.bf16.mxu1 %v7330_v3 }
 0x43c   : > { %6881 = vmatpush3.bf16.msra.mxu1 %v6880_v51 }
 0x43d   : > { %6882 = vmatprep.subr.bf16.mxu1 %v7330_v3 }
 0x440   : > { %6884 = vmatpush3.bf16.msra.mxu1 %v6883_v56 }
 0x441   : > { %6885 = vmatprep.subr.bf16.mxu1 %v7330_v3 }
 0x444   : > { %6887 = vmatpush3.bf16.msra.mxu1 %v6886_v59 }
 0x445   : > { %6888 = vmatprep.subr.bf16.mxu1 %v7330_v3 }
 0x447   : > { %6141 = vmatmul.mubr.msk.f32.vlgmr.msra.gmra.mrb[6].mxu1 %vm1045_vm2, %v7717_v24  ;;  %v5263_v24 = vld [vmem:[%s8769_s3 + $0x1f0] sm:$0xff] }
 0x448   : > { %6890 = vmatpush3.bf16.msra.mxu1 %v6889_v63  ;;  %6159 = vmatprep.mubr.msk.f32.mxu1 %vm7331_vm0, %v7332_v6  ;;  %v6898_v12 = vpack.c.bf16 %v5264_v10, %v5263_v24  ;;  %v2486_v24 = vld [vmem:[%s8768_s2 + $0x18] sm:$0xff] }
 0x449   : > { %6891 = vmatprep.subr.bf16.mxu1 %v7330_v3 }
 0x44c   : > { %6893 = vmatpush3.bf16.msra.mxu1 %v6892_v2  ;;  %v2484_v2 = vld [vmem:[%s8768_s2 + $0x8] sm:$0xff] }
 0x44d   : > { %6894 = vmatprep.subr.bf16.mxu1 %v7330_v3  ;;  %v6937_v7 = vpack.c.bf16 %v2484_v2, %v2483_v1 }
 0x450   : > { %6896 = vmatpush3.bf16.msra.mxu1 %v6895_v9  ;;  %v2485_v9 = vld [vmem:[%s8768_s2 + $0x10] sm:$0xff] }
 0x451   : > { %6897 = vmatprep.subr.bf16.mxu1 %v7330_v3  ;;  %v6940_v10 = vpack.c.bf16 %v2486_v24, %v2485_v9 }
 0x454   : > { %6899 = vmatpush3.bf16.msra.mxu1 %v6898_v12 }
 0x455   : > { %6900 = vmatprep.subr.bf16.mxu1 %v7330_v3 }
 0x457   : > { %6160 = vmatmul.mubr.msk.f32.vlgmr.msra.gmra.mrb[6].mxu1 %vm1045_vm2, %v1984_v19 }
 0x458   : > { %6902 = vmatpush3.bf16.msra.mxu1 %v6901_v16  ;;  %6178 = vmatprep.mubr.msk.f32.mxu1 %vm7331_vm0, %v7332_v6 }
 0x459   : > { %6903 = vmatprep.subr.bf16.mxu1 %v7330_v3 }
 0x45c   : > { %6905 = vmatpush3.bf16.msra.mxu1 %v6904_v20 }
 0x45d   : > { %6906 = vmatprep.subr.bf16.mxu1 %v7330_v3 }
 0x460   : > { %6908 = vmatpush3.bf16.msra.mxu1 %v6907_v25 }
 0x461   : > { %6909 = vmatprep.subr.bf16.mxu1 %v7330_v3 }
 0x464   : > { %6911 = vmatpush3.bf16.msra.mxu1 %v6910_v28 }
 0x465   : > { %6219 = vmatprep.subr.mxu1 %v7332_v6 }
 0x467   : > { %6179 = vmatmul.mubr.msk.f32.vlgmr.msra.gmra.mrb[6].mxu1 %vm1045_vm2, %v2068_v29 }
 0x468   : > { %6220 = vmatpush3.msra.mxu1 %v7644_v33  ;;  %6221 = vmatprep.mubr.msk.f32.mxu1 %vm7331_vm0, %v7332_v6 }
 0x469   : > { %7074 = vmatprep.subr.bf16.mxu1 %v7330_v3 }
 0x53a   : > { %v7978_v30 = vpop.f32.mrb[6].mxu1 }
 0x53b   : > { %v2142_v31 = vsel %vm1045_vm2, %v7978_v30, 0.0  ;;  %v2222_v32 = vmul.f32 %v7978_v30, %v7978_v30  ;;  %v6180_v34 = vpop.f32.mrb[7].mxu1 }
 0x53c   : > { %v2143_v35 = vrot.slane %v2142_v31, 4 }
 0x53d   : > { %v2223_v37 = vsel %vm1045_vm2, %v2222_v32, 0.0 }
 0x53e   : > { %v2144_v36 = vadd.f32 %v2143_v35, %v2142_v31  ;;  %v2224_v40 = vrot.slane %v2223_v37, 4 }
 0x540   : > { %v2145_v38 = vrot.slane %v2144_v36, 2  ;;  %v2225_v44 = vadd.f32 %v2224_v40, %v2223_v37 }
 0x542   : > { %v2146_v39 = vadd.f32 %v2145_v38, %v2144_v36  ;;  %v2226_v45 = vrot.slane %v2225_v44, 2 }
 0x544   : > { %v2147_v42 = vrot.slane %v2146_v39, 1  ;;  %v2227_v49 = vadd.f32 %v2226_v45, %v2225_v44 }
 0x546   : > { %v2148_v43 = vadd.f32 %v2147_v42, %v2146_v39  ;;  %v2228_v50 = vrot.slane %v2227_v49, 1 }
 0x548   : > { %6198 = vmatmul.mubr.msk.f32.vlgmr.msra.gmra.mrb[4].mxu0 %vm1045_vm2, %v2148_v43  ;;  %v2229_v51 = vadd.f32 %v2228_v50, %v2227_v49 }
 0x549   : > { %6926 = vmatpush3.bf16.msra.mxu0 %v7454_v23  ;;  %6216 = vmatprep.mubr.msk.f32.mxu0 %vm7331_vm0, %v7332_v6 }
 0x54a   : > { %6927 = vmatprep.subr.bf16.mxu0 %v7330_v3 }
 0x54d   : > { %6929 = vmatpush3.bf16.msra.mxu0 %v7595_v8 }
 0x54e   : > { %6930 = vmatprep.subr.bf16.mxu0 %v7330_v3 }
 0x551   : > { %6932 = vmatpush3.bf16.msra.mxu0 %v7607_v11 }
 0x552   : > { %6933 = vmatprep.subr.bf16.mxu0 %v7330_v3 }
 0x555   : > { %6935 = vmatpush3.bf16.msra.mxu0 %v7619_v14 }
 0x556   : > { %6224 = vmatprep.subr.mxu0 %v7332_v6 }
 0x558   : > { %6217 = vmatmul.mubr.msk.f32.vlgmr.msra.gmra.mrb[6].mxu0 %vm1045_vm2, %v2229_v51 }
 0x559   : > { %6225 = vmatpush3.msra.mxu0 %v7644_v33  ;;  %6226 = vmatprep.mubr.msk.f32.mxu0 %vm7331_vm0, %v7332_v6 }
 0x55a   : > { %6936 = vmatprep.subr.bf16.mxu0 %v7330_v3 }
 0x61b   : > { %v2218_v52 = vpop.f32.mrb[4].mxu0 }
 0x61c   : > { %v2303_v54 = vmul.f32 0.015625, %v2218_v52  ;;  %v6199_v56 = vpop.f32.mrb[5].mxu0 }
 0x61e   : > { %6222 = vmatmul.mubr.msk.f32.vlgmr.msra.gmra.mrb[8].mxu1 %vm1213_vm3, %v2303_v54  ;;  %v2305_v58 = vmul.f32 %v2303_v54, %v2303_v54 }
 0x61f   : > { %7076 = vmatpush3.bf16.msra.mxu1 %v7454_v23  ;;  %6475 = vmatprep.mubr.msk.f32.mxu1 %vm7331_vm0, %v7332_v6 }
 0x620   : > { %7077 = vmatprep.subr.bf16.mxu1 %v7330_v3 }
 0x623   : > { %7079 = vmatpush3.bf16.msra.mxu1 %v7595_v8 }
 0x624   : > { %7080 = vmatprep.subr.bf16.mxu1 %v7330_v3 }
 0x627   : > { %7082 = vmatpush3.bf16.msra.mxu1 %v7607_v11 }
 0x628   : > { %7083 = vmatprep.subr.bf16.mxu1 %v7330_v3 }
 0x62b   : > { %v2299_v57 = vpop.f32.mrb[6].mxu0  ;;  %7085 = vmatpush3.bf16.msra.mxu1 %v7619_v14 }
 0x62c   : > { %v2304_v59 = vmul.f32 0.015625, %v2299_v57  ;;  %v6218_v60 = vpop.f32.mrb[7].mxu0  ;;  %7086 = vmatprep.subr.bf16.mxu1 %v7330_v3 }
 0x62d   : > { %v2885_v60 = vsub.s32 2, %v7658_v46 }
 0x62e   : > { %v2306_v61 = vsub.f32 %v2304_v59, %v2305_v58  ;;  %v2467_v59 = vsub.s32 1, %v7658_v46 }
 0x62f   : > { %v2886_v1 = vrot.slane %v7667_v53, %v2885_v60  ;;  %v2891_v24 = vrot.slane %v7672_v55, %v2885_v60 }
 0x630   : > { %v2307_v63 = vadd.f32 1e-05, %v2306_v61  ;;  %v2468_v61 = vrot.slane %v7667_v53, %v2467_v59  ;;  %v5296_v53 = vld [vmem:[%s8769_s3 + $0x280] sm:$0xff] }
 0x632   : > { %7311 = vrsqrt.f32 %v2307_v63 }
 0x63c   : > { %v7312_v41 = vpop.eup %7311 }
 0x63d   : > { %6227 = vmatmul.mubr.msk.f32.vlgmr.msra.gmra.mrb[8].mxu0 %vm1213_vm3, %v7312_v41 }
 0x63e   : > { %6938 = vmatpush3.bf16.msra.mxu0 %v6937_v7  ;;  %6237 = vmatprep.mubr.msk.f32.mxu0 %vm7331_vm0, %v7332_v6  ;;  %v2473_v7 = vrot.slane %v7672_v55, %v2467_v59  ;;  %v5298_v55 = vld [vmem:[%s8769_s3 + $0x290] sm:$0xff]  ;;  %v5313_v59 = vld [vmem:[%s8769_s3 + $0x2f8] sm:$0xff] }
 0x63f   : > { %6939 = vmatprep.subr.bf16.mxu0 %v7330_v3 }
 0x642   : > { %6941 = vmatpush3.bf16.msra.mxu0 %v6940_v10 }
 0x643   : > { %6942 = vmatprep.subr.bf16.mxu0 %v7330_v3 }
 0x645   : > { %6238 = vmatmul.mubr.msk.f32.vlgmr.msra.gmra.mrb[10].mxu0 %vm331_vm1, %v2482_v62 }
 0x646   : > { %6944 = vmatpush3.bf16.msra.mxu0 %v7454_v23  ;;  %6256 = vmatprep.mubr.msk.f32.mxu0 %vm7331_vm0, %v7332_v6 }
 0x647   : > { %6945 = vmatprep.subr.bf16.mxu0 %v7330_v3 }
 0x64a   : > { %6947 = vmatpush3.bf16.msra.mxu0 %v7595_v8 }
 0x64b   : > { %6948 = vmatprep.subr.bf16.mxu0 %v7330_v3 }
 0x64e   : > { %6950 = vmatpush3.bf16.msra.mxu0 %v7607_v11 }
 0x64f   : > { %6951 = vmatprep.subr.bf16.mxu0 %v7330_v3 }
 0x652   : > { %6953 = vmatpush3.bf16.msra.mxu0 %v7619_v14 }
 0x653   : > { %6954 = vmatprep.subr.bf16.mxu0 %v7330_v3 }
 0x6f1   : > { %v2378_v4 = vpop.f32.mrb[8].mxu1 }
 0x6f2   : > { %v2458_v12 = vrot.slane %v2378_v4, %v7661_v47  ;;  %v6223_v13 = vpop.f32.mrb[9].mxu1 }
 0x6f3   : > { %v5297_v13 = vld [vmem:[%s8769_s3 + $0x288] sm:$0xff] }
 0x6f4   : > { %v2459_v15 = vsub.f32 %v7978_v30, %v2458_v12 }
 0x710   : > { %v2451_v16 = vpop.f32.mrb[8].mxu0 }
 0x711   : > { %v2463_v17 = vrot.slane %v2451_v16, %v7661_v47  ;;  %v6228_v18 = vpop.f32.mrb[9].mxu0  ;;  %v5299_v16 = vld [vmem:[%s8769_s3 + $0x298] sm:$0xff] }
 0x712   : > { %v5300_v18 = vld [vmem:[%s8769_s3 + $0x2a0] sm:$0xff] }
 0x713   : > { %v2464_v19 = vmul.f32 %v2463_v17, %v2459_v15  ;;  %v6967_v15 = vpack.c.bf16 %v5297_v13, %v5296_v53  ;;  %v6970_v17 = vpack.c.bf16 %v5299_v16, %v5298_v55  ;;  %v5325_v53 = vld [vmem:[%s8769_s3 + $0x348] sm:$0xff]  ;;  %v5326_v55 = vld [vmem:[%s8769_s3 + $0x350] sm:$0xff] }
 0x715   : > { %v2469_v5 = vmul.f32 %v2468_v61, %v2464_v19  ;;  %v5301_v19 = vld [vmem:[%s8769_s3 + $0x2a8] sm:$0xff]  ;;  %v5315_v61 = vld [vmem:[%s8769_s3 + $0x300] sm:$0xff] }
 0x717   : > { %v2474_v48 = vadd.f32 %v2473_v7, %v2469_v5 }
 0x718   : > { %v2556_v20 = vpop.f32.mrb[10].mxu0 }
 0x719   : > { %v2560_v21 = vsel %vm1045_vm2, %v2556_v20, 0.0  ;;  %v2640_v22 = vmul.f32 %v2556_v20, %v2556_v20  ;;  %v6239_v25 = vpop.f32.mrb[11].mxu0 }
 0x71a   : > { %v2561_v26 = vrot.slane %v2560_v21, 4 }
 0x71b   : > { %v2641_v28 = vsel %vm1045_vm2, %v2640_v22, 0.0  ;;  %v5303_v22 = vld [vmem:[%s8769_s3 + $0x2b8] sm:$0xff] }
 0x71c   : > { %v2562_v27 = vadd.f32 %v2561_v26, %v2560_v21  ;;  %v2642_v32 = vrot.slane %v2641_v28, 4  ;;  %v5302_v21 = vld [vmem:[%s8769_s3 + $0x2b0] sm:$0xff] }
 0x71d   : > { %v6976_v25 = vpack.c.bf16 %v5303_v22, %v5302_v21  ;;  %v5331_v21 = vld [vmem:[%s8769_s3 + $0x378] sm:$0xff] }
 0x71e   : > { %v2563_v29 = vrot.slane %v2562_v27, 2  ;;  %v2643_v30 = vadd.f32 %v2642_v32, %v2641_v28  ;;  %v5289_v32 = vld [vmem:[%s8769_s3 + $0x248] sm:$0xff] }
 0x720   : > { %v2564_v31 = vadd.f32 %v2563_v29, %v2562_v27  ;;  %v2644_v36 = vrot.slane %v2643_v30, 2 }
 0x722   : > { %v2565_v34 = vrot.slane %v2564_v31, 1  ;;  %v2645_v37 = vadd.f32 %v2644_v36, %v2643_v30  ;;  %v5291_v30 = vld [vmem:[%s8769_s3 + $0x258] sm:$0xff] }
 0x724   : > { %v2566_v35 = vadd.f32 %v2565_v34, %v2564_v31  ;;  %v2646_v38 = vrot.slane %v2645_v37, 1  ;;  %v5288_v31 = vld [vmem:[%s8769_s3 + $0x240] sm:$0xff] }
 0x725   : > { %v6979_v34 = vpack.c.bf16 %v5289_v32, %v5288_v31  ;;  %v5336_v31 = vld [vmem:[%s8769_s3 + $0x398] sm:$0xff] }
 0x726   : > { %6257 = vmatmul.mubr.msk.f32.vlgmr.msra.gmra.mrb[12].mxu0 %vm1045_vm2, %v2566_v35  ;;  %v2647_v39 = vadd.f32 %v2646_v38, %v2645_v37  ;;  %v5290_v35 = vld [vmem:[%s8769_s3 + $0x250] sm:$0xff]  ;;  %v5292_v38 = vld [vmem:[%s8769_s3 + $0x260] sm:$0xff] }
 0x727   : > { %6956 = vmatpush3.bf16.msra.mxu0 %v7454_v23  ;;  %6275 = vmatprep.mubr.msk.f32.mxu0 %vm7331_vm0, %v7332_v6  ;;  %v6982_v37 = vpack.c.bf16 %v5291_v30, %v5290_v35  ;;  %v5337_v35 = vld [vmem:[%s8769_s3 + $0x3a0] sm:$0xff]  ;;  %v5338_v30 = vld [vmem:[%s8769_s3 + $0x3a8] sm:$0xff] }
 0x728   : > { %6957 = vmatprep.subr.bf16.mxu0 %v7330_v3 }
 0x72b   : > { %6959 = vmatpush3.bf16.msra.mxu0 %v7595_v8 }
 0x72c   : > { %6960 = vmatprep.subr.bf16.mxu0 %v7330_v3 }
 0x72f   : > { %6962 = vmatpush3.bf16.msra.mxu0 %v7607_v11 }
 0x730   : > { %6963 = vmatprep.subr.bf16.mxu0 %v7330_v3 }
 0x733   : > { %6965 = vmatpush3.bf16.msra.mxu0 %v7619_v14 }
 0x734   : > { %6278 = vmatprep.subr.mxu0 %v7332_v6 }
 0x736   : > { %6276 = vmatmul.mubr.msk.f32.vlgmr.msra.gmra.mrb[14].mxu0 %vm1045_vm2, %v2647_v39  ;;  %v5293_v39 = vld [vmem:[%s8769_s3 + $0x268] sm:$0xff] }
 0x737   : > { %6279 = vmatpush3.msra.mxu0 %v7644_v33  ;;  %6280 = vmatprep.mubr.msk.f32.mxu0 %vm7331_vm0, %v7332_v6 }
 0x738   : > { %6283 = vmatprep.subr.mxu0 %v7332_v6 }
 0x7f9   : > { %v2636_v40 = vpop.f32.mrb[12].mxu0 }
 0x7fa   : > { %v2721_v42 = vmul.f32 0.015625, %v2636_v40  ;;  %v6258_v43 = vpop.f32.mrb[13].mxu0  ;;  %v6985_v40 = vpack.c.bf16 %v5293_v39, %v5292_v38  ;;  %v5340_v38 = vld [vmem:[%s8769_s3 + $0x3b8] sm:$0xff] }
 0x7fb   : > { %v5295_v43 = vld [vmem:[%s8769_s3 + $0x278] sm:$0xff] }
 0x7fc   : > { %6281 = vmatmul.mubr.msk.f32.vlgmr.msra.gmra.mrb[16].mxu0 %vm1213_vm3, %v2721_v42  ;;  %v2723_v45 = vmul.f32 %v2721_v42, %v2721_v42  ;;  %v5294_v42 = vld [vmem:[%s8769_s3 + $0x270] sm:$0xff] }
 0x7fd   : > { %6284 = vmatpush3.msra.mxu0 %v7644_v33  ;;  %6285 = vmatprep.mubr.msk.f32.mxu0 %vm7331_vm0, %v7332_v6 }
 0x7fe   : > { %6966 = vmatprep.subr.bf16.mxu0 %v7330_v3 }
 0x809   : > { %v2717_v44 = vpop.f32.mrb[14].mxu0 }
 0x80a   : > { %v2722_v49 = vmul.f32 0.015625, %v2717_v44  ;;  %v6277_v50 = vpop.f32.mrb[15].mxu0  ;;  %v6988_v44 = vpack.c.bf16 %v5295_v43, %v5294_v42  ;;  %v5343_v42 = vld [vmem:[%s8769_s3 + $0x3c8] sm:$0xff] }
 0x80c   : > { %v2724_v51 = vsub.f32 %v2722_v49, %v2723_v45  ;;  %v5306_v45 = vld [vmem:[%s8769_s3 + $0x2c0] sm:$0xff]  ;;  %v5307_v49 = vld [vmem:[%s8769_s3 + $0x2c8] sm:$0xff] }
 0x80d   : > { %v6991_v50 = vpack.c.bf16 %v5307_v49, %v5306_v45  ;;  %v5345_v45 = vld [vmem:[%s8769_s3 + $0x3d8] sm:$0xff] }
 0x80e   : > { %v2725_v52 = vadd.f32 1e-05, %v2724_v51  ;;  %v5308_v51 = vld [vmem:[%s8769_s3 + $0x2d0] sm:$0xff] }
 0x810   : > { %7313 = vrsqrt.f32 %v2725_v52  ;;  %v5309_v52 = vld [vmem:[%s8769_s3 + $0x2d8] sm:$0xff] }
 0x81a   : > { %v7314_v54 = vpop.eup %7313 }
 0x81b   : > { %6286 = vmatmul.mubr.msk.f32.vlgmr.msra.gmra.mrb[18].mxu0 %vm1213_vm3, %v7314_v54  ;;  %v6994_v54 = vpack.c.bf16 %v5309_v52, %v5308_v51  ;;  %v5346_v51 = vld [vmem:[%s8769_s3 + $0x3e0] sm:$0xff]  ;;  %v5347_v52 = vld [vmem:[%s8769_s3 + $0x3e8] sm:$0xff] }
 0x81c   : > { %6304 = vmatprep.mubr.msk.f32.mxu0 %vm7331_vm0, %v7332_v6  ;;  %6968 = vmatpush3.bf16.msra.mxu0 %v6967_v15  ;;  %v5327_v15 = vld [vmem:[%s8769_s3 + $0x358] sm:$0xff] }
 0x81d   : > { %6969 = vmatprep.subr.bf16.mxu0 %v7330_v3  ;;  %v7018_v16 = vpack.c.bf16 %v5327_v15, %v5326_v55  ;;  %v5365_v55 = vld [vmem:[%s8769_s3 + $0x468] sm:$0xff] }
 0x820   : > { %6971 = vmatpush3.bf16.msra.mxu0 %v6970_v17  ;;  %v5328_v17 = vld [vmem:[%s8769_s3 + $0x360] sm:$0xff] }
 0x821   : > { %6972 = vmatprep.subr.bf16.mxu0 %v7330_v3 }
 0x8cf   : > { %v2796_v56 = vpop.f32.mrb[16].mxu0 }
 0x8d0   : > { %v2876_v33 = vrot.slane %v2796_v56, %v7661_v47  ;;  %v6282_v57 = vpop.f32.mrb[17].mxu0  ;;  %v5310_v56 = vld [vmem:[%s8769_s3 + $0x2e0] sm:$0xff] }
 0x8d2   : > { %v2877_v58 = vsub.f32 %v2556_v20, %v2876_v33  ;;  %v6973_v20 = vpack.c.bf16 %v5301_v19, %v5300_v18  ;;  %v5311_v33 = vld [vmem:[%s8769_s3 + $0x2e8] sm:$0xff] }
 0x8d3   : > { %v6997_v57 = vpack.c.bf16 %v5311_v33, %v5310_v56  ;;  %v5329_v18 = vld [vmem:[%s8769_s3 + $0x368] sm:$0xff]  ;;  %v5348_v56 = vld [vmem:[%s8769_s3 + $0x3f0] sm:$0xff]  ;;  %v5349_v33 = vld [vmem:[%s8769_s3 + $0x3f8] sm:$0xff] }
 0x8d4   : > { %6974 = vmatpush3.bf16.msra.mxu0 %v6973_v20  ;;  %v7021_v19 = vpack.c.bf16 %v5329_v18, %v5328_v17  ;;  %v5330_v20 = vld [vmem:[%s8769_s3 + $0x370] sm:$0xff]  ;;  %v5367_v17 = vld [vmem:[%s8769_s3 + $0x478] sm:$0xff] }
 0x8d5   : > { %6975 = vmatprep.subr.bf16.mxu0 %v7330_v3  ;;  %v7024_v22 = vpack.c.bf16 %v5331_v21, %v5330_v20 }
 0x8d8   : > { %6977 = vmatpush3.bf16.msra.mxu0 %v6976_v25  ;;  %v5333_v25 = vld [vmem:[%s8769_s3 + $0x380] sm:$0xff] }
 0x8d9   : > { %6978 = vmatprep.subr.bf16.mxu0 %v7330_v3 }
 0x8ee   : > { %v2869_v63 = vpop.f32.mrb[18].mxu0 }
 0x8ef   : > { %v2881_v0 = vrot.slane %v2869_v63, %v7661_v47  ;;  %v6287_v2 = vpop.f32.mrb[19].mxu0  ;;  %v5316_v63 = vld [vmem:[%s8769_s3 + $0x308] sm:$0xff] }
 0x8f0   : > { %v5318_v2 = vld [vmem:[%s8769_s3 + $0x318] sm:$0xff] }
 0x8f1   : > { %v2882_v9 = vmul.f32 %v2881_v0, %v2877_v58  ;;  %v5312_v58 = vld [vmem:[%s8769_s3 + $0x2f0] sm:$0xff]  ;;  %v7003_v0 = vpack.c.bf16 %v5316_v63, %v5315_v61  ;;  %v5354_v63 = vld [vmem:[%s8769_s3 + $0x418] sm:$0xff] }
 0x8f2   : > { %v7000_v60 = vpack.c.bf16 %v5313_v59, %v5312_v58  ;;  %v5351_v58 = vld [vmem:[%s8769_s3 + $0x400] sm:$0xff]  ;;  %v5352_v59 = vld [vmem:[%s8769_s3 + $0x408] sm:$0xff]  ;;  %v5353_v61 = vld [vmem:[%s8769_s3 + $0x410] sm:$0xff] }
 0x8f3   : > { %v2887_v41 = vmul.f32 %v2886_v1, %v2882_v9  ;;  %v5317_v1 = vld [vmem:[%s8769_s3 + $0x310] sm:$0xff]  ;;  %v5319_v9 = vld [vmem:[%s8769_s3 + $0x320] sm:$0xff] }
 0x8f4   : > { %v7006_v7 = vpack.c.bf16 %v5318_v2, %v5317_v1  ;;  %v5355_v1 = vld [vmem:[%s8769_s3 + $0x420] sm:$0xff]  ;;  %v5356_v2 = vld [vmem:[%s8769_s3 + $0x428] sm:$0xff] }
 0x8f5   : > { %v2892_v10 = vadd.f32 %v2891_v24, %v2887_v41  ;;  %v5320_v24 = vld [vmem:[%s8769_s3 + $0x328] sm:$0xff] }
 0x8f6   : > { %v7009_v41 = vpack.c.bf16 %v5320_v24, %v5319_v9  ;;  %v5360_v24 = vld [vmem:[%s8769_s3 + $0x440] sm:$0xff] }
 0x8f7   : > { %v2893_v62 = vadd.f32 %v2892_v10, %v2474_v48  ;;  %v5321_v48 = vld [vmem:[%s8769_s3 + $0x330] sm:$0xff]  ;;  %v5322_v10 = vld [vmem:[%s8769_s3 + $0x338] sm:$0xff] }
 0x8f9   : > { %vm2894_vm8 = vcmp.ge.f32.partialorder %v2893_v62, 0.0  ;;  %v2895_v4 = vmul.f32 0.01, %v2893_v62 }
 0x8fb   : > { %v8081_v12 = vsel %vm2894_vm8, %v2893_v62, %v2895_v4  ;;  %v7012_v62 = vpack.c.bf16 %v5322_v10, %v5321_v48  ;;  %v5324_v4 = vld [vmem:[%s8769_s3 + $0x340] sm:$0xff]  ;;  %v5362_v10 = vld [vmem:[%s8769_s3 + $0x450] sm:$0xff] }
 0x8fc   : > { %2898 = vrot.lane.b32.xlu1 %v8081_v12, %s7333_s30  ;;  %v7015_v13 = vpack.c.bf16 %v5325_v53, %v5324_v4 }
 0x96e   : > { %v2899_v26 = vpop.permute.xlu1 %2898 }
 0x96f   : > { %2901 = vst.msk [vmem:[#allocation2 + $0x1] sm:$0xff] %vm1387_vm7, %v2899_v26  ;;  %v5334_v26 = vld [vmem:[%s8769_s3 + $0x388] sm:$0xff] }
 0x976   : > { %v2902_v27 = vld [vmem:[#allocation2] sm:$0xff] }
 0x977   : > { %3077 = vrot.lane.b32.xlu1 %v2902_v27, %s7334_s25  ;;  %2922 = vrot.lane.b32.xlu0 %v2902_v27, %s7335_s26  ;;  %v8116_v28 = vld [vmem:[#allocation2 + $0x1] sm:$0xff] }
 0x978   : > { %v8122_v29 = vld [vmem:[#allocation2 + $0x2] sm:$0xff] }
 0x97b   : > { %3329 = vrot.lane.b32.xlu1 %v8116_v28, %s7334_s25  ;;  %3245 = vrot.lane.b32.xlu0 %v8116_v28, %s7335_s26 }
 0x97f   : > { %3581 = vrot.lane.b32.xlu1 %v8122_v29, %s7334_s25  ;;  %3497 = vrot.lane.b32.xlu0 %v8122_v29, %s7335_s26 }
 0x9e9   : > { %v2923_v36 = vpop.permute.xlu0 %2922  ;;  %v3078_v5 = vpop.permute.xlu1 %3077 }
 0x9ea   : > { %6305 = vmatmul.mubr.msk.f32.vlgmr.msra.gmra.mrb[20].mxu0 %vm1045_vm2, %v2923_v36  ;;  %v7033_v36 = vpack.c.bf16 %v5338_v30, %v5337_v35 }
 0x9eb   : > { %6980 = vmatpush3.bf16.msra.mxu0 %v6979_v34  ;;  %6323 = vmatprep.mubr.msk.f32.mxu0 %vm7331_vm0, %v7332_v6 }
 0x9ec   : > { %6981 = vmatprep.subr.bf16.mxu0 %v7330_v3 }
 0x9ed   : > { %v3246_v32 = vpop.permute.xlu0 %3245  ;;  %v3330_v49 = vpop.permute.xlu1 %3329 }
 0x9ef   : > { %6983 = vmatpush3.bf16.msra.mxu0 %v6982_v37  ;;  %v5339_v37 = vld [vmem:[%s8769_s3 + $0x3b0] sm:$0xff] }
 0x9f0   : > { %6984 = vmatprep.subr.bf16.mxu0 %v7330_v3  ;;  %v7036_v39 = vpack.c.bf16 %v5340_v38, %v5339_v37 }
 0x9f1   : > { %v3498_v4 = vpop.permute.xlu0 %3497 }
 0x9f3   : > { %6986 = vmatpush3.bf16.msra.mxu0 %v6985_v40  ;;  %v5342_v40 = vld [vmem:[%s8769_s3 + $0x3c0] sm:$0xff] }
 0x9f4   : > { %6987 = vmatprep.subr.bf16.mxu0 %v7330_v3  ;;  %v7039_v43 = vpack.c.bf16 %v5343_v42, %v5342_v40  ;;  %v8406_v42 = vld [vmem:[%s8773_s7] sm:$0xff] }
 0x9f7   : > { %6989 = vmatpush3.bf16.msra.mxu0 %v6988_v44  ;;  %v5344_v44 = vld [vmem:[%s8769_s3 + $0x3d0] sm:$0xff] }
 0x9f8   : > { %6990 = vmatprep.subr.bf16.mxu0 %v7330_v3 }
 0x9fa   : > { %6324 = vmatmul.mubr.msk.f32.vlgmr.msra.gmra.mrb[20].mxu0 %vm1045_vm2, %v2902_v27  ;;  %v7027_v27 = vpack.c.bf16 %v5334_v26, %v5333_v25 }
 0x9fb   : > { %6992 = vmatpush3.bf16.msra.mxu0 %v6991_v50  ;;  %6342 = vmatprep.mubr.msk.f32.mxu0 %vm7331_vm0, %v7332_v6  ;;  %v7042_v50 = vpack.c.bf16 %v5345_v45, %v5344_v44 }
 0x9fc   : > { %6993 = vmatprep.subr.bf16.mxu0 %v7330_v3 }
 0x9ff   : > { %6995 = vmatpush3.bf16.msra.mxu0 %v6994_v54  ;;  %v7045_v54 = vpack.c.bf16 %v5347_v52, %v5346_v51 }
 0xa00   : > { %6996 = vmatprep.subr.bf16.mxu0 %v7330_v3 }
 0xa03   : > { %6998 = vmatpush3.bf16.msra.mxu0 %v6997_v57  ;;  %v7048_v57 = vpack.c.bf16 %v5349_v33, %v5348_v56 }
 0xa04   : > { %6999 = vmatprep.subr.bf16.mxu0 %v7330_v3 }
 0xa07   : > { %7001 = vmatpush3.bf16.msra.mxu0 %v7000_v60  ;;  %v7051_v60 = vpack.c.bf16 %v5352_v59, %v5351_v58 }
 0xa08   : > { %7002 = vmatprep.subr.bf16.mxu0 %v7330_v3 }
 0xa0a   : > { %6343 = vmatmul.mubr.msk.f32.vlgmr.msra.gmra.mrb[20].mxu0 %vm1045_vm2, %v3078_v5  ;;  %v7057_v5 = vpack.c.bf16 %v5356_v2, %v5355_v1  ;;  %v8426_v1 = vld [vmem:[%s8770_s4] sm:$0x1f] }
 0xa0b   : > { %7004 = vmatpush3.bf16.msra.mxu0 %v7003_v0  ;;  %6361 = vmatprep.mubr.msk.f32.mxu0 %vm7331_vm0, %v7332_v6  ;;  %v7054_v0 = vpack.c.bf16 %v5354_v63, %v5353_v61  ;;  %v3981_v61 = vsub.s32 3, %v7658_v46 }
 0xa0c   : > { %7005 = vmatprep.subr.bf16.mxu0 %v7330_v3 }
 0xa0d   : > { %v3982_v2 = vrot.slane %v8426_v1, %v3981_v61 }
 0xa0f   : > { %7007 = vmatpush3.bf16.msra.mxu0 %v7006_v7  ;;  %v5358_v7 = vld [vmem:[%s8769_s3 + $0x438] sm:$0xff] }
 0xa10   : > { %7008 = vmatprep.subr.bf16.mxu0 %v7330_v3 }
 0xa13   : > { %7010 = vmatpush3.bf16.msra.mxu0 %v7009_v41  ;;  %v5361_v41 = vld [vmem:[%s8769_s3 + $0x448] sm:$0xff] }
 0xa14   : > { %7011 = vmatprep.subr.bf16.mxu0 %v7330_v3  ;;  %v7063_v48 = vpack.c.bf16 %v5361_v41, %v5360_v24 }
 0xa17   : > { %7013 = vmatpush3.bf16.msra.mxu0 %v7012_v62  ;;  %v5363_v62 = vld [vmem:[%s8769_s3 + $0x458] sm:$0xff] }
 0xa18   : > { %7014 = vmatprep.subr.bf16.mxu0 %v7330_v3  ;;  %v7066_v53 = vpack.c.bf16 %v5363_v62, %v5362_v10  ;;  %v5381_v62 = vld [vmem:[%s8769_s3 + $0x4c0] sm:$0xff] }
 0xa1a   : > { %6362 = vmatmul.mubr.msk.f32.vlgmr.msra.gmra.mrb[20].mxu0 %vm1045_vm2, %v8116_v28  ;;  %v5335_v28 = vld [vmem:[%s8769_s3 + $0x390] sm:$0xff] }
 0xa1b   : > { %7016 = vmatpush3.bf16.msra.mxu0 %v7015_v13  ;;  %6380 = vmatprep.mubr.msk.f32.mxu0 %vm7331_vm0, %v7332_v6  ;;  %v7030_v34 = vpack.c.bf16 %v5336_v31, %v5335_v28  ;;  %v5364_v13 = vld [vmem:[%s8769_s3 + $0x460] sm:$0xff] }
 0xa1c   : > { %7017 = vmatprep.subr.bf16.mxu0 %v7330_v3  ;;  %v7069_v15 = vpack.c.bf16 %v5365_v55, %v5364_v13  ;;  %v5384_v55 = vld [vmem:[%s8769_s3 + $0x4d8] sm:$0xff] }
 0xa1f   : > { %7019 = vmatpush3.bf16.msra.mxu0 %v7018_v16  ;;  %v5366_v16 = vld [vmem:[%s8769_s3 + $0x470] sm:$0xff] }
 0xa20   : > { %7020 = vmatprep.subr.bf16.mxu0 %v7330_v3  ;;  %v7072_v18 = vpack.c.bf16 %v5367_v17, %v5366_v16  ;;  %v5385_v16 = vld [vmem:[%s8769_s3 + $0x4e0] sm:$0xff]  ;;  %v5386_v17 = vld [vmem:[%s8769_s3 + $0x4e8] sm:$0xff] }
 0xa23   : > { %7022 = vmatpush3.bf16.msra.mxu0 %v7021_v19  ;;  %v3582_v19 = vpop.permute.xlu1 %3581 }
 0xa24   : > { %7023 = vmatprep.subr.bf16.mxu0 %v7330_v3 }
 0xa27   : > { %7025 = vmatpush3.bf16.msra.mxu0 %v7024_v22 }
 0xa28   : > { %7026 = vmatprep.subr.bf16.mxu0 %v7330_v3 }
 0xa2a   : > { %6381 = vmatmul.mubr.msk.f32.vlgmr.msra.gmra.mrb[20].mxu0 %vm1045_vm2, %v3246_v32 }
 0xa2b   : > { %7028 = vmatpush3.bf16.msra.mxu0 %v7027_v27  ;;  %6399 = vmatprep.mubr.msk.f32.mxu0 %vm7331_vm0, %v7332_v6 }
 0xa2c   : > { %7029 = vmatprep.subr.bf16.mxu0 %v7330_v3 }
 0xa2f   : > { %7031 = vmatpush3.bf16.msra.mxu0 %v7030_v34 }
 0xa30   : > { %7032 = vmatprep.subr.bf16.mxu0 %v7330_v3 }
 0xa33   : > { %7034 = vmatpush3.bf16.msra.mxu0 %v7033_v36 }
 0xa34   : > { %7035 = vmatprep.subr.bf16.mxu0 %v7330_v3 }
 0xa37   : > { %7037 = vmatpush3.bf16.msra.mxu0 %v7036_v39 }
 0xa38   : > { %7038 = vmatprep.subr.bf16.mxu0 %v7330_v3 }
 0xa3a   : > { %6400 = vmatmul.mubr.msk.f32.vlgmr.msra.gmra.mrb[20].mxu0 %vm1045_vm2, %v3330_v49 }
 0xa3b   : > { %7040 = vmatpush3.bf16.msra.mxu0 %v7039_v43  ;;  %6418 = vmatprep.mubr.msk.f32.mxu0 %vm7331_vm0, %v7332_v6 }
 0xa3c   : > { %7041 = vmatprep.subr.bf16.mxu0 %v7330_v3 }
 0xa3f   : > { %7043 = vmatpush3.bf16.msra.mxu0 %v7042_v50 }
 0xa40   : > { %7044 = vmatprep.subr.bf16.mxu0 %v7330_v3 }
 0xa43   : > { %7046 = vmatpush3.bf16.msra.mxu0 %v7045_v54 }
 0xa44   : > { %7047 = vmatprep.subr.bf16.mxu0 %v7330_v3 }
 0xa47   : > { %7049 = vmatpush3.bf16.msra.mxu0 %v7048_v57 }
 0xa48   : > { %7050 = vmatprep.subr.bf16.mxu0 %v7330_v3 }
 0xa4a   : > { %6419 = vmatmul.mubr.msk.f32.vlgmr.msra.gmra.mrb[20].mxu0 %vm1045_vm2, %v8122_v29  ;;  %v5357_v29 = vld [vmem:[%s8769_s3 + $0x430] sm:$0xff] }
 0xa4b   : > { %7052 = vmatpush3.bf16.msra.mxu0 %v7051_v60  ;;  %6437 = vmatprep.mubr.msk.f32.mxu0 %vm7331_vm0, %v7332_v6  ;;  %v7060_v9 = vpack.c.bf16 %v5358_v7, %v5357_v29  ;;  %v8432_v7 = vld [vmem:[%s8771_s5] sm:$0x1f] }
 0xa4c   : > { %7053 = vmatprep.subr.bf16.mxu0 %v7330_v3 }
 0xa4f   : > { %7055 = vmatpush3.bf16.msra.mxu0 %v7054_v0 }
 0xa50   : > { %7056 = vmatprep.subr.bf16.mxu0 %v7330_v3 }
 0xa53   : > { %7058 = vmatpush3.bf16.msra.mxu0 %v7057_v5 }
 0xa54   : > { %7059 = vmatprep.subr.bf16.mxu0 %v7330_v3 }
 0xa57   : > { %7061 = vmatpush3.bf16.msra.mxu0 %v7060_v9  ;;  %v3987_v9 = vrot.slane %v8432_v7, %v3981_v61  ;;  %v5400_v61 = vld [vmem:[%s8769_s3 + $0x540] sm:$0xff] }
 0xa58   : > { %7062 = vmatprep.subr.bf16.mxu0 %v7330_v3 }
 0xa5a   : > { %6438 = vmatmul.mubr.msk.f32.vlgmr.msra.gmra.mrb[20].mxu0 %vm1045_vm2, %v3498_v4  ;;  %v5382_v4 = vld [vmem:[%s8769_s3 + $0x4c8] sm:$0xff] }
 0xa5b   : > { %7064 = vmatpush3.bf16.msra.mxu0 %v7063_v48  ;;  %6456 = vmatprep.mubr.msk.f32.mxu0 %vm7331_vm0, %v7332_v6  ;;  %v7099_v13 = vpack.c.bf16 %v5382_v4, %v5381_v62  ;;  %v5407_v62 = vld [vmem:[%s8769_s3 + $0x578] sm:$0xff] }
 0xa5c   : > { %7065 = vmatprep.subr.bf16.mxu0 %v7330_v3 }
 0xa5f   : > { %7067 = vmatpush3.bf16.msra.mxu0 %v7066_v53  ;;  %v5383_v53 = vld [vmem:[%s8769_s3 + $0x4d0] sm:$0xff] }
 0xa60   : > { %7068 = vmatprep.subr.bf16.mxu0 %v7330_v3 }
 0xa63   : > { %7070 = vmatpush3.bf16.msra.mxu0 %v7069_v15  ;;  %v7102_v15 = vpack.c.bf16 %v5384_v55, %v5383_v53  ;;  %v5409_v53 = vld [vmem:[%s8769_s3 + $0x580] sm:$0xff] }
 0xa64   : > { %7071 = vmatprep.subr.bf16.mxu0 %v7330_v3 }
 0xa67   : > { %7073 = vmatpush3.bf16.msra.mxu0 %v7072_v18  ;;  %v7105_v18 = vpack.c.bf16 %v5386_v17, %v5385_v16  ;;  %v5412_v16 = vld [vmem:[%s8769_s3 + $0x598] sm:$0xff] }
 0xa68   : > { %7206 = vmatprep.subr.bf16.mxu0 %v7330_v3 }
 0xa6a   : > { %6457 = vmatmul.mubr.msk.f32.vlgmr.msra.gmra.mrb[20].mxu0 %vm1045_vm2, %v3582_v19  ;;  %v5387_v19 = vld [vmem:[%s8769_s3 + $0x4f0] sm:$0xff] }
 0xa6b   : > { %7208 = vmatpush3.bf16.msra.mxu0 %v7454_v23  ;;  %6694 = vmatprep.mubr.msk.f32.mxu0 %vm7331_vm0, %v7332_v6 }
 0xa6c   : > { %7209 = vmatprep.subr.bf16.mxu0 %v7330_v3 }
 0xa6f   : > { %7211 = vmatpush3.bf16.msra.mxu0 %v7595_v8 }
 0xa70   : > { %7212 = vmatprep.subr.bf16.mxu0 %v7330_v3 }
 0xa73   : > { %7214 = vmatpush3.bf16.msra.mxu0 %v7607_v11 }
 0xa74   : > { %7215 = vmatprep.subr.bf16.mxu0 %v7330_v3 }
 0xa77   : > { %7217 = vmatpush3.bf16.msra.mxu0 %v7619_v14 }
 0xa78   : > { %7218 = vmatprep.subr.bf16.mxu0 %v7330_v3 }
 0xb3d   : > { %v3651_v20 = vpop.f32.mrb[20].mxu0 }
 0xb3e   : > { %v3656_v21 = vsel %vm1045_vm2, %v3651_v20, 0.0  ;;  %v3736_v22 = vmul.f32 %v3651_v20, %v3651_v20  ;;  %v6458_v25 = vpop.f32.mrb[21].mxu0 }
 0xb3f   : > { %v3657_v26 = vrot.slane %v3656_v21, 4 }
 0xb40   : > { %v3737_v28 = vsel %vm1045_vm2, %v3736_v22, 0.0 }
 0xb41   : > { %v3658_v27 = vadd.f32 %v3657_v26, %v3656_v21  ;;  %v3738_v34 = vrot.slane %v3737_v28, 4 }
 0xb43   : > { %v3659_v31 = vrot.slane %v3658_v27, 2  ;;  %v3739_v36 = vadd.f32 %v3738_v34, %v3737_v28  ;;  %v5373_v28 = vld [vmem:[%s8769_s3 + $0x480] sm:$0xff]  ;;  %v5375_v34 = vld [vmem:[%s8769_s3 + $0x490] sm:$0xff] }
 0xb45   : > { %v3660_v32 = vadd.f32 %v3659_v31, %v3658_v27  ;;  %v3740_v37 = vrot.slane %v3739_v36, 2  ;;  %v5374_v31 = vld [vmem:[%s8769_s3 + $0x488] sm:$0xff] }
 0xb47   : > { %v3661_v35 = vrot.slane %v3660_v32, 1  ;;  %v3741_v38 = vadd.f32 %v3740_v37, %v3739_v36  ;;  %v5377_v37 = vld [vmem:[%s8769_s3 + $0x4a0] sm:$0xff] }
 0xb49   : > { %v3662_v30 = vadd.f32 %v3661_v35, %v3660_v32  ;;  %v3742_v39 = vrot.slane %v3741_v38, 1  ;;  %v7111_v32 = vpack.c.bf16 %v5374_v31, %v5373_v28  ;;  %v5376_v35 = vld [vmem:[%s8769_s3 + $0x498] sm:$0xff]  ;;  %v5419_v28 = vld [vmem:[%s8769_s3 + $0x5c8] sm:$0xff] }
 0xb4a   : > { %v7114_v36 = vpack.c.bf16 %v5376_v35, %v5375_v34  ;;  %v5421_v34 = vld [vmem:[%s8769_s3 + $0x5d8] sm:$0xff] }
 0xb4b   : > { %6476 = vmatmul.mubr.msk.f32.vlgmr.msra.gmra.mrb[10].mxu1 %vm1045_vm2, %v3662_v30  ;;  %v3743_v40 = vadd.f32 %v3742_v39, %v3741_v38  ;;  %v5378_v38 = vld [vmem:[%s8769_s3 + $0x4a8] sm:$0xff] }
 0xb4c   : > { %7088 = vmatpush3.bf16.msra.mxu1 %v7454_v23  ;;  %6494 = vmatprep.mubr.msk.f32.mxu1 %vm7331_vm0, %v7332_v6  ;;  %v7117_v39 = vpack.c.bf16 %v5378_v38, %v5377_v37  ;;  %v5423_v37 = vld [vmem:[%s8769_s3 + $0x5e8] sm:$0xff] }
 0xb4d   : > { %7089 = vmatprep.subr.bf16.mxu1 %v7330_v3 }
 0xb50   : > { %7091 = vmatpush3.bf16.msra.mxu1 %v7595_v8 }
 0xb51   : > { %7092 = vmatprep.subr.bf16.mxu1 %v7330_v3 }
 0xb54   : > { %7094 = vmatpush3.bf16.msra.mxu1 %v7607_v11 }
 0xb55   : > { %7095 = vmatprep.subr.bf16.mxu1 %v7330_v3 }
 0xb58   : > { %7097 = vmatpush3.bf16.msra.mxu1 %v7619_v14 }
 0xb59   : > { %6497 = vmatprep.subr.mxu1 %v7332_v6 }
 0xb5b   : > { %6495 = vmatmul.mubr.msk.f32.vlgmr.msra.gmra.mrb[12].mxu1 %vm1045_vm2, %v3743_v40  ;;  %v5379_v40 = vld [vmem:[%s8769_s3 + $0x4b0] sm:$0xff] }
 0xb5c   : > { %6498 = vmatpush3.msra.mxu1 %v8406_v42  ;;  %6499 = vmatprep.mubr.msk.f32.mxu1 %vm7331_vm0, %v7332_v6 }
 0xb5d   : > { %6502 = vmatprep.subr.mxu1 %v7332_v6 }
 0xc1e   : > { %v3732_v43 = vpop.f32.mrb[10].mxu1 }
 0xc1f   : > { %v3817_v44 = vmul.f32 0.015625, %v3732_v43  ;;  %v6477_v45 = vpop.f32.mrb[11].mxu1  ;;  %v5380_v43 = vld [vmem:[%s8769_s3 + $0x4b8] sm:$0xff] }
 0xc20   : > { %v5391_v45 = vld [vmem:[%s8769_s3 + $0x500] sm:$0xff] }
 0xc21   : > { %6500 = vmatmul.mubr.msk.f32.vlgmr.msra.gmra.mrb[14].mxu1 %vm1213_vm3, %v3817_v44  ;;  %v3819_v50 = vmul.f32 %v3817_v44, %v3817_v44  ;;  %v7120_v44 = vpack.c.bf16 %v5380_v43, %v5379_v40  ;;  %v5425_v40 = vld [vmem:[%s8769_s3 + $0x5f8] sm:$0xff] }
 0xc22   : > { %6503 = vmatpush3.msra.mxu1 %v8406_v42  ;;  %6504 = vmatprep.mubr.msk.f32.mxu1 %vm7331_vm0, %v7332_v6 }
 0xc23   : > { %7098 = vmatprep.subr.bf16.mxu1 %v7330_v3 }
 0xc2e   : > { %v3813_v49 = vpop.f32.mrb[12].mxu1 }
 0xc2f   : > { %v3818_v51 = vmul.f32 0.015625, %v3813_v49  ;;  %v6496_v52 = vpop.f32.mrb[13].mxu1  ;;  %v5392_v49 = vld [vmem:[%s8769_s3 + $0x508] sm:$0xff] }
 0xc30   : > { %v5394_v52 = vld [vmem:[%s8769_s3 + $0x518] sm:$0xff] }
 0xc31   : > { %v3820_v54 = vsub.f32 %v3818_v51, %v3819_v50  ;;  %v7123_v50 = vpack.c.bf16 %v5392_v49, %v5391_v45  ;;  %v5393_v51 = vld [vmem:[%s8769_s3 + $0x510] sm:$0xff]  ;;  %v5428_v45 = vld [vmem:[%s8769_s3 + $0x608] sm:$0xff] }
 0xc33   : > { %v3821_v56 = vadd.f32 1e-05, %v3820_v54  ;;  %v7126_v54 = vpack.c.bf16 %v5394_v52, %v5393_v51  ;;  %v5430_v51 = vld [vmem:[%s8769_s3 + $0x618] sm:$0xff] }
 0xc35   : > { %7315 = vrsqrt.f32 %v3821_v56  ;;  %v5395_v56 = vld [vmem:[%s8769_s3 + $0x520] sm:$0xff] }
 0xc3f   : > { %v7316_v33 = vpop.eup %7315 }
 0xc40   : > { %6505 = vmatmul.mubr.msk.f32.vlgmr.msra.gmra.mrb[16].mxu1 %vm1213_vm3, %v7316_v33  ;;  %v5396_v33 = vld [vmem:[%s8769_s3 + $0x528] sm:$0xff] }
 0xc41   : > { %6523 = vmatprep.mubr.msk.f32.mxu1 %vm7331_vm0, %v7332_v6  ;;  %7100 = vmatpush3.bf16.msra.mxu1 %v7099_v13  ;;  %v5410_v13 = vld [vmem:[%s8769_s3 + $0x588] sm:$0xff] }
 0xc42   : > { %7101 = vmatprep.subr.bf16.mxu1 %v7330_v3  ;;  %v7147_v55 = vpack.c.bf16 %v5410_v13, %v5409_v53  ;;  %v5447_v13 = vld [vmem:[%s8769_s3 + $0x690] sm:$0xff] }
 0xc45   : > { %7103 = vmatpush3.bf16.msra.mxu1 %v7102_v15  ;;  %v5411_v15 = vld [vmem:[%s8769_s3 + $0x590] sm:$0xff] }
 0xc46   : > { %7104 = vmatprep.subr.bf16.mxu1 %v7330_v3  ;;  %v7150_v17 = vpack.c.bf16 %v5412_v16, %v5411_v15 }
 0xc49   : > { %7106 = vmatpush3.bf16.msra.mxu1 %v7105_v18  ;;  %v5413_v18 = vld [vmem:[%s8769_s3 + $0x5a0] sm:$0xff] }
 0xc4a   : > { %7107 = vmatprep.subr.bf16.mxu1 %v7330_v3 }
 0xcf4   : > { %v3892_v57 = vpop.f32.mrb[14].mxu1 }
 0xcf5   : > { %v3972_v58 = vrot.slane %v3892_v57, %v7661_v47  ;;  %v6501_v59 = vpop.f32.mrb[15].mxu1  ;;  %v7129_v57 = vpack.c.bf16 %v5396_v33, %v5395_v56  ;;  %v5431_v56 = vld [vmem:[%s8769_s3 + $0x620] sm:$0xff]  ;;  %v5432_v33 = vld [vmem:[%s8769_s3 + $0x628] sm:$0xff] }
 0xcf6   : > { %v5398_v59 = vld [vmem:[%s8769_s3 + $0x538] sm:$0xff] }
 0xcf7   : > { %v3973_v60 = vsub.f32 %v3651_v20, %v3972_v58  ;;  %v5388_v20 = vld [vmem:[%s8769_s3 + $0x4f8] sm:$0xff]  ;;  %v5397_v58 = vld [vmem:[%s8769_s3 + $0x530] sm:$0xff] }
 0xcf8   : > { %v7108_v21 = vpack.c.bf16 %v5388_v20, %v5387_v19  ;;  %v5414_v19 = vld [vmem:[%s8769_s3 + $0x5a8] sm:$0xff] }
 0xcf9   : > { %v7153_v20 = vpack.c.bf16 %v5414_v19, %v5413_v18  ;;  %v5450_v18 = vld [vmem:[%s8769_s3 + $0x6a8] sm:$0xff] }
 0xcfa   : > { %7109 = vmatpush3.bf16.msra.mxu1 %v7108_v21  ;;  %v5415_v21 = vld [vmem:[%s8769_s3 + $0x5b0] sm:$0xff] }
 0xcfb   : > { %7110 = vmatprep.subr.bf16.mxu1 %v7330_v3 }
 0xd13   : > { %v3965_v63 = vpop.f32.mrb[16].mxu1 }
 0xd14   : > { %v3977_v0 = vrot.slane %v3965_v63, %v7661_v47  ;;  %v6506_v5 = vpop.f32.mrb[17].mxu1  ;;  %v5401_v63 = vld [vmem:[%s8769_s3 + $0x548] sm:$0xff] }
 0xd15   : > { %v5403_v5 = vld [vmem:[%s8769_s3 + $0x558] sm:$0xff] }
 0xd16   : > { %v3978_v29 = vmul.f32 %v3977_v0, %v3973_v60  ;;  %v7132_v60 = vpack.c.bf16 %v5398_v59, %v5397_v58  ;;  %v7135_v0 = vpack.c.bf16 %v5401_v63, %v5400_v61  ;;  %v5433_v58 = vld [vmem:[%s8769_s3 + $0x630] sm:$0xff]  ;;  %v5434_v59 = vld [vmem:[%s8769_s3 + $0x638] sm:$0xff]  ;;  %v5436_v61 = vld [vmem:[%s8769_s3 + $0x640] sm:$0xff] }
 0xd17   : > { %v5437_v63 = vld [vmem:[%s8769_s3 + $0x648] sm:$0xff] }
 0xd18   : > { %v3983_v24 = vmul.f32 %v3982_v2, %v3978_v29  ;;  %v5402_v2 = vld [vmem:[%s8769_s3 + $0x550] sm:$0xff] }
 0xd1a   : > { %v3988_v41 = vadd.f32 %v3987_v9, %v3983_v24  ;;  %v7138_v9 = vpack.c.bf16 %v5403_v5, %v5402_v2  ;;  %v5404_v24 = vld [vmem:[%s8769_s3 + $0x560] sm:$0xff]  ;;  %v5438_v2 = vld [vmem:[%s8769_s3 + $0x650] sm:$0xff]  ;;  %v5439_v5 = vld [vmem:[%s8769_s3 + $0x658] sm:$0xff] }
 0xd1c   : > { %vm3989_vm9 = vcmp.ge.f32.partialorder %v3988_v41, 0.0  ;;  %v3990_v48 = vmul.f32 0.01, %v3988_v41 }
 0xd1e   : > { %v3991_v10 = vsel %vm3989_vm9, %v3988_v41, %v3990_v48  ;;  %v5405_v41 = vld [vmem:[%s8769_s3 + $0x568] sm:$0xff] }
 0xd1f   : > { %3993 = vrot.lane.b32.xlu0 %v3991_v10, %s7333_s30  ;;  %v7141_v48 = vpack.c.bf16 %v5405_v41, %v5404_v24  ;;  %v5406_v10 = vld [vmem:[%s8769_s3 + $0x570] sm:$0xff]  ;;  %v5441_v24 = vld [vmem:[%s8769_s3 + $0x668] sm:$0xff] }
 0xd20   : > { %v7144_v4 = vpack.c.bf16 %v5407_v62, %v5406_v10  ;;  %v5445_v62 = vld [vmem:[%s8769_s3 + $0x680] sm:$0xff] }
 0xd91   : > { %v3994_v22 = vpop.permute.xlu0 %3993 }
 0xd92   : > { %3996 = vst.msk [vmem:[#allocation2 + $0x1] sm:$0xff] %vm1387_vm7, %v3994_v22  ;;  %v5416_v22 = vld [vmem:[%s8769_s3 + $0x5b8] sm:$0xff] }
 0xd99   : > { %v3997_v25 = vld [vmem:[#allocation2] sm:$0xff] }
 0xd9a   : > { %4172 = vrot.lane.b32.xlu0 %v3997_v25, %s7334_s25  ;;  %4017 = vrot.lane.b32.xlu1 %v3997_v25, %s7335_s26  ;;  %v8467_v26 = vld [vmem:[#allocation2 + $0x1] sm:$0xff] }
 0xd9b   : > { %v8473_v27 = vld [vmem:[#allocation2 + $0x2] sm:$0xff] }
 0xd9e   : > { %4424 = vrot.lane.b32.xlu0 %v8467_v26, %s7334_s25  ;;  %4340 = vrot.lane.b32.xlu1 %v8467_v26, %s7335_s26 }
 0xda2   : > { %4676 = vrot.lane.b32.xlu0 %v8473_v27, %s7334_s25  ;;  %4592 = vrot.lane.b32.xlu1 %v8473_v27, %s7335_s26  ;;  %s5148_s25 = sshll.u32 %s8776_s28, 3 }
 0xda3   : > { %s303_s12 = scalar_lea.vmem %s8774_s8, %s5148_s25 }
 0xe0c   : > { %v4018_v30 = vpop.permute.xlu1 %4017  ;;  %v4173_v29 = vpop.permute.xlu0 %4172 }
 0xe0d   : > { %6524 = vmatmul.mubr.msk.f32.vlgmr.msra.gmra.mrb[18].mxu1 %vm1045_vm2, %v4018_v30 }
 0xe0e   : > { %7112 = vmatpush3.bf16.msra.mxu1 %v7111_v32  ;;  %6542 = vmatprep.mubr.msk.f32.mxu1 %vm7331_vm0, %v7332_v6  ;;  %v5420_v32 = vld [vmem:[%s8769_s3 + $0x5d0] sm:$0xff] }
 0xe0f   : > { %7113 = vmatprep.subr.bf16.mxu1 %v7330_v3  ;;  %v7162_v30 = vpack.c.bf16 %v5421_v34, %v5420_v32 }
 0xe10   : > { %v4341_v35 = vpop.permute.xlu1 %4340  ;;  %v4425_v52 = vpop.permute.xlu0 %4424 }
 0xe12   : > { %7115 = vmatpush3.bf16.msra.mxu1 %v7114_v36  ;;  %v5422_v36 = vld [vmem:[%s8769_s3 + $0x5e0] sm:$0xff] }
 0xe13   : > { %7116 = vmatprep.subr.bf16.mxu1 %v7330_v3  ;;  %v7165_v38 = vpack.c.bf16 %v5423_v37, %v5422_v36 }
 0xe14   : > { %v4593_v15 = vpop.permute.xlu1 %4592 }
 0xe16   : > { %7118 = vmatpush3.bf16.msra.mxu1 %v7117_v39  ;;  %v5424_v39 = vld [vmem:[%s8769_s3 + $0x5f0] sm:$0xff] }
 0xe17   : > { %7119 = vmatprep.subr.bf16.mxu1 %v7330_v3  ;;  %v7168_v43 = vpack.c.bf16 %v5425_v40, %v5424_v39 }
 0xe1a   : > { %7121 = vmatpush3.bf16.msra.mxu1 %v7120_v44  ;;  %v5427_v44 = vld [vmem:[%s8769_s3 + $0x600] sm:$0xff] }
 0xe1b   : > { %7122 = vmatprep.subr.bf16.mxu1 %v7330_v3  ;;  %v7171_v49 = vpack.c.bf16 %v5428_v45, %v5427_v44 }
 0xe1d   : > { %6543 = vmatmul.mubr.msk.f32.vlgmr.msra.gmra.mrb[18].mxu1 %vm1045_vm2, %v3997_v25  ;;  %v7156_v25 = vpack.c.bf16 %v5416_v22, %v5415_v21  ;;  %v5452_v21 = vld [vmem:[%s8769_s3 + $0x6b8] sm:$0xff] }
 0xe1e   : > { %7124 = vmatpush3.bf16.msra.mxu1 %v7123_v50  ;;  %6561 = vmatprep.mubr.msk.f32.mxu1 %vm7331_vm0, %v7332_v6  ;;  %v5429_v50 = vld [vmem:[%s8769_s3 + $0x610] sm:$0xff] }
 0xe1f   : > { %7125 = vmatprep.subr.bf16.mxu1 %v7330_v3 }
 0xe22   : > { %7127 = vmatpush3.bf16.msra.mxu1 %v7126_v54  ;;  %v7174_v54 = vpack.c.bf16 %v5430_v51, %v5429_v50 }
 0xe23   : > { %7128 = vmatprep.subr.bf16.mxu1 %v7330_v3 }
 0xe26   : > { %7130 = vmatpush3.bf16.msra.mxu1 %v7129_v57  ;;  %v7177_v57 = vpack.c.bf16 %v5432_v33, %v5431_v56 }
 0xe27   : > { %7131 = vmatprep.subr.bf16.mxu1 %v7330_v3 }
 0xe2a   : > { %7133 = vmatpush3.bf16.msra.mxu1 %v7132_v60  ;;  %v7180_v60 = vpack.c.bf16 %v5434_v59, %v5433_v58 }
 0xe2b   : > { %7134 = vmatprep.subr.bf16.mxu1 %v7330_v3 }
 0xe2d   : > { %6562 = vmatmul.mubr.msk.f32.vlgmr.msra.gmra.mrb[18].mxu1 %vm1045_vm2, %v4173_v29  ;;  %v7186_v29 = vpack.c.bf16 %v5439_v5, %v5438_v2 }
 0xe2e   : > { %7136 = vmatpush3.bf16.msra.mxu1 %v7135_v0  ;;  %6580 = vmatprep.mubr.msk.f32.mxu1 %vm7331_vm0, %v7332_v6  ;;  %v7183_v0 = vpack.c.bf16 %v5437_v63, %v5436_v61 }
 0xe2f   : > { %7137 = vmatprep.subr.bf16.mxu1 %v7330_v3 }
 0xe32   : > { %7139 = vmatpush3.bf16.msra.mxu1 %v7138_v9  ;;  %v5440_v9 = vld [vmem:[%s8769_s3 + $0x660] sm:$0xff] }
 0xe33   : > { %7140 = vmatprep.subr.bf16.mxu1 %v7330_v3  ;;  %v7189_v41 = vpack.c.bf16 %v5441_v24, %v5440_v9 }
 0xe36   : > { %7142 = vmatpush3.bf16.msra.mxu1 %v7141_v48  ;;  %v5443_v48 = vld [vmem:[%s8769_s3 + $0x678] sm:$0xff] }
 0xe37   : > { %7143 = vmatprep.subr.bf16.mxu1 %v7330_v3 }
 0xe3a   : > { %7145 = vmatpush3.bf16.msra.mxu1 %v7144_v4  ;;  %v5446_v4 = vld [vmem:[%s8769_s3 + $0x688] sm:$0xff] }
 0xe3b   : > { %7146 = vmatprep.subr.bf16.mxu1 %v7330_v3  ;;  %v7195_v53 = vpack.c.bf16 %v5446_v4, %v5445_v62 }
 0xe3d   : > { %6581 = vmatmul.mubr.msk.f32.vlgmr.msra.gmra.mrb[18].mxu1 %vm1045_vm2, %v8467_v26  ;;  %v5418_v26 = vld [vmem:[%s8769_s3 + $0x5c0] sm:$0xff] }
 0xe3e   : > { %7148 = vmatpush3.bf16.msra.mxu1 %v7147_v55  ;;  %6599 = vmatprep.mubr.msk.f32.mxu1 %vm7331_vm0, %v7332_v6  ;;  %v7159_v31 = vpack.c.bf16 %v5419_v28, %v5418_v26  ;;  %v5448_v55 = vld [vmem:[%s8769_s3 + $0x698] sm:$0xff] }
 0xe3f   : > { %7149 = vmatprep.subr.bf16.mxu1 %v7330_v3  ;;  %v7198_v16 = vpack.c.bf16 %v5448_v55, %v5447_v13 }
 0xe42   : > { %7151 = vmatpush3.bf16.msra.mxu1 %v7150_v17  ;;  %v5449_v17 = vld [vmem:[%s8769_s3 + $0x6a0] sm:$0xff] }
 0xe43   : > { %7152 = vmatprep.subr.bf16.mxu1 %v7330_v3  ;;  %v7201_v19 = vpack.c.bf16 %v5450_v18, %v5449_v17 }
 0xe46   : > { %7154 = vmatpush3.bf16.msra.mxu1 %v7153_v20  ;;  %v5451_v20 = vld [vmem:[%s8769_s3 + $0x6b0] sm:$0xff] }
 0xe47   : > { %7155 = vmatprep.subr.bf16.mxu1 %v7330_v3  ;;  %v7204_v22 = vpack.c.bf16 %v5452_v21, %v5451_v20 }
 0xe4a   : > { %7157 = vmatpush3.bf16.msra.mxu1 %v7156_v25  ;;  %v4677_v25 = vpop.permute.xlu0 %4676 }
 0xe4b   : > { %7158 = vmatprep.subr.bf16.mxu1 %v7330_v3 }
 0xe4d   : > { %6600 = vmatmul.mubr.msk.f32.vlgmr.msra.gmra.mrb[18].mxu1 %vm1045_vm2, %v4341_v35 }
 0xe4e   : > { %7160 = vmatpush3.bf16.msra.mxu1 %v7159_v31  ;;  %6618 = vmatprep.mubr.msk.f32.mxu1 %vm7331_vm0, %v7332_v6 }
 0xe4f   : > { %7161 = vmatprep.subr.bf16.mxu1 %v7330_v3 }
 0xe52   : > { %7163 = vmatpush3.bf16.msra.mxu1 %v7162_v30 }
 0xe53   : > { %7164 = vmatprep.subr.bf16.mxu1 %v7330_v3 }
 0xe56   : > { %7166 = vmatpush3.bf16.msra.mxu1 %v7165_v38 }
 0xe57   : > { %7167 = vmatprep.subr.bf16.mxu1 %v7330_v3 }
 0xe5a   : > { %7169 = vmatpush3.bf16.msra.mxu1 %v7168_v43 }
 0xe5b   : > { %7170 = vmatprep.subr.bf16.mxu1 %v7330_v3 }
 0xe5d   : > { %6619 = vmatmul.mubr.msk.f32.vlgmr.msra.gmra.mrb[18].mxu1 %vm1045_vm2, %v4425_v52 }
 0xe5e   : > { %7172 = vmatpush3.bf16.msra.mxu1 %v7171_v49  ;;  %6637 = vmatprep.mubr.msk.f32.mxu1 %vm7331_vm0, %v7332_v6 }
 0xe5f   : > { %7173 = vmatprep.subr.bf16.mxu1 %v7330_v3 }
 0xe62   : > { %7175 = vmatpush3.bf16.msra.mxu1 %v7174_v54 }
 0xe63   : > { %7176 = vmatprep.subr.bf16.mxu1 %v7330_v3 }
 0xe66   : > { %7178 = vmatpush3.bf16.msra.mxu1 %v7177_v57 }
 0xe67   : > { %7179 = vmatprep.subr.bf16.mxu1 %v7330_v3 }
 0xe6a   : > { %7181 = vmatpush3.bf16.msra.mxu1 %v7180_v60 }
 0xe6b   : > { %7182 = vmatprep.subr.bf16.mxu1 %v7330_v3 }
 0xe6d   : > { %6638 = vmatmul.mubr.msk.f32.vlgmr.msra.gmra.mrb[18].mxu1 %vm1045_vm2, %v8473_v27  ;;  %v5442_v27 = vld [vmem:[%s8769_s3 + $0x670] sm:$0xff] }
 0xe6e   : > { %7184 = vmatpush3.bf16.msra.mxu1 %v7183_v0  ;;  %6656 = vmatprep.mubr.msk.f32.mxu1 %vm7331_vm0, %v7332_v6  ;;  %v7192_v10 = vpack.c.bf16 %v5443_v48, %v5442_v27 }
 0xe6f   : > { %7185 = vmatprep.subr.bf16.mxu1 %v7330_v3 }
 0xe72   : > { %7187 = vmatpush3.bf16.msra.mxu1 %v7186_v29 }
 0xe73   : > { %7188 = vmatprep.subr.bf16.mxu1 %v7330_v3 }
 0xe76   : > { %7190 = vmatpush3.bf16.msra.mxu1 %v7189_v41 }
 0xe77   : > { %7191 = vmatprep.subr.bf16.mxu1 %v7330_v3 }
 0xe7a   : > { %7193 = vmatpush3.bf16.msra.mxu1 %v7192_v10 }
 0xe7b   : > { %7194 = vmatprep.subr.bf16.mxu1 %v7330_v3 }
 0xe7d   : > { %6657 = vmatmul.mubr.msk.f32.vlgmr.msra.gmra.mrb[18].mxu1 %vm1045_vm2, %v4593_v15 }
 0xe7e   : > { %7196 = vmatpush3.bf16.msra.mxu1 %v7195_v53  ;;  %6675 = vmatprep.mubr.msk.f32.mxu1 %vm7331_vm0, %v7332_v6 }
 0xe7f   : > { %7197 = vmatprep.subr.bf16.mxu1 %v7330_v3 }
 0xe82   : > { %7199 = vmatpush3.bf16.msra.mxu1 %v7198_v16 }
 0xe83   : > { %7200 = vmatprep.subr.bf16.mxu1 %v7330_v3 }
 0xe86   : > { %7202 = vmatpush3.bf16.msra.mxu1 %v7201_v19 }
 0xe87   : > { %7203 = vmatprep.subr.bf16.mxu1 %v7330_v3 }
 0xe8a   : > { %7205 = vmatpush3.bf16.msra.mxu1 %v7204_v22 }
 0xe8d   : > { %6676 = vmatmul.mubr.msk.f32.vlgmr.msra.gmra.mrb[18].mxu1 %vm1045_vm2, %v4677_v25 }
 0xf60   : > { %v4746_v26 = vpop.f32.mrb[18].mxu1 }
 0xf61   : > { %v4751_v28 = vsel %vm1045_vm2, %v4746_v26, 0.0  ;;  %v4831_v31 = vmul.f32 %v4746_v26, %v4746_v26  ;;  %v6677_v32 = vpop.f32.mrb[19].mxu1 }
 0xf62   : > { %v4752_v34 = vrot.slane %v4751_v28, 4 }
 0xf63   : > { %v4832_v30 = vsel %vm1045_vm2, %v4831_v31, 0.0 }
 0xf64   : > { %v4753_v35 = vadd.f32 %v4752_v34, %v4751_v28  ;;  %v4833_v38 = vrot.slane %v4832_v30, 4 }
 0xf66   : > { %v4754_v36 = vrot.slane %v4753_v35, 2  ;;  %v4834_v43 = vadd.f32 %v4833_v38, %v4832_v30 }
 0xf68   : > { %v4755_v37 = vadd.f32 %v4754_v36, %v4753_v35  ;;  %v4835_v44 = vrot.slane %v4834_v43, 2 }
 0xf6a   : > { %v4756_v39 = vrot.slane %v4755_v37, 1  ;;  %v4836_v45 = vadd.f32 %v4835_v44, %v4834_v43 }
 0xf6c   : > { %v4757_v40 = vadd.f32 %v4756_v39, %v4755_v37  ;;  %v4837_v49 = vrot.slane %v4836_v45, 1 }
 0xf6e   : > { %6695 = vmatmul.mubr.msk.f32.vlgmr.msra.gmra.mrb[22].mxu0 %vm1045_vm2, %v4757_v40  ;;  %v4838_v50 = vadd.f32 %v4837_v49, %v4836_v45 }
 0xf6f   : > { %7220 = vmatpush3.bf16.msra.mxu0 %v7454_v23  ;;  %6713 = vmatprep.mubr.msk.f32.mxu0 %vm7331_vm0, %v7332_v6 }
 0xf70   : > { %7221 = vmatprep.subr.bf16.mxu0 %v7330_v3 }
 0xf73   : > { %7223 = vmatpush3.bf16.msra.mxu0 %v7595_v8 }
 0xf74   : > { %7224 = vmatprep.subr.bf16.mxu0 %v7330_v3 }
 0xf77   : > { %7226 = vmatpush3.bf16.msra.mxu0 %v7607_v11 }
 0xf78   : > { %7227 = vmatprep.subr.bf16.mxu0 %v7330_v3 }
 0xf7b   : > { %7229 = vmatpush3.bf16.msra.mxu0 %v7619_v14 }
 0xf7c   : > { %6716 = vmatprep.subr.mxu0 %v7332_v6 }
 0xf7e   : > { %6714 = vmatmul.mubr.msk.f32.vlgmr.msra.gmra.mrb[24].mxu0 %vm1045_vm2, %v4838_v50 }
 0xf7f   : > { %6717 = vmatpush3.msra.mxu0 %v8406_v42  ;;  %6718 = vmatprep.mubr.msk.f32.mxu0 %vm7331_vm0, %v7332_v6 }
 0xf80   : > { %6721 = vmatprep.subr.mxu0 %v7332_v6 }
0x1041   : > { %v4827_v23 = vpop.f32.mrb[22].mxu0 }
0x1042   : > { %v4912_v8 = vmul.f32 0.015625, %v4827_v23  ;;  %v6696_v11 = vpop.f32.mrb[23].mxu0 }
0x1044   : > { %6719 = vmatmul.mubr.msk.f32.vlgmr.msra.gmra.mrb[26].mxu0 %vm1213_vm3, %v4912_v8  ;;  %v4914_v14 = vmul.f32 %v4912_v8, %v4912_v8 }
0x1045   : > { %6722 = vmatpush3.msra.mxu0 %v8406_v42  ;;  %6723 = vmatprep.mubr.msk.f32.mxu0 %vm7331_vm0, %v7332_v6  ;;  %v5076_v42 = vsub.s32 4, %v7658_v46 }
0x1047   : > { %v5077_v63 = vrot.slane %v8426_v1, %v5076_v42  ;;  %v5082_v5 = vrot.slane %v8432_v7, %v5076_v42 }
0x1051   : > { %v4908_v3 = vpop.f32.mrb[24].mxu0 }
0x1052   : > { %v4913_v51 = vmul.f32 0.015625, %v4908_v3  ;;  %v6715_v52 = vpop.f32.mrb[25].mxu0 }
0x1054   : > { %v4915_v54 = vsub.f32 %v4913_v51, %v4914_v14 }
0x1056   : > { %v4916_v56 = vadd.f32 1e-05, %v4915_v54 }
0x1058   : > { %7317 = vrsqrt.f32 %v4916_v56 }
0x1062   : > { %v7318_v33 = vpop.eup %7317 }
0x1063   : > { %6724 = vmatmul.mubr.msk.f32.vlgmr.msra.gmra.mrb[28].mxu0 %vm1213_vm3, %v7318_v33 }
0x1117   : > { %v4987_v57 = vpop.f32.mrb[26].mxu0 }
0x1118   : > { %v5067_v58 = vrot.slane %v4987_v57, %v7661_v47  ;;  %v6720_v59 = vpop.f32.mrb[27].mxu0 }
0x111a   : > { %v5068_v60 = vsub.f32 %v4746_v26, %v5067_v58 }
0x1136   : > { %v5060_v61 = vpop.f32.mrb[28].mxu0 }
0x1137   : > { %v5072_v6 = vrot.slane %v5060_v61, %v7661_v47  ;;  %v6725_v0 = vpop.f32.mrb[29].mxu0 }
0x1139   : > { %v5073_v2 = vmul.f32 %v5072_v6, %v5068_v60 }
0x113b   : > { %v5078_v29 = vmul.f32 %v5077_v63, %v5073_v2 }
0x113d   : > { %v5083_v9 = vadd.f32 %v5082_v5, %v5078_v29 }
0x113f   : > { %v5084_v24 = vadd.f32 %v5083_v9, %v8081_v12 }
0x1141   : > { %vm5085_vm10 = vcmp.ge.f32.partialorder %v5084_v24, 0.0  ;;  %v5086_v46 = vmul.f32 0.01, %v5084_v24 }
0x1143   : > { %v5087_v41 = vsel %vm5085_vm10, %v5084_v24, %v5086_v46 }
0x1144   : > { %5088 = vst.msk [vmem:[%s303_s12] sm:$0xff] %vm1045_vm2, %v5087_v41 }
0x1145 PF: > { %s18_s27 = sadd.s32 1, %s7328_s27  }
0x1146   : > { %p15_p4 = scmp.ge.s32.totalorder %s18_s27, 4  }
0x1148   :  { %17 = sbr.rel (!%p15_p4) target bundleno = 1 (0x1), region = 124 }

</bundles_post_ra>
